<compile_context>
chip_gen: v6e
topology: v6e:2x2x1
jax: 0.10.0
libtpu: 0.0.40
codegen_flags: <defaults>
</compile_context>

<pallas_src>
import math

import jax
import jax.numpy as jnp
from jax.experimental import pallas as pl
from jax.experimental.pallas import tpu as pltpu


# ----------------------------------------------------------------------------
# tile-size helpers
# ----------------------------------------------------------------------------
def _round_up(v, m):
    return ((v + m - 1) // m) * m


def _pick_row_tile(h, w, max_rows=1024):
    """Image rows per tile. TH must divide H and TH*W must be a multiple of 8
    (a single full-image tile is always legal as a full-dim block)."""
    if h * w <= max_rows:
        return h
    cands = [th for th in range(1, h + 1)
             if h % th == 0 and th * w <= max_rows and (th * w) % 8 == 0]
    return max(cands) if cands else h


def _pick_cout_tile(cout_pad, max_tn=512):
    if cout_pad <= max_tn:
        return cout_pad
    return 256 if cout_pad % 256 == 0 else 128


# ----------------------------------------------------------------------------
# Fused dual-modality conv (stride=1, dilation=1, groups=1) + folded BN + SiLU
# ----------------------------------------------------------------------------
def fused_dual_conv_bn_silu(x, w, scale, shift, k, pad):
    """x: (2, N, H, W, Cin) f32, w: (2, Cout, Cin, k, k), scale/shift: (2, Cout).
    Returns (2, N, H, W, Cout) f32."""
    assert x.shape[0] == 2 and pad == k // 2, "only 'same' k//2 padding, stride 1"
    _, n_img, h_img, w_img, cin = x.shape
    cout = w.shape[1]

    cout_pad = max(128, _round_up(cout, 128))          # lane-dense output
    tn = _pick_cout_tile(cout_pad)
    ct = cout_pad // tn
    th = _pick_row_tile(h_img, w_img)
    tm = th * w_img                                    # rows per output tile
    mt = h_img // th
    P = pad * w_img + pad                              # flat zero-pad each end
    mp = h_img * w_img + 2 * P                         # padded flat length

    # activation: flatten spatial; zero-pad P rows front/back (covers the H
    # 'same' padding and the +/-pad column shift of the edge rows).
    xf = x.astype(jnp.float32).reshape(2, n_img, h_img * w_img, cin)
    if P > 0:
        xf = jnp.pad(xf, ((0, 0), (0, 0), (P, P), (0, 0)))

    # composed LoRA weight -> (modality, tap, Cin, Cout_pad), bf16 for the MXU.
    wt = jnp.transpose(w, (0, 3, 4, 2, 1)).reshape(2, k * k, cin, cout)
    wt = jnp.pad(wt, ((0, 0), (0, 0), (0, 0), (0, cout_pad - cout))).astype(jnp.bfloat16)
    sc = jnp.pad(scale, ((0, 0), (0, cout_pad - cout))).reshape(2, 1, cout_pad).astype(jnp.float32)
    sh = jnp.pad(shift, ((0, 0), (0, cout_pad - cout))).reshape(2, 1, cout_pad).astype(jnp.float32)

    def kernel(x_ref, w_ref, scale_ref, shift_ref, o_ref):
        # x_ref: (Mp, Cin) resident padded image   w_ref: (k*k, Cin, TN) bf16
        # scale_ref/shift_ref: (1, TN)             o_ref: (TM, TN)
        s = pl.program_id(3)
        base = pl.multiple_of(s * tm, 8)
        if pad > 0:
            col = jax.lax.broadcasted_iota(jnp.int32, (tm, 1), 0) % w_img
        acc = jnp.zeros((tm, tn), jnp.float32)
        for t in range(k * k):                       # static tap unroll
            kh, kw = divmod(t, k)
            win = x_ref[pl.ds(base + kh * w_img + kw, tm), :]
            if pad > 0 and kw != pad:                # mask wrapped border columns
                cc = col + (kw - pad)
                win = jnp.where((cc >= 0) & (cc < w_img), win, 0.0)
            acc = acc + jnp.dot(win.astype(jnp.bfloat16), w_ref[t],
                                preferred_element_type=jnp.float32)
        y = acc * scale_ref[...] + shift_ref[...]    # folded BN
        y = y * pl.reciprocal(1.0 + jnp.exp(-y), approx=True)   # SiLU (EUP recip)
        o_ref[...] = y.astype(o_ref.dtype)

    out = pl.pallas_call(
        kernel,
        out_shape=jax.ShapeDtypeStruct((2, n_img, h_img * w_img, cout_pad), jnp.float32),
        grid=(2, n_img, ct, mt),
        in_specs=[
            pl.BlockSpec((None, None, mp, cin), lambda m, n, j, s: (m, n, 0, 0)),
            pl.BlockSpec((None, k * k, cin, tn), lambda m, n, j, s: (m, 0, 0, j)),
            pl.BlockSpec((None, 1, tn), lambda m, n, j, s: (m, 0, j)),
            pl.BlockSpec((None, 1, tn), lambda m, n, j, s: (m, 0, j)),
        ],
        out_specs=pl.BlockSpec((None, None, tm, tn), lambda m, n, j, s: (m, n, s, j)),
        compiler_params=pltpu.CompilerParams(
            dimension_semantics=("parallel", "parallel", "parallel", "parallel"),
            vmem_limit_bytes=48 * 1024 * 1024),      # safe on v5e/v6e/v7x
    )(xf, wt, sc, sh)

    out = out.reshape(2, n_img, h_img, w_img, cout_pad)[..., :cout]
    return out


# Pure-JAX reference with matching numerics (bf16 operands, f32 accumulation).
def ref_dual_conv_bn_silu(x, w, scale, shift, k, pad):
    outs = []
    for m in range(2):
        w_hwio = jnp.transpose(w[m], (2, 3, 1, 0)).astype(jnp.bfloat16)
        y = jax.lax.conv_general_dilated(
            x[m].astype(jnp.bfloat16), w_hwio, window_strides=(1, 1),
            padding=[(pad, pad), (pad, pad)],
            dimension_numbers=("NHWC", "HWIO", "NHWC"),
            preferred_element_type=jnp.float32)
        y = y * scale[m].reshape(1, 1, 1, -1) + shift[m].reshape(1, 1, 1, -1)
        outs.append(y * jax.nn.sigmoid(y))
    return jnp.stack(outs, 0)


# ----------------------------------------------------------------------------
# Deterministic parameter construction (mirrors the PyTorch __init__ shapes)
# ----------------------------------------------------------------------------
def _kaiming_uniform(key, shape):
    bound = 1.0 / math.sqrt(shape[1])     # kaiming_uniform_(a=sqrt(5)), fan_in = shape[1]
    return jax.random.uniform(key, shape, jnp.float32, -bound, bound)


def make_lora_conv_weights(key, c1, c2, k, r, lora_alpha):
    """Conv2d_all_lora_m: compose per-modality effective conv weights (OIHW)."""
    base = c1 * c2 * k * k / (c1 * k + c2 * k)
    inter_r = max(int(math.floor(base * r)), 1)
    inter_aux = max(int(math.floor(base * (1.0 - r))), 1)
    ks = jax.random.split(key, 6)
    lora_A = _kaiming_uniform(ks[0], (inter_r, c2 * k))
    lora_B = _kaiming_uniform(ks[1], (k * c1, inter_r))
    lora_A_rgb = _kaiming_uniform(ks[2], (inter_aux, c2 * k))
    lora_B_rgb = _kaiming_uniform(ks[3], (k * c1, inter_aux))
    lora_A_ir = _kaiming_uniform(ks[4], (inter_aux, c2 * k))
    lora_B_ir = _kaiming_uniform(ks[5], (k * c1, inter_aux))
    scaling = lora_alpha / r

    def compose(B_aux, A_aux):
        M = jnp.concatenate([lora_B, B_aux], axis=1) @ jnp.concatenate([lora_A, A_aux], axis=0)
        return (M.reshape(c2, c1, k, k) * scaling).astype(jnp.float32)  # same .view as torch

    return compose(lora_B_rgb, lora_A_rgb), compose(lora_B_ir, lora_A_ir)


def make_conv_layer(key, c1, c2, k, r, lora_alpha):
    """Conv_all_lora_m: LoRA conv + per-modality BatchNorm (eval mode) + SiLU."""
    k_lora, k_bn = jax.random.split(key)
    w_rgb, w_ir = make_lora_conv_weights(k_lora, c1, c2, k, r, lora_alpha)
    kb = jax.random.split(k_bn, 8)

    def bn_affine(ks4):
        eps = 1e-5
        gamma = jax.random.uniform(ks4[0], (c2,), jnp.float32, 0.5, 1.5)
        beta = jax.random.uniform(ks4[1], (c2,), jnp.float32, -0.2, 0.2)
        mean = jax.random.uniform(ks4[2], (c2,), jnp.float32, -0.2, 0.2)
        var = jax.random.uniform(ks4[3], (c2,), jnp.float32, 0.5, 1.5)
        s = gamma / jnp.sqrt(var + eps)
        return s, beta - mean * s

    scale_rgb, shift_rgb = bn_affine(kb[:4])
    scale_ir, shift_ir = bn_affine(kb[4:])
    return dict(w=jnp.stack([w_rgb, w_ir], 0),
                scale=jnp.stack([scale_rgb, scale_ir], 0),
                shift=jnp.stack([shift_rgb, shift_ir], 0),
                k=k, pad=k // 2)  # autopad(k) with p=None, d=1


def make_c2f_params(key, c1, c2, n=1, shortcut=False, r=0.5, lora_alpha=1.0, e=0.5):
    c = int(c2 * e)
    keys = jax.random.split(key, 2 + n)
    params = {"c": c,
              "cv1": make_conv_layer(keys[0], c1, 2 * c, 1, r, lora_alpha),
              "cv2": make_conv_layer(keys[1], (2 + n) * c, c2, 1, r, lora_alpha),
              "m": []}
    for i in range(n):
        kb1, kb2 = jax.random.split(keys[2 + i])
        params["m"].append({
            "cv1": make_conv_layer(kb1, c, c, 3, r, lora_alpha),  # Bottleneck e=1.0
            "cv2": make_conv_layer(kb2, c, c, 3, r, lora_alpha),
            "add": bool(shortcut),  # c1 == c2 inside the bottleneck
        })
    return params


# ----------------------------------------------------------------------------
# C2f_all_lora_m forward (both modalities carried as one stacked tensor)
# ----------------------------------------------------------------------------
def c2f_all_lora_m_forward(params, x_rgb_nchw, x_ir_nchw,
                           conv_impl=fused_dual_conv_bn_silu):
    x = jnp.stack([x_rgb_nchw, x_ir_nchw], 0)         # (2, N, C, H, W)
    x = jnp.transpose(x, (0, 1, 3, 4, 2))             # (2, N, H, W, C)

    def conv(p, z):
        return conv_impl(z, p["w"], p["scale"], p["shift"], p["k"], p["pad"])

    y = conv(params["cv1"], x)                        # (2, N, H, W, 2c)
    c = params["c"]
    ys = [y[..., :c], y[..., c:]]                     # chunk(2, dim=C)
    for bp in params["m"]:
        b = conv(bp["cv2"], conv(bp["cv1"], ys[-1]))
        if bp["add"]:
            b = b + ys[-1]
        ys.append(b)
    out = conv(params["cv2"], jnp.concatenate(ys, axis=-1))
    return (jnp.transpose(out[0], (0, 3, 1, 2)),
            jnp.transpose(out[1], (0, 3, 1, 2)))


# ----------------------------------------------------------------------------
if __name__ == "__main__":
    key = jax.random.PRNGKey(0)
    k_rgb, k_ir, k_par = jax.random.split(key, 3)

    # small shapes consistent with the module: tuple input (x_rgb, x_ir), NCHW
    N, C1, H, W = 2, 4, 16, 16
    C2, n_bneck = 4, 1
    x_rgb = jax.random.normal(k_rgb, (N, C1, H, W), jnp.float32)
    x_ir = jax.random.normal(k_ir, (N, C1, H, W), jnp.float32)

    # r must be > 0 (scaling = lora_alpha / r in the reference module)
    params = make_c2f_params(k_par, C1, C2, n=n_bneck, shortcut=False,
                             r=0.5, lora_alpha=1.0, e=0.5)

    fwd = jax.jit(lambda xr, xi: c2f_all_lora_m_forward(
        params, xr, xi, conv_impl=fused_dual_conv_bn_silu))
    out_rgb, out_ir = fwd(x_rgb, x_ir)
    jax.block_until_ready((out_rgb, out_ir))

    # correctness check vs. a lax.conv reference using the same bf16 operand /
    # f32 accumulation numerics (the only remaining deltas are accumulation
    # order and the approx EUP reciprocal in SiLU).
    ref_rgb, ref_ir = c2f_all_lora_m_forward(params, x_rgb, x_ir,
                                             conv_impl=ref_dual_conv_bn_silu)
    jax.block_until_ready((ref_rgb, ref_ir))
    for got, ref in ((out_rgb, ref_rgb), (out_ir, ref_ir)):
        assert got.shape == (N, C2, H, W), got.shape
        assert bool(jnp.all(jnp.isfinite(got)))
        err = float(jnp.max(jnp.abs(got - ref)))
        scale = float(jnp.max(jnp.abs(ref)))
        assert err <= 0.05 * max(1.0, scale), (err, scale)

    print("KERNEL_OK")
</pallas_src>

<mosaic_0001>
module attributes {stable_mosaic.version = 11 : i64} {
  func.func @kernel(%arg0: i32, %arg1: i32, %arg2: i32, %arg3: i32, %arg4: memref<1x1x256x4xf32, #tpu.memory_space<vmem>>, %arg5: memref<1x1x4x128xbf16, #tpu.memory_space<vmem>>, %arg6: memref<1x1x128xf32, #tpu.memory_space<vmem>>, %arg7: memref<1x1x128xf32, #tpu.memory_space<vmem>>, %arg8: memref<1x1x256x128xf32, #tpu.memory_space<vmem>>) attributes {dimension_semantics = [#tpu.dimension_semantics<parallel>, #tpu.dimension_semantics<parallel>, #tpu.dimension_semantics<parallel>, #tpu.dimension_semantics<parallel>], iteration_bounds = array<i64: 2, 2, 1, 1>, scalar_prefetch = 0 : i64, scratch_operands = 0 : i64, tpu.core_type = #tpu.core_type<tc>, window_params = [{transform_indices = @transform_0, window_bounds = array<i64: 1, 1, 256, 4>}, {transform_indices = @transform_1, window_bounds = array<i64: 1, 1, 4, 128>}, {transform_indices = @transform_2, window_bounds = array<i64: 1, 1, 128>}, {transform_indices = @transform_3, window_bounds = array<i64: 1, 1, 128>}, {transform_indices = @transform_4, window_bounds = array<i64: 1, 1, 256, 128>}]} {
    %c256_i32 = arith.constant 256 : i32
    %0 = arith.muli %arg3, %c256_i32 : i32
    %1 = tpu.assume_multiple %0, 8 : i32
    %cst = arith.constant 0.000000e+00 : f32
    %2 = vector.broadcast %cst : f32 to vector<256x128xf32>
    %c0_i32 = arith.constant 0 : i32
    %3 = arith.addi %1, %c0_i32 : i32
    %c0_i32_0 = arith.constant 0 : i32
    %4 = arith.addi %3, %c0_i32_0 : i32
    %c0 = arith.constant 0 : index
    %c0_1 = arith.constant 0 : index
    %5 = arith.index_cast %4 : i32 to index
    %c0_2 = arith.constant 0 : index
    %6 = vector.load %arg4[%c0, %c0_1, %5, %c0_2] : memref<1x1x256x4xf32, #tpu.memory_space<vmem>>, vector<1x1x256x4xf32>
    %7 = vector.shape_cast %6 : vector<1x1x256x4xf32> to vector<256x4xf32>
    %8 = arith.truncf %7 : vector<256x4xf32> to vector<256x4xbf16>
    %c0_3 = arith.constant 0 : index
    %c0_4 = arith.constant 0 : index
    %c0_5 = arith.constant 0 : index
    %c0_6 = arith.constant 0 : index
    %9 = vector.load %arg5[%c0_3, %c0_4, %c0_5, %c0_6] : memref<1x1x4x128xbf16, #tpu.memory_space<vmem>>, vector<1x1x4x128xbf16>
    %10 = vector.shape_cast %9 : vector<1x1x4x128xbf16> to vector<4x128xbf16>
    %cst_7 = arith.constant dense<0.000000e+00> : vector<256x128xf32>
    %11 = tpu.matmul %8, %10, %cst_7 {dimension_numbers = #tpu.dot_dimension_numbers<[1], [0], [0], [1], [0, 0, 1, 1], [], []>} : vector<256x4xbf16>, vector<4x128xbf16>, vector<256x128xf32> -> vector<256x128xf32>
    %12 = arith.addf %2, %11 : vector<256x128xf32>
    %c0_8 = arith.constant 0 : index
    %c0_9 = arith.constant 0 : index
    %c0_10 = arith.constant 0 : index
    %13 = vector.load %arg6[%c0_8, %c0_9, %c0_10] : memref<1x1x128xf32, #tpu.memory_space<vmem>>, vector<1x1x128xf32>
    %14 = vector.shape_cast %13 : vector<1x1x128xf32> to vector<1x128xf32>
    %15 = vector.broadcast %14 : vector<1x128xf32> to vector<256x128xf32>
    %16 = arith.mulf %12, %15 : vector<256x128xf32>
    %c0_11 = arith.constant 0 : index
    %c0_12 = arith.constant 0 : index
    %c0_13 = arith.constant 0 : index
    %17 = vector.load %arg7[%c0_11, %c0_12, %c0_13] : memref<1x1x128xf32, #tpu.memory_space<vmem>>, vector<1x1x128xf32>
    %18 = vector.shape_cast %17 : vector<1x1x128xf32> to vector<1x128xf32>
    %19 = vector.broadcast %18 : vector<1x128xf32> to vector<256x128xf32>
    %20 = arith.addf %16, %19 : vector<256x128xf32>
    %cst_14 = arith.constant 0.000000e+00 : f32
    %21 = vector.broadcast %cst_14 : f32 to vector<256x128xf32>
    %22 = arith.subf %21, %20 : vector<256x128xf32>
    %23 = math.exp %22 : vector<256x128xf32>
    %cst_15 = arith.constant 1.000000e+00 : f32
    %24 = vector.broadcast %cst_15 : f32 to vector<256x128xf32>
    %25 = arith.addf %24, %23 : vector<256x128xf32>
    %26 = tpu.reciprocal %25 {approx = true} : vector<256x128xf32> -> vector<256x128xf32>
    %27 = arith.mulf %20, %26 : vector<256x128xf32>
    %c0_16 = arith.constant 0 : index
    %c0_17 = arith.constant 0 : index
    %c0_18 = arith.constant 0 : index
    %c0_19 = arith.constant 0 : index
    %28 = vector.load %arg8[%c0_16, %c0_17, %c0_18, %c0_19] : memref<1x1x256x128xf32, #tpu.memory_space<vmem>>, vector<1x1x256x128xf32>
    %29 = vector.shape_cast %28 : vector<1x1x256x128xf32> to vector<256x128xf32>
    %30 = vector.shape_cast %27 : vector<256x128xf32> to vector<1x1x256x128xf32>
    tpu.vector_store %arg8[%c0_16, %c0_17, %c0_18, %c0_19], %30 {strides = array<i32>} : memref<1x1x256x128xf32, #tpu.memory_space<vmem>>, vector<1x1x256x128xf32>,
    return
  }
  func.func @transform_0(%arg0: i32, %arg1: i32, %arg2: i32, %arg3: i32) -> (i32, i32, i32, i32) {
    %c0_i32 = arith.constant 0 : i32
    %c0_i32_0 = arith.constant 0 : i32
    %c0_i32_1 = arith.constant 0 : i32
    return %arg0, %arg1, %c0_i32, %c0_i32_0 : i32, i32, i32, i32
  }
  func.func @transform_1(%arg0: i32, %arg1: i32, %arg2: i32, %arg3: i32) -> (i32, i32, i32, i32) {
    %c0_i32 = arith.constant 0 : i32
    %c0_i32_0 = arith.constant 0 : i32
    %c0_i32_1 = arith.constant 0 : i32
    return %arg0, %c0_i32, %c0_i32_0, %arg2 : i32, i32, i32, i32
  }
  func.func @transform_2(%arg0: i32, %arg1: i32, %arg2: i32, %arg3: i32) -> (i32, i32, i32) {
    %c0_i32 = arith.constant 0 : i32
    %c0_i32_0 = arith.constant 0 : i32
    return %arg0, %c0_i32, %arg2 : i32, i32, i32
  }
  func.func @transform_3(%arg0: i32, %arg1: i32, %arg2: i32, %arg3: i32) -> (i32, i32, i32) {
    %c0_i32 = arith.constant 0 : i32
    %c0_i32_0 = arith.constant 0 : i32
    return %arg0, %c0_i32, %arg2 : i32, i32, i32
  }
  func.func @transform_4(%arg0: i32, %arg1: i32, %arg2: i32, %arg3: i32) -> (i32, i32, i32, i32) {
    %c0_i32 = arith.constant 0 : i32
    return %arg0, %arg1, %arg3, %arg2 : i32, i32, i32, i32
  }
}

module attributes {stable_mosaic.version = 11 : i64} {
  func.func @kernel(%arg0: i32, %arg1: i32, %arg2: i32, %arg3: i32, %arg4: memref<1x1x290x2xf32, #tpu.memory_space<vmem>>, %arg5: memref<1x9x2x128xbf16, #tpu.memory_space<vmem>>, %arg6: memref<1x1x128xf32, #tpu.memory_space<vmem>>, %arg7: memref<1x1x128xf32, #tpu.memory_space<vmem>>, %arg8: memref<1x1x256x128xf32, #tpu.memory_space<vmem>>) attributes {dimension_semantics = [#tpu.dimension_semantics<parallel>, #tpu.dimension_semantics<parallel>, #tpu.dimension_semantics<parallel>, #tpu.dimension_semantics<parallel>], iteration_bounds = array<i64: 2, 2, 1, 1>, scalar_prefetch = 0 : i64, scratch_operands = 0 : i64, tpu.core_type = #tpu.core_type<tc>, window_params = [{transform_indices = @transform_0, window_bounds = array<i64: 1, 1, 290, 2>}, {transform_indices = @transform_1, window_bounds = array<i64: 1, 9, 2, 128>}, {transform_indices = @transform_2, window_bounds = array<i64: 1, 1, 128>}, {transform_indices = @transform_3, window_bounds = array<i64: 1, 1, 128>}, {transform_indices = @transform_4, window_bounds = array<i64: 1, 1, 256, 128>}]} {
    %c256_i32 = arith.constant 256 : i32
    %0 = arith.muli %arg3, %c256_i32 : i32
    %1 = tpu.assume_multiple %0, 8 : i32
    %2 = tpu.iota {dimensions = array<i32: 0>} : vector<256x1xi32>
    %c16_i32 = arith.constant 16 : i32
    %c0_i32 = arith.constant 0 : i32
    %3 = arith.cmpi eq, %c16_i32, %c0_i32 : i32
    %c1_i32 = arith.constant 1 : i32
    %4 = arith.select %3, %c1_i32, %c16_i32 : i32
    %5 = vector.broadcast %4 : i32 to vector<256x1xi32>
    %6 = arith.remsi %2, %5 : vector<256x1xi32>
    %c0_i32_0 = arith.constant 0 : i32
    %7 = vector.broadcast %c0_i32_0 : i32 to vector<256x1xi32>
    %8 = arith.cmpi ne, %6, %7 : vector<256x1xi32>
    %c0_i32_1 = arith.constant 0 : i32
    %9 = vector.broadcast %c0_i32_1 : i32 to vector<256x1xi32>
    %10 = arith.cmpi slt, %6, %9 : vector<256x1xi32>
    %c0_i32_2 = arith.constant 0 : i32
    %11 = arith.cmpi slt, %4, %c0_i32_2 : i32
    %12 = vector.broadcast %11 : i1 to vector<256x1xi1>
    %13 = vector.broadcast %12 : vector<256x1xi1> to vector<256x1xi1>
    %14 = arith.xori %10, %13 : vector<256x1xi1>
    %15 = arith.andi %14, %8 : vector<256x1xi1>
    %16 = vector.broadcast %4 : i32 to vector<256x1xi32>
    %17 = arith.addi %6, %16 : vector<256x1xi32>
    %18 = arith.select %15, %17, %6 : vector<256x1xi1>, vector<256x1xi32>
    %cst = arith.constant 0.000000e+00 : f32
    %19 = vector.broadcast %cst : f32 to vector<256x128xf32>
    %c0_i32_3 = arith.constant 0 : i32
    %20 = arith.addi %1, %c0_i32_3 : i32
    %c0_i32_4 = arith.constant 0 : i32
    %21 = arith.addi %20, %c0_i32_4 : i32
    %c0 = arith.constant 0 : index
    %c0_5 = arith.constant 0 : index
    %22 = arith.index_cast %21 : i32 to index
    %c0_6 = arith.constant 0 : index
    %23 = vector.load %arg4[%c0, %c0_5, %22, %c0_6] : memref<1x1x290x2xf32, #tpu.memory_space<vmem>>, vector<1x1x256x2xf32>
    %24 = vector.shape_cast %23 : vector<1x1x256x2xf32> to vector<256x2xf32>
    %c-1_i32 = arith.constant -1 : i32
    %25 = vector.broadcast %c-1_i32 : i32 to vector<256x1xi32>
    %26 = arith.addi %18, %25 : vector<256x1xi32>
    %c0_i32_7 = arith.constant 0 : i32
    %27 = vector.broadcast %c0_i32_7 : i32 to vector<256x1xi32>
    %28 = arith.cmpi sge, %26, %27 : vector<256x1xi32>
    %c16_i32_8 = arith.constant 16 : i32
    %29 = vector.broadcast %c16_i32_8 : i32 to vector<256x1xi32>
    %30 = arith.cmpi slt, %26, %29 : vector<256x1xi32>
    %31 = arith.andi %28, %30 : vector<256x1xi1>
    %cst_9 = arith.constant 0.000000e+00 : f32
    %32 = vector.shape_cast %31 : vector<256x1xi1> to vector<256x1xi1>
    %33 = vector.broadcast %32 : vector<256x1xi1> to vector<256x2xi1>
    %34 = vector.broadcast %cst_9 : f32 to vector<256x2xf32>
    %35 = arith.select %33, %24, %34 : vector<256x2xi1>, vector<256x2xf32>
    %36 = arith.truncf %35 : vector<256x2xf32> to vector<256x2xbf16>
    %c0_10 = arith.constant 0 : index
    %c0_11 = arith.constant 0 : index
    %c0_12 = arith.constant 0 : index
    %c0_13 = arith.constant 0 : index
    %37 = vector.load %arg5[%c0_10, %c0_11, %c0_12, %c0_13] : memref<1x9x2x128xbf16, #tpu.memory_space<vmem>>, vector<1x1x2x128xbf16>
    %38 = vector.shape_cast %37 : vector<1x1x2x128xbf16> to vector<2x128xbf16>
    %cst_14 = arith.constant dense<0.000000e+00> : vector<256x128xf32>
    %39 = tpu.matmul %36, %38, %cst_14 {dimension_numbers = #tpu.dot_dimension_numbers<[1], [0], [0], [1], [0, 0, 1, 1], [], []>} : vector<256x2xbf16>, vector<2x128xbf16>, vector<256x128xf32> -> vector<256x128xf32>
    %40 = arith.addf %19, %39 : vector<256x128xf32>
    %c0_i32_15 = arith.constant 0 : i32
    %41 = arith.addi %1, %c0_i32_15 : i32
    %c1_i32_16 = arith.constant 1 : i32
    %42 = arith.addi %41, %c1_i32_16 : i32
    %c0_17 = arith.constant 0 : index
    %c0_18 = arith.constant 0 : index
    %43 = arith.index_cast %42 : i32 to index
    %c0_19 = arith.constant 0 : index
    %44 = vector.load %arg4[%c0_17, %c0_18, %43, %c0_19] : memref<1x1x290x2xf32, #tpu.memory_space<vmem>>, vector<1x1x256x2xf32>
    %45 = vector.shape_cast %44 : vector<1x1x256x2xf32> to vector<256x2xf32>
    %46 = arith.truncf %45 : vector<256x2xf32> to vector<256x2xbf16>
    %c0_20 = arith.constant 0 : index
    %c1 = arith.constant 1 : index
    %c0_21 = arith.constant 0 : index
    %c0_22 = arith.constant 0 : index
    %47 = vector.load %arg5[%c0_20, %c1, %c0_21, %c0_22] : memref<1x9x2x128xbf16, #tpu.memory_space<vmem>>, vector<1x1x2x128xbf16>
    %48 = vector.shape_cast %47 : vector<1x1x2x128xbf16> to vector<2x128xbf16>
    %cst_23 = arith.constant dense<0.000000e+00> : vector<256x128xf32>
    %49 = tpu.matmul %46, %48, %cst_23 {dimension_numbers = #tpu.dot_dimension_numbers<[1], [0], [0], [1], [0, 0, 1, 1], [], []>} : vector<256x2xbf16>, vector<2x128xbf16>, vector<256x128xf32> -> vector<256x128xf32>
    %50 = arith.addf %40, %49 : vector<256x128xf32>
    %c0_i32_24 = arith.constant 0 : i32
    %51 = arith.addi %1, %c0_i32_24 : i32
    %c2_i32 = arith.constant 2 : i32
    %52 = arith.addi %51, %c2_i32 : i32
    %c0_25 = arith.constant 0 : index
    %c0_26 = arith.constant 0 : index
    %53 = arith.index_cast %52 : i32 to index
    %c0_27 = arith.constant 0 : index
    %54 = vector.load %arg4[%c0_25, %c0_26, %53, %c0_27] : memref<1x1x290x2xf32, #tpu.memory_space<vmem>>, vector<1x1x256x2xf32>
    %55 = vector.shape_cast %54 : vector<1x1x256x2xf32> to vector<256x2xf32>
    %c1_i32_28 = arith.constant 1 : i32
    %56 = vector.broadcast %c1_i32_28 : i32 to vector<256x1xi32>
    %57 = arith.addi %18, %56 : vector<256x1xi32>
    %c0_i32_29 = arith.constant 0 : i32
    %58 = vector.broadcast %c0_i32_29 : i32 to vector<256x1xi32>
    %59 = arith.cmpi sge, %57, %58 : vector<256x1xi32>
    %c16_i32_30 = arith.constant 16 : i32
    %60 = vector.broadcast %c16_i32_30 : i32 to vector<256x1xi32>
    %61 = arith.cmpi slt, %57, %60 : vector<256x1xi32>
    %62 = arith.andi %59, %61 : vector<256x1xi1>
    %cst_31 = arith.constant 0.000000e+00 : f32
    %63 = vector.shape_cast %62 : vector<256x1xi1> to vector<256x1xi1>
    %64 = vector.broadcast %63 : vector<256x1xi1> to vector<256x2xi1>
    %65 = vector.broadcast %cst_31 : f32 to vector<256x2xf32>
    %66 = arith.select %64, %55, %65 : vector<256x2xi1>, vector<256x2xf32>
    %67 = arith.truncf %66 : vector<256x2xf32> to vector<256x2xbf16>
    %c0_32 = arith.constant 0 : index
    %c2 = arith.constant 2 : index
    %c0_33 = arith.constant 0 : index
    %c0_34 = arith.constant 0 : index
    %68 = vector.load %arg5[%c0_32, %c2, %c0_33, %c0_34] : memref<1x9x2x128xbf16, #tpu.memory_space<vmem>>, vector<1x1x2x128xbf16>
    %69 = vector.shape_cast %68 : vector<1x1x2x128xbf16> to vector<2x128xbf16>
    %cst_35 = arith.constant dense<0.000000e+00> : vector<256x128xf32>
    %70 = tpu.matmul %67, %69, %cst_35 {dimension_numbers = #tpu.dot_dimension_numbers<[1], [0], [0], [1], [0, 0, 1, 1], [], []>} : vector<256x2xbf16>, vector<2x128xbf16>, vector<256x128xf32> -> vector<256x128xf32>
    %71 = arith.addf %50, %70 : vector<256x128xf32>
    %c16_i32_36 = arith.constant 16 : i32
    %72 = arith.addi %1, %c16_i32_36 : i32
    %c0_i32_37 = arith.constant 0 : i32
    %73 = arith.addi %72, %c0_i32_37 : i32
    %c0_38 = arith.constant 0 : index
    %c0_39 = arith.constant 0 : index
    %74 = arith.index_cast %73 : i32 to index
    %c0_40 = arith.constant 0 : index
    %75 = vector.load %arg4[%c0_38, %c0_39, %74, %c0_40] : memref<1x1x290x2xf32, #tpu.memory_space<vmem>>, vector<1x1x256x2xf32>
    %76 = vector.shape_cast %75 : vector<1x1x256x2xf32> to vector<256x2xf32>
    %c-1_i32_41 = arith.constant -1 : i32
    %77 = vector.broadcast %c-1_i32_41 : i32 to vector<256x1xi32>
    %78 = arith.addi %18, %77 : vector<256x1xi32>
    %c0_i32_42 = arith.constant 0 : i32
    %79 = vector.broadcast %c0_i32_42 : i32 to vector<256x1xi32>
    %80 = arith.cmpi sge, %78, %79 : vector<256x1xi32>
    %c16_i32_43 = arith.constant 16 : i32
    %81 = vector.broadcast %c16_i32_43 : i32 to vector<256x1xi32>
    %82 = arith.cmpi slt, %78, %81 : vector<256x1xi32>
    %83 = arith.andi %80, %82 : vector<256x1xi1>
    %cst_44 = arith.constant 0.000000e+00 : f32
    %84 = vector.shape_cast %83 : vector<256x1xi1> to vector<256x1xi1>
    %85 = vector.broadcast %84 : vector<256x1xi1> to vector<256x2xi1>
    %86 = vector.broadcast %cst_44 : f32 to vector<256x2xf32>
    %87 = arith.select %85, %76, %86 : vector<256x2xi1>, vector<256x2xf32>
    %88 = arith.truncf %87 : vector<256x2xf32> to vector<256x2xbf16>
    %c0_45 = arith.constant 0 : index
    %c3 = arith.constant 3 : index
    %c0_46 = arith.constant 0 : index
    %c0_47 = arith.constant 0 : index
    %89 = vector.load %arg5[%c0_45, %c3, %c0_46, %c0_47] : memref<1x9x2x128xbf16, #tpu.memory_space<vmem>>, vector<1x1x2x128xbf16>
    %90 = vector.shape_cast %89 : vector<1x1x2x128xbf16> to vector<2x128xbf16>
    %cst_48 = arith.constant dense<0.000000e+00> : vector<256x128xf32>
    %91 = tpu.matmul %88, %90, %cst_48 {dimension_numbers = #tpu.dot_dimension_numbers<[1], [0], [0], [1], [0, 0, 1, 1], [], []>} : vector<256x2xbf16>, vector<2x128xbf16>, vector<256x128xf32> -> vector<256x128xf32>
    %92 = arith.addf %71, %91 : vector<256x128xf32>
    %c16_i32_49 = arith.constant 16 : i32
    %93 = arith.addi %1, %c16_i32_49 : i32
    %c1_i32_50 = arith.constant 1 : i32
    %94 = arith.addi %93, %c1_i32_50 : i32
    %c0_51 = arith.constant 0 : index
    %c0_52 = arith.constant 0 : index
    %95 = arith.index_cast %94 : i32 to index
    %c0_53 = arith.constant 0 : index
    %96 = vector.load %arg4[%c0_51, %c0_52, %95, %c0_53] : memref<1x1x290x2xf32, #tpu.memory_space<vmem>>, vector<1x1x256x2xf32>
    %97 = vector.shape_cast %96 : vector<1x1x256x2xf32> to vector<256x2xf32>
    %98 = arith.truncf %97 : vector<256x2xf32> to vector<256x2xbf16>
    %c0_54 = arith.constant 0 : index
    %c4 = arith.constant 4 : index
    %c0_55 = arith.constant 0 : index
    %c0_56 = arith.constant 0 : index
    %99 = vector.load %arg5[%c0_54, %c4, %c0_55, %c0_56] : memref<1x9x2x128xbf16, #tpu.memory_space<vmem>>, vector<1x1x2x128xbf16>
    %100 = vector.shape_cast %99 : vector<1x1x2x128xbf16> to vector<2x128xbf16>
    %cst_57 = arith.constant dense<0.000000e+00> : vector<256x128xf32>
    %101 = tpu.matmul %98, %100, %cst_57 {dimension_numbers = #tpu.dot_dimension_numbers<[1], [0], [0], [1], [0, 0, 1, 1], [], []>} : vector<256x2xbf16>, vector<2x128xbf16>, vector<256x128xf32> -> vector<256x128xf32>
    %102 = arith.addf %92, %101 : vector<256x128xf32>
    %c16_i32_58 = arith.constant 16 : i32
    %103 = arith.addi %1, %c16_i32_58 : i32
    %c2_i32_59 = arith.constant 2 : i32
    %104 = arith.addi %103, %c2_i32_59 : i32
    %c0_60 = arith.constant 0 : index
    %c0_61 = arith.constant 0 : index
    %105 = arith.index_cast %104 : i32 to index
    %c0_62 = arith.constant 0 : index
    %106 = vector.load %arg4[%c0_60, %c0_61, %105, %c0_62] : memref<1x1x290x2xf32, #tpu.memory_space<vmem>>, vector<1x1x256x2xf32>
    %107 = vector.shape_cast %106 : vector<1x1x256x2xf32> to vector<256x2xf32>
    %c1_i32_63 = arith.constant 1 : i32
    %108 = vector.broadcast %c1_i32_63 : i32 to vector<256x1xi32>
    %109 = arith.addi %18, %108 : vector<256x1xi32>
    %c0_i32_64 = arith.constant 0 : i32
    %110 = vector.broadcast %c0_i32_64 : i32 to vector<256x1xi32>
    %111 = arith.cmpi sge, %109, %110 : vector<256x1xi32>
    %c16_i32_65 = arith.constant 16 : i32
    %112 = vector.broadcast %c16_i32_65 : i32 to vector<256x1xi32>
    %113 = arith.cmpi slt, %109, %112 : vector<256x1xi32>
    %114 = arith.andi %111, %113 : vector<256x1xi1>
    %cst_66 = arith.constant 0.000000e+00 : f32
    %115 = vector.shape_cast %114 : vector<256x1xi1> to vector<256x1xi1>
    %116 = vector.broadcast %115 : vector<256x1xi1> to vector<256x2xi1>
    %117 = vector.broadcast %cst_66 : f32 to vector<256x2xf32>
    %118 = arith.select %116, %107, %117 : vector<256x2xi1>, vector<256x2xf32>
    %119 = arith.truncf %118 : vector<256x2xf32> to vector<256x2xbf16>
    %c0_67 = arith.constant 0 : index
    %c5 = arith.constant 5 : index
    %c0_68 = arith.constant 0 : index
    %c0_69 = arith.constant 0 : index
    %120 = vector.load %arg5[%c0_67, %c5, %c0_68, %c0_69] : memref<1x9x2x128xbf16, #tpu.memory_space<vmem>>, vector<1x1x2x128xbf16>
    %121 = vector.shape_cast %120 : vector<1x1x2x128xbf16> to vector<2x128xbf16>
    %cst_70 = arith.constant dense<0.000000e+00> : vector<256x128xf32>
    %122 = tpu.matmul %119, %121, %cst_70 {dimension_numbers = #tpu.dot_dimension_numbers<[1], [0], [0], [1], [0, 0, 1, 1], [], []>} : vector<256x2xbf16>, vector<2x128xbf16>, vector<256x128xf32> -> vector<256x128xf32>
    %123 = arith.addf %102, %122 : vector<256x128xf32>
    %c32_i32 = arith.constant 32 : i32
    %124 = arith.addi %1, %c32_i32 : i32
    %c0_i32_71 = arith.constant 0 : i32
    %125 = arith.addi %124, %c0_i32_71 : i32
    %c0_72 = arith.constant 0 : index
    %c0_73 = arith.constant 0 : index
    %126 = arith.index_cast %125 : i32 to index
    %c0_74 = arith.constant 0 : index
    %127 = vector.load %arg4[%c0_72, %c0_73, %126, %c0_74] : memref<1x1x290x2xf32, #tpu.memory_space<vmem>>, vector<1x1x256x2xf32>
    %128 = vector.shape_cast %127 : vector<1x1x256x2xf32> to vector<256x2xf32>
    %c-1_i32_75 = arith.constant -1 : i32
    %129 = vector.broadcast %c-1_i32_75 : i32 to vector<256x1xi32>
    %130 = arith.addi %18, %129 : vector<256x1xi32>
    %c0_i32_76 = arith.constant 0 : i32
    %131 = vector.broadcast %c0_i32_76 : i32 to vector<256x1xi32>
    %132 = arith.cmpi sge, %130, %131 : vector<256x1xi32>
    %c16_i32_77 = arith.constant 16 : i32
    %133 = vector.broadcast %c16_i32_77 : i32 to vector<256x1xi32>
    %134 = arith.cmpi slt, %130, %133 : vector<256x1xi32>
    %135 = arith.andi %132, %134 : vector<256x1xi1>
    %cst_78 = arith.constant 0.000000e+00 : f32
    %136 = vector.shape_cast %135 : vector<256x1xi1> to vector<256x1xi1>
    %137 = vector.broadcast %136 : vector<256x1xi1> to vector<256x2xi1>
    %138 = vector.broadcast %cst_78 : f32 to vector<256x2xf32>
    %139 = arith.select %137, %128, %138 : vector<256x2xi1>, vector<256x2xf32>
    %140 = arith.truncf %139 : vector<256x2xf32> to vector<256x2xbf16>
    %c0_79 = arith.constant 0 : index
    %c6 = arith.constant 6 : index
    %c0_80 = arith.constant 0 : index
    %c0_81 = arith.constant 0 : index
    %141 = vector.load %arg5[%c0_79, %c6, %c0_80, %c0_81] : memref<1x9x2x128xbf16, #tpu.memory_space<vmem>>, vector<1x1x2x128xbf16>
    %142 = vector.shape_cast %141 : vector<1x1x2x128xbf16> to vector<2x128xbf16>
    %cst_82 = arith.constant dense<0.000000e+00> : vector<256x128xf32>
    %143 = tpu.matmul %140, %142, %cst_82 {dimension_numbers = #tpu.dot_dimension_numbers<[1], [0], [0], [1], [0, 0, 1, 1], [], []>} : vector<256x2xbf16>, vector<2x128xbf16>, vector<256x128xf32> -> vector<256x128xf32>
    %144 = arith.addf %123, %143 : vector<256x128xf32>
    %c32_i32_83 = arith.constant 32 : i32
    %145 = arith.addi %1, %c32_i32_83 : i32
    %c1_i32_84 = arith.constant 1 : i32
    %146 = arith.addi %145, %c1_i32_84 : i32
    %c0_85 = arith.constant 0 : index
    %c0_86 = arith.constant 0 : index
    %147 = arith.index_cast %146 : i32 to index
    %c0_87 = arith.constant 0 : index
    %148 = vector.load %arg4[%c0_85, %c0_86, %147, %c0_87] : memref<1x1x290x2xf32, #tpu.memory_space<vmem>>, vector<1x1x256x2xf32>
    %149 = vector.shape_cast %148 : vector<1x1x256x2xf32> to vector<256x2xf32>
    %150 = arith.truncf %149 : vector<256x2xf32> to vector<256x2xbf16>
    %c0_88 = arith.constant 0 : index
    %c7 = arith.constant 7 : index
    %c0_89 = arith.constant 0 : index
    %c0_90 = arith.constant 0 : index
    %151 = vector.load %arg5[%c0_88, %c7, %c0_89, %c0_90] : memref<1x9x2x128xbf16, #tpu.memory_space<vmem>>, vector<1x1x2x128xbf16>
    %152 = vector.shape_cast %151 : vector<1x1x2x128xbf16> to vector<2x128xbf16>
    %cst_91 = arith.constant dense<0.000000e+00> : vector<256x128xf32>
    %153 = tpu.matmul %150, %152, %cst_91 {dimension_numbers = #tpu.dot_dimension_numbers<[1], [0], [0], [1], [0, 0, 1, 1], [], []>} : vector<256x2xbf16>, vector<2x128xbf16>, vector<256x128xf32> -> vector<256x128xf32>
    %154 = arith.addf %144, %153 : vector<256x128xf32>
    %c32_i32_92 = arith.constant 32 : i32
    %155 = arith.addi %1, %c32_i32_92 : i32
    %c2_i32_93 = arith.constant 2 : i32
    %156 = arith.addi %155, %c2_i32_93 : i32
    %c0_94 = arith.constant 0 : index
    %c0_95 = arith.constant 0 : index
    %157 = arith.index_cast %156 : i32 to index
    %c0_96 = arith.constant 0 : index
    %158 = vector.load %arg4[%c0_94, %c0_95, %157, %c0_96] : memref<1x1x290x2xf32, #tpu.memory_space<vmem>>, vector<1x1x256x2xf32>
    %159 = vector.shape_cast %158 : vector<1x1x256x2xf32> to vector<256x2xf32>
    %c1_i32_97 = arith.constant 1 : i32
    %160 = vector.broadcast %c1_i32_97 : i32 to vector<256x1xi32>
    %161 = arith.addi %18, %160 : vector<256x1xi32>
    %c0_i32_98 = arith.constant 0 : i32
    %162 = vector.broadcast %c0_i32_98 : i32 to vector<256x1xi32>
    %163 = arith.cmpi sge, %161, %162 : vector<256x1xi32>
    %c16_i32_99 = arith.constant 16 : i32
    %164 = vector.broadcast %c16_i32_99 : i32 to vector<256x1xi32>
    %165 = arith.cmpi slt, %161, %164 : vector<256x1xi32>
    %166 = arith.andi %163, %165 : vector<256x1xi1>
    %cst_100 = arith.constant 0.000000e+00 : f32
    %167 = vector.shape_cast %166 : vector<256x1xi1> to vector<256x1xi1>
    %168 = vector.broadcast %167 : vector<256x1xi1> to vector<256x2xi1>
    %169 = vector.broadcast %cst_100 : f32 to vector<256x2xf32>
    %170 = arith.select %168, %159, %169 : vector<256x2xi1>, vector<256x2xf32>
    %171 = arith.truncf %170 : vector<256x2xf32> to vector<256x2xbf16>
    %c0_101 = arith.constant 0 : index
    %c8 = arith.constant 8 : index
    %c0_102 = arith.constant 0 : index
    %c0_103 = arith.constant 0 : index
    %172 = vector.load %arg5[%c0_101, %c8, %c0_102, %c0_103] : memref<1x9x2x128xbf16, #tpu.memory_space<vmem>>, vector<1x1x2x128xbf16>
    %173 = vector.shape_cast %172 : vector<1x1x2x128xbf16> to vector<2x128xbf16>
    %cst_104 = arith.constant dense<0.000000e+00> : vector<256x128xf32>
    %174 = tpu.matmul %171, %173, %cst_104 {dimension_numbers = #tpu.dot_dimension_numbers<[1], [0], [0], [1], [0, 0, 1, 1], [], []>} : vector<256x2xbf16>, vector<2x128xbf16>, vector<256x128xf32> -> vector<256x128xf32>
    %175 = arith.addf %154, %174 : vector<256x128xf32>
    %c0_105 = arith.constant 0 : index
    %c0_106 = arith.constant 0 : index
    %c0_107 = arith.constant 0 : index
    %176 = vector.load %arg6[%c0_105, %c0_106, %c0_107] : memref<1x1x128xf32, #tpu.memory_space<vmem>>, vector<1x1x128xf32>
    %177 = vector.shape_cast %176 : vector<1x1x128xf32> to vector<1x128xf32>
    %178 = vector.broadcast %177 : vector<1x128xf32> to vector<256x128xf32>
    %179 = arith.mulf %175, %178 : vector<256x128xf32>
    %c0_108 = arith.constant 0 : index
    %c0_109 = arith.constant 0 : index
    %c0_110 = arith.constant 0 : index
    %180 = vector.load %arg7[%c0_108, %c0_109, %c0_110] : memref<1x1x128xf32, #tpu.memory_space<vmem>>, vector<1x1x128xf32>
    %181 = vector.shape_cast %180 : vector<1x1x128xf32> to vector<1x128xf32>
    %182 = vector.broadcast %181 : vector<1x128xf32> to vector<256x128xf32>
    %183 = arith.addf %179, %182 : vector<256x128xf32>
    %cst_111 = arith.constant 0.000000e+00 : f32
    %184 = vector.broadcast %cst_111 : f32 to vector<256x128xf32>
    %185 = arith.subf %184, %183 : vector<256x128xf32>
    %186 = math.exp %185 : vector<256x128xf32>
    %cst_112 = arith.constant 1.000000e+00 : f32
    %187 = vector.broadcast %cst_112 : f32 to vector<256x128xf32>
    %188 = arith.addf %187, %186 : vector<256x128xf32>
    %189 = tpu.reciprocal %188 {approx = true} : vector<256x128xf32> -> vector<256x128xf32>
    %190 = arith.mulf %183, %189 : vector<256x128xf32>
    %c0_113 = arith.constant 0 : index
    %c0_114 = arith.constant 0 : index
    %c0_115 = arith.constant 0 : index
    %c0_116 = arith.constant 0 : index
    %191 = vector.load %arg8[%c0_113, %c0_114, %c0_115, %c0_116] : memref<1x1x256x128xf32, #tpu.memory_space<vmem>>, vector<1x1x256x128xf32>
    %192 = vector.shape_cast %191 : vector<1x1x256x128xf32> to vector<256x128xf32>
    %193 = vector.shape_cast %190 : vector<256x128xf32> to vector<1x1x256x128xf32>
    tpu.vector_store %arg8[%c0_113, %c0_114, %c0_115, %c0_116], %193 {strides = array<i32>} : memref<1x1x256x128xf32, #tpu.memory_space<vmem>>, vector<1x1x256x128xf32>,
    return
  }
  func.func @transform_0(%arg0: i32, %arg1: i32, %arg2: i32, %arg3: i32) -> (i32, i32, i32, i32) {
    %c0_i32 = arith.constant 0 : i32
    %c0_i32_0 = arith.constant 0 : i32
    %c0_i32_1 = arith.constant 0 : i32
    return %arg0, %arg1, %c0_i32, %c0_i32_0 : i32, i32, i32, i32
  }
  func.func @transform_1(%arg0: i32, %arg1: i32, %arg2: i32, %arg3: i32) -> (i32, i32, i32, i32) {
    %c0_i32 = arith.constant 0 : i32
    %c0_i32_0 = arith.constant 0 : i32
    %c0_i32_1 = arith.constant 0 : i32
    return %arg0, %c0_i32, %c0_i32_0, %arg2 : i32, i32, i32, i32
  }
  func.func @transform_2(%arg0: i32, %arg1: i32, %arg2: i32, %arg3: i32) -> (i32, i32, i32) {
    %c0_i32 = arith.constant 0 : i32
    %c0_i32_0 = arith.constant 0 : i32
    return %arg0, %c0_i32, %arg2 : i32, i32, i32
  }
  func.func @transform_3(%arg0: i32, %arg1: i32, %arg2: i32, %arg3: i32) -> (i32, i32, i32) {
    %c0_i32 = arith.constant 0 : i32
    %c0_i32_0 = arith.constant 0 : i32
    return %arg0, %c0_i32, %arg2 : i32, i32, i32
  }
  func.func @transform_4(%arg0: i32, %arg1: i32, %arg2: i32, %arg3: i32) -> (i32, i32, i32, i32) {
    %c0_i32 = arith.constant 0 : i32
    return %arg0, %arg1, %arg3, %arg2 : i32, i32, i32, i32
  }
}

module attributes {stable_mosaic.version = 11 : i64} {
  func.func @kernel(%arg0: i32, %arg1: i32, %arg2: i32, %arg3: i32, %arg4: memref<1x1x256x6xf32, #tpu.memory_space<vmem>>, %arg5: memref<1x1x6x128xbf16, #tpu.memory_space<vmem>>, %arg6: memref<1x1x128xf32, #tpu.memory_space<vmem>>, %arg7: memref<1x1x128xf32, #tpu.memory_space<vmem>>, %arg8: memref<1x1x256x128xf32, #tpu.memory_space<vmem>>) attributes {dimension_semantics = [#tpu.dimension_semantics<parallel>, #tpu.dimension_semantics<parallel>, #tpu.dimension_semantics<parallel>, #tpu.dimension_semantics<parallel>], iteration_bounds = array<i64: 2, 2, 1, 1>, scalar_prefetch = 0 : i64, scratch_operands = 0 : i64, tpu.core_type = #tpu.core_type<tc>, window_params = [{transform_indices = @transform_0, window_bounds = array<i64: 1, 1, 256, 6>}, {transform_indices = @transform_1, window_bounds = array<i64: 1, 1, 6, 128>}, {transform_indices = @transform_2, window_bounds = array<i64: 1, 1, 128>}, {transform_indices = @transform_3, window_bounds = array<i64: 1, 1, 128>}, {transform_indices = @transform_4, window_bounds = array<i64: 1, 1, 256, 128>}]} {
    %c256_i32 = arith.constant 256 : i32
    %0 = arith.muli %arg3, %c256_i32 : i32
    %1 = tpu.assume_multiple %0, 8 : i32
    %cst = arith.constant 0.000000e+00 : f32
    %2 = vector.broadcast %cst : f32 to vector<256x128xf32>
    %c0_i32 = arith.constant 0 : i32
    %3 = arith.addi %1, %c0_i32 : i32
    %c0_i32_0 = arith.constant 0 : i32
    %4 = arith.addi %3, %c0_i32_0 : i32
    %c0 = arith.constant 0 : index
    %c0_1 = arith.constant 0 : index
    %5 = arith.index_cast %4 : i32 to index
    %c0_2 = arith.constant 0 : index
    %6 = vector.load %arg4[%c0, %c0_1, %5, %c0_2] : memref<1x1x256x6xf32, #tpu.memory_space<vmem>>, vector<1x1x256x6xf32>
    %7 = vector.shape_cast %6 : vector<1x1x256x6xf32> to vector<256x6xf32>
    %8 = arith.truncf %7 : vector<256x6xf32> to vector<256x6xbf16>
    %c0_3 = arith.constant 0 : index
    %c0_4 = arith.constant 0 : index
    %c0_5 = arith.constant 0 : index
    %c0_6 = arith.constant 0 : index
    %9 = vector.load %arg5[%c0_3, %c0_4, %c0_5, %c0_6] : memref<1x1x6x128xbf16, #tpu.memory_space<vmem>>, vector<1x1x6x128xbf16>
    %10 = vector.shape_cast %9 : vector<1x1x6x128xbf16> to vector<6x128xbf16>
    %cst_7 = arith.constant dense<0.000000e+00> : vector<256x128xf32>
    %11 = tpu.matmul %8, %10, %cst_7 {dimension_numbers = #tpu.dot_dimension_numbers<[1], [0], [0], [1], [0, 0, 1, 1], [], []>} : vector<256x6xbf16>, vector<6x128xbf16>, vector<256x128xf32> -> vector<256x128xf32>
    %12 = arith.addf %2, %11 : vector<256x128xf32>
    %c0_8 = arith.constant 0 : index
    %c0_9 = arith.constant 0 : index
    %c0_10 = arith.constant 0 : index
    %13 = vector.load %arg6[%c0_8, %c0_9, %c0_10] : memref<1x1x128xf32, #tpu.memory_space<vmem>>, vector<1x1x128xf32>
    %14 = vector.shape_cast %13 : vector<1x1x128xf32> to vector<1x128xf32>
    %15 = vector.broadcast %14 : vector<1x128xf32> to vector<256x128xf32>
    %16 = arith.mulf %12, %15 : vector<256x128xf32>
    %c0_11 = arith.constant 0 : index
    %c0_12 = arith.constant 0 : index
    %c0_13 = arith.constant 0 : index
    %17 = vector.load %arg7[%c0_11, %c0_12, %c0_13] : memref<1x1x128xf32, #tpu.memory_space<vmem>>, vector<1x1x128xf32>
    %18 = vector.shape_cast %17 : vector<1x1x128xf32> to vector<1x128xf32>
    %19 = vector.broadcast %18 : vector<1x128xf32> to vector<256x128xf32>
    %20 = arith.addf %16, %19 : vector<256x128xf32>
    %cst_14 = arith.constant 0.000000e+00 : f32
    %21 = vector.broadcast %cst_14 : f32 to vector<256x128xf32>
    %22 = arith.subf %21, %20 : vector<256x128xf32>
    %23 = math.exp %22 : vector<256x128xf32>
    %cst_15 = arith.constant 1.000000e+00 : f32
    %24 = vector.broadcast %cst_15 : f32 to vector<256x128xf32>
    %25 = arith.addf %24, %23 : vector<256x128xf32>
    %26 = tpu.reciprocal %25 {approx = true} : vector<256x128xf32> -> vector<256x128xf32>
    %27 = arith.mulf %20, %26 : vector<256x128xf32>
    %c0_16 = arith.constant 0 : index
    %c0_17 = arith.constant 0 : index
    %c0_18 = arith.constant 0 : index
    %c0_19 = arith.constant 0 : index
    %28 = vector.load %arg8[%c0_16, %c0_17, %c0_18, %c0_19] : memref<1x1x256x128xf32, #tpu.memory_space<vmem>>, vector<1x1x256x128xf32>
    %29 = vector.shape_cast %28 : vector<1x1x256x128xf32> to vector<256x128xf32>
    %30 = vector.shape_cast %27 : vector<256x128xf32> to vector<1x1x256x128xf32>
    tpu.vector_store %arg8[%c0_16, %c0_17, %c0_18, %c0_19], %30 {strides = array<i32>} : memref<1x1x256x128xf32, #tpu.memory_space<vmem>>, vector<1x1x256x128xf32>,
    return
  }
  func.func @transform_0(%arg0: i32, %arg1: i32, %arg2: i32, %arg3: i32) -> (i32, i32, i32, i32) {
    %c0_i32 = arith.constant 0 : i32
    %c0_i32_0 = arith.constant 0 : i32
    %c0_i32_1 = arith.constant 0 : i32
    return %arg0, %arg1, %c0_i32, %c0_i32_0 : i32, i32, i32, i32
  }
  func.func @transform_1(%arg0: i32, %arg1: i32, %arg2: i32, %arg3: i32) -> (i32, i32, i32, i32) {
    %c0_i32 = arith.constant 0 : i32
    %c0_i32_0 = arith.constant 0 : i32
    %c0_i32_1 = arith.constant 0 : i32
    return %arg0, %c0_i32, %c0_i32_0, %arg2 : i32, i32, i32, i32
  }
  func.func @transform_2(%arg0: i32, %arg1: i32, %arg2: i32, %arg3: i32) -> (i32, i32, i32) {
    %c0_i32 = arith.constant 0 : i32
    %c0_i32_0 = arith.constant 0 : i32
    return %arg0, %c0_i32, %arg2 : i32, i32, i32
  }
  func.func @transform_3(%arg0: i32, %arg1: i32, %arg2: i32, %arg3: i32) -> (i32, i32, i32) {
    %c0_i32 = arith.constant 0 : i32
    %c0_i32_0 = arith.constant 0 : i32
    return %arg0, %c0_i32, %arg2 : i32, i32, i32
  }
  func.func @transform_4(%arg0: i32, %arg1: i32, %arg2: i32, %arg3: i32) -> (i32, i32, i32, i32) {
    %c0_i32 = arith.constant 0 : i32
    return %arg0, %arg1, %arg3, %arg2 : i32, i32, i32, i32
  }
}

</mosaic_0001>

<bundles_post_ra>
// kernel: _lambda_.4
= control target key start
LH: loop header
LB: loop body
LE: loop exit
PB: predicated region body
PF: predicated region fallthrough
CT: control target
= control target key end

     0   :  { %s1399_s15 = smov 0   ;;  %s1401_s16 = smov 0   ;;  %s1755_s0 = inlined_call_operand.vmem [shape: f32[2,2,256,4], index: 0, kind: input, shape index: {}]   ;;  %s1756_s1 = inlined_call_operand.vmem [shape: bf16[2,1,4,128], index: 1, kind: input, shape index: {}]   ;;  %s1757_s2 = inlined_call_operand.vmem [shape: f32[2,1,128], index: 2, kind: input, shape index: {}]   ;;  %s1758_s3 = inlined_call_operand.vmem [shape: f32[2,1,128], index: 3, kind: input, shape index: {}]   ;;  %s1759_s4 = inlined_call_operand.vmem [shape: f32[2,2,256,128], index: 4, kind: output, shape index: {}]  }
   0x1   :  { %s1403_s17 = smov 0   ;;  %s1405_s18 = smov 0  }
   0x2   :  { %s1407_s19 = smov 0  }
   0x3 LB: > { %s36_s20 = sadd.s32 1, %s1364_s17  ;;  %s40_s21 = sadd.s32 1, %s1368_s18  ;;  %s1372_s19 = sphi %s1407_s19, %s14_s19   ;;  %s1368_s18 = sphi %s1405_s18, %s1763_s18   ;;  %s1364_s17 = sphi %s1403_s17, %s1762_s17   ;;  %s1360_s16 = sphi %s1401_s16, %s1761_s16   ;;  %s1356_s15 = sphi %s1399_s15, %s1760_s15  }
   0x4   : > { %p38_p0 = scmp.ge.s32.totalorder %s36_s20, 2  ;;  %p1083_p1 = scmp.ge.s32.totalorder %s1372_s19, 1 }
   0x5   : > { %p240_p2 = scmp.lt.s32.totalorder %s1372_s19, 5 }
   0x6   : > { %s1765_s20 = smov (%p38_p0, %s36_s20), 0  ;;  %s1767_s21 = smov (!%p38_p0, %s40_s21), %s1368_s18 }
   0x7   : > { %p241_p3 = pnand %p1083_p1, %p240_p2  ;;  %p42_p4 = scmp.ge.s32.totalorder %s1767_s21, 2 }
   0x8   : > { %p300_p5 = scmp.lt.s32.totalorder (!%p241_p3), %s1360_s16, 1  ;;  %p302_p6 = scmp.lt.s32.totalorder (!%p241_p3), %s1356_s15, 1 }
   0x9   : > { %s1769_s21 = smov (%p42_p4, %s1767_s21), 0  ;;  %244 = sbr.rel (%p241_p3) target bundleno = 315 (0x13b), region = 36 }
   0xe   : > { %s1771_s16 = smov (!%p300_p5, %s1360_s16), 1  ;;  %s1773_s15 = smov (!%p302_p6, %s1356_s15), 1  ;;  %vm446_vm0 = vcmask 1041408   ;;  %vm397_vm1 = vcmask 31744  }
   0xf   : > { %s1085_s22 = sshll.u32 %s1771_s16, 6  ;;  %s1087_s23 = sshll.u32 %s1771_s16, 1 }
  0x10   : > { %s1084_s24 = sshll.u32 %s1773_s15, 5  ;;  %s315_s27 = scalar_lea.vmem %s1756_s1, %s1087_s23 }
  0x11   : > { %s1436_s28 = sadd.s32 %s1085_s22, %s1084_s24  ;;  %v396_v0 = vld [vmem:[%s315_s27] sm:$0x3]  ;;  %s321_s9 = scalar_lea.vmem %s1757_s2, %s1771_s16 }
  0x12   : > { %s1086_s29 = sshll.u32 %s1436_s28, 3  ;;  %1164 = vmatprep.subr.msk.bf16.mxu0 %vm446_vm0, %v396_v0  ;;  %1165 = vmatprep.subr.msk.bf16.mxu1 %vm446_vm0, %v396_v0  ;;  %v448_v1 = vsel %vm446_vm0, %v396_v0, 0  ;;  %s327_s12 = scalar_lea.vmem %s1758_s3, %s1771_s16  ;;  %v1502_v50 = vld [vmem:[%s321_s9] ss:$0 sm:$0xff] }
  0x13   : > { %s1444_s6 = scalar_lea.vmem %s1755_s0, %s1086_s29  ;;  %1129 = vmatpush3.bf16.msra.mxu0 %v448_v1  ;;  %1163 = vmatpush3.bf16.msra.mxu1 %v448_v1  ;;  %v1504_v51 = vld [vmem:[%s327_s12] ss:$0 sm:$0xff]  ;;  %s1633_s15 = scalar_lea.vmem %s1759_s4, %s1086_s29 }
  0x14   : > { %v348_v2 = vld [vmem:[%s1444_s6] sm:$0xff]  ;;  %v349_v3 = vld [vmem:[%s1444_s6 + $0x8] sm:$0xff]  ;;  %v350_v7 = vld [vmem:[%s1444_s6 + $0x10] sm:$0xff] }
  0x15   : > { %v364_v4 = vld [vmem:[%s1444_s6 + $0x80] sm:$0xff]  ;;  %v380_v5 = vpack.c.bf16 %v349_v3, %v348_v2  ;;  %v365_v6 = vld [vmem:[%s1444_s6 + $0x88] sm:$0xff]  ;;  %v351_v8 = vld [vmem:[%s1444_s6 + $0x18] sm:$0xff] }
  0x16   : > { %v388_v9 = vpack.c.bf16 %v365_v6, %v364_v4  ;;  %v381_v10 = vpack.c.bf16 %v351_v8, %v350_v7  ;;  %v366_v11 = vld [vmem:[%s1444_s6 + $0x90] sm:$0xff]  ;;  %v367_v12 = vld [vmem:[%s1444_s6 + $0x98] sm:$0xff]  ;;  %v352_v13 = vld [vmem:[%s1444_s6 + $0x20] sm:$0xff] }
  0x17   : > { %1130 = vmatprep.mubr.msk.bf16.mxu0 %vm397_vm1, %v380_v5  ;;  %v389_v14 = vpack.c.bf16 %v367_v12, %v366_v11  ;;  %v353_v15 = vld [vmem:[%s1444_s6 + $0x28] sm:$0xff]  ;;  %v368_v16 = vld [vmem:[%s1444_s6 + $0xa0] sm:$0xff]  ;;  %v354_v20 = vld [vmem:[%s1444_s6 + $0x30] sm:$0xff] }
  0x18   : > { %v369_v17 = vld [vmem:[%s1444_s6 + $0xa8] sm:$0xff]  ;;  %1146 = vmatprep.mubr.msk.bf16.mxu1 %vm397_vm1, %v388_v9  ;;  %1131 = vmatmul.mubr.msk.bf16.vlgmr.msra.gmra.mxu0 %vm397_vm1, %v381_v10  ;;  %v382_v18 = vpack.c.bf16 %v353_v15, %v352_v13  ;;  %v355_v21 = vld [vmem:[%s1444_s6 + $0x38] sm:$0xff]  ;;  %v370_v22 = vld [vmem:[%s1444_s6 + $0xb0] sm:$0xff] }
  0x19   : > { %v390_v19 = vpack.c.bf16 %v369_v17, %v368_v16  ;;  %1147 = vmatmul.mubr.msk.bf16.vlgmr.msra.gmra.mxu1 %vm397_vm1, %v389_v14  ;;  %v371_v23 = vld [vmem:[%s1444_s6 + $0xb8] sm:$0xff]  ;;  %v356_v24 = vld [vmem:[%s1444_s6 + $0x40] sm:$0xff]  ;;  %v357_v25 = vld [vmem:[%s1444_s6 + $0x48] sm:$0xff]  ;;  %v383_v28 = vpack.c.bf16 %v355_v21, %v354_v20 }
  0x1a   : > { %1134 = vmatprep.mubr.msk.bf16.mxu0 %vm397_vm1, %v382_v18  ;;  %v372_v26 = vld [vmem:[%s1444_s6 + $0xc0] sm:$0xff]  ;;  %v373_v27 = vld [vmem:[%s1444_s6 + $0xc8] sm:$0xff]  ;;  %v391_v29 = vpack.c.bf16 %v371_v23, %v370_v22  ;;  %v384_v30 = vpack.c.bf16 %v357_v25, %v356_v24  ;;  %v358_v32 = vld [vmem:[%s1444_s6 + $0x50] sm:$0xff] }
  0x1b   : > { %1150 = vmatprep.mubr.msk.bf16.mxu1 %vm397_vm1, %v390_v19  ;;  %v392_v31 = vpack.c.bf16 %v373_v27, %v372_v26  ;;  %v359_v33 = vld [vmem:[%s1444_s6 + $0x58] sm:$0xff]  ;;  %v374_v34 = vld [vmem:[%s1444_s6 + $0xd0] sm:$0xff]  ;;  %v360_v36 = vld [vmem:[%s1444_s6 + $0x60] sm:$0xff] }
  0x1c   : > { %v375_v35 = vld [vmem:[%s1444_s6 + $0xd8] sm:$0xff]  ;;  %v361_v37 = vld [vmem:[%s1444_s6 + $0x68] sm:$0xff]  ;;  %v376_v38 = vld [vmem:[%s1444_s6 + $0xe0] sm:$0xff]  ;;  %v385_v40 = vpack.c.bf16 %v359_v33, %v358_v32 }
  0x1d   : > { %v377_v39 = vld [vmem:[%s1444_s6 + $0xe8] sm:$0xff]  ;;  %v393_v41 = vpack.c.bf16 %v375_v35, %v374_v34  ;;  %v386_v42 = vpack.c.bf16 %v361_v37, %v360_v36  ;;  %v362_v44 = vld [vmem:[%s1444_s6 + $0x70] sm:$0xff]  ;;  %v363_v45 = vld [vmem:[%s1444_s6 + $0x78] sm:$0xff] }
  0x1e   : > { %v394_v43 = vpack.c.bf16 %v377_v39, %v376_v38  ;;  %v378_v46 = vld [vmem:[%s1444_s6 + $0xf0] sm:$0xff]  ;;  %v379_v47 = vld [vmem:[%s1444_s6 + $0xf8] sm:$0xff]  ;;  %v387_v48 = vpack.c.bf16 %v363_v45, %v362_v44 }
  0x1f   : > { %v395_v49 = vpack.c.bf16 %v379_v47, %v378_v46 }
  0x20   : > { %1135 = vmatmul.mubr.msk.bf16.gmra.mxu0 %vm397_vm1, %v383_v28 }
  0x21   : > { %1151 = vmatmul.mubr.msk.bf16.gmra.mxu1 %vm397_vm1, %v391_v29  ;;  %1138 = vmatprep.mubr.msk.bf16.mxu0 %vm397_vm1, %v384_v30 }
  0x22   : > { %1154 = vmatprep.mubr.msk.bf16.mxu1 %vm397_vm1, %v392_v31 }
  0x28   : > { %1139 = vmatmul.mubr.msk.bf16.gmra.mxu0 %vm397_vm1, %v385_v40 }
  0x29   : > { %1155 = vmatmul.mubr.msk.bf16.gmra.mxu1 %vm397_vm1, %v393_v41  ;;  %1142 = vmatprep.mubr.msk.bf16.mxu0 %vm397_vm1, %v386_v42 }
  0x2a   : > { %1158 = vmatprep.mubr.msk.bf16.mxu1 %vm397_vm1, %v394_v43 }
  0x30   : > { %1143 = vmatmul.mubr.msk.bf16.gmra.mxu0 %vm397_vm1, %v387_v48 }
  0x31   : > { %1159 = vmatmul.mubr.msk.bf16.gmra.mxu1 %vm397_vm1, %v395_v49 }
  0xd8   : > { %v1132_v52 = vpop.f32.mrf.mxu0 }
  0xd9   : > { %v620_v53 = vmul.f32 %v1132_v52, %v1502_v50  ;;  %v1148_v54 = vpop.f32.mrf.mxu1 }
  0xda   : > { %v636_v55 = vmul.f32 %v1148_v54, %v1502_v50  ;;  %v484_v56 = vpop.f32.mrf.mxu0 }
  0xdb   : > { %v1509_v57 = vadd.f32 %v1504_v51, %v620_v53  ;;  %v618_v58 = vmul.f32 %v1502_v50, %v484_v56  ;;  %v548_v59 = vpop.f32.mrf.mxu1 }
  0xdc   : > { %v1513_v60 = vadd.f32 %v1504_v51, %v636_v55  ;;  %v634_v61 = vmul.f32 %v1502_v50, %v548_v59  ;;  %v1133_v62 = vpop.f32.mrf.mxu0 }
  0xdd   : > { %v691_v63 = vsub.f32 0.0, %v1509_v57  ;;  %v1518_v0 = vadd.f32 %v1504_v51, %v618_v58  ;;  %v621_v1 = vmul.f32 %v1133_v62, %v1502_v50  ;;  %v1149_v2 = vpop.f32.mrf.mxu1 }
  0xde   : > { %v707_v3 = vsub.f32 0.0, %v1513_v60  ;;  %v1523_v4 = vadd.f32 %v1504_v51, %v634_v61  ;;  %v637_v5 = vmul.f32 %v1149_v2, %v1502_v50  ;;  %v487_v6 = vpop.f32.mrf.mxu0 }
  0xdf   : > { %v725_v7 = vmul.f32 1.442695, %v691_v63  ;;  %v689_v8 = vsub.f32 0.0, %v1518_v0  ;;  %v1528_v9 = vadd.f32 %v1504_v51, %v621_v1  ;;  %v619_v10 = vmul.f32 %v1502_v50, %v487_v6  ;;  %v551_v11 = vpop.f32.mrf.mxu1 }
  0xe0   : > { %v757_v12 = vmul.f32 1.442695, %v707_v3  ;;  %v705_v13 = vsub.f32 0.0, %v1523_v4  ;;  %v1533_v14 = vadd.f32 %v1504_v51, %v637_v5  ;;  %v635_v15 = vmul.f32 %v1502_v50, %v551_v11  ;;  %v1136_v16 = vpop.f32.mrf.mxu0 }
  0xe1   : > { %1206 = vpow2.f32 %v725_v7  ;;  %v721_v17 = vmul.f32 1.442695, %v689_v8  ;;  %v692_v18 = vsub.f32 0.0, %v1528_v9  ;;  %v1538_v19 = vadd.f32 %v1504_v51, %v619_v10  ;;  %v1152_v20 = vpop.f32.mrf.mxu1 }
  0xe2   : > { %1208 = vpow2.f32 %v757_v12  ;;  %v753_v21 = vmul.f32 1.442695, %v705_v13  ;;  %v708_v22 = vsub.f32 0.0, %v1533_v14  ;;  %v1542_v23 = vadd.f32 %v1504_v51, %v635_v15  ;;  %v500_v24 = vpop.f32.mrf.mxu0 }
  0xe3   : > { %1210 = vpow2.f32 %v721_v17  ;;  %v727_v25 = vmul.f32 1.442695, %v692_v18  ;;  %v690_v26 = vsub.f32 0.0, %v1538_v19  ;;  %v624_v27 = vmul.f32 %v1136_v16, %v1502_v50  ;;  %v564_v28 = vpop.f32.mrf.mxu1 }
  0xe4   : > { %1212 = vpow2.f32 %v753_v21  ;;  %v759_v29 = vmul.f32 1.442695, %v708_v22  ;;  %v706_v30 = vsub.f32 0.0, %v1542_v23  ;;  %v640_v31 = vmul.f32 %v1152_v20, %v1502_v50  ;;  %v1137_v32 = vpop.f32.mrf.mxu0 }
  0xe5   : > { %1214 = vpow2.f32 %v727_v25  ;;  %v723_v33 = vmul.f32 1.442695, %v690_v26  ;;  %v1549_v34 = vadd.f32 %v1504_v51, %v624_v27  ;;  %v622_v35 = vmul.f32 %v1502_v50, %v500_v24  ;;  %v1153_v36 = vpop.f32.mrf.mxu1 }
  0xe6   : > { %1216 = vpow2.f32 %v759_v29  ;;  %v755_v37 = vmul.f32 1.442695, %v706_v30  ;;  %v1553_v38 = vadd.f32 %v1504_v51, %v640_v31  ;;  %v638_v39 = vmul.f32 %v1502_v50, %v564_v28  ;;  %v503_v40 = vpop.f32.mrf.mxu0 }
  0xe7   : > { %1218 = vpow2.f32 %v723_v33  ;;  %v695_v41 = vsub.f32 0.0, %v1549_v34  ;;  %v1558_v42 = vadd.f32 %v1504_v51, %v622_v35  ;;  %v625_v43 = vmul.f32 %v1137_v32, %v1502_v50  ;;  %v567_v44 = vpop.f32.mrf.mxu1 }
  0xe8   : > { %1220 = vpow2.f32 %v755_v37  ;;  %v711_v45 = vsub.f32 0.0, %v1553_v38  ;;  %v1563_v46 = vadd.f32 %v1504_v51, %v638_v39  ;;  %v641_v47 = vmul.f32 %v1153_v36, %v1502_v50  ;;  %v1140_v48 = vpop.f32.mrf.mxu0 }
  0xe9   : > { %v733_v49 = vmul.f32 1.442695, %v695_v41  ;;  %v693_v52 = vsub.f32 0.0, %v1558_v42  ;;  %v1568_v53 = vadd.f32 %v1504_v51, %v625_v43  ;;  %v623_v54 = vmul.f32 %v1502_v50, %v503_v40  ;;  %v1156_v55 = vpop.f32.mrf.mxu1 }
  0xea   : > { %v765_v56 = vmul.f32 1.442695, %v711_v45  ;;  %v709_v58 = vsub.f32 0.0, %v1563_v46  ;;  %v1573_v59 = vadd.f32 %v1504_v51, %v641_v47  ;;  %v639_v61 = vmul.f32 %v1502_v50, %v567_v44  ;;  %v516_v6 = vpop.f32.mrf.mxu0 }
  0xeb   : > { %1222 = vpow2.f32 %v733_v49  ;;  %v729_v62 = vmul.f32 1.442695, %v693_v52  ;;  %v696_v63 = vsub.f32 0.0, %v1568_v53  ;;  %v1578_v1 = vadd.f32 %v1504_v51, %v623_v54  ;;  %v580_v10 = vpop.f32.mrf.mxu1 }
  0xec   : > { %1224 = vpow2.f32 %v765_v56  ;;  %v761_v2 = vmul.f32 1.442695, %v709_v58  ;;  %v712_v3 = vsub.f32 0.0, %v1573_v59  ;;  %v1582_v5 = vadd.f32 %v1504_v51, %v639_v61  ;;  %v1141_v25 = vpop.f32.mrf.mxu0 }
  0xed   : > { %1226 = vpow2.f32 %v729_v62  ;;  %v735_v7 = vmul.f32 1.442695, %v696_v63  ;;  %v628_v8 = vmul.f32 %v1140_v48, %v1502_v50  ;;  %v694_v13 = vsub.f32 0.0, %v1578_v1  ;;  %v1157_v30 = vpop.f32.mrf.mxu1 }
  0xee   : > { %v1207_v11 = vpop.eup %1206  ;;  %1228 = vpow2.f32 %v761_v2  ;;  %v767_v12 = vmul.f32 1.442695, %v712_v3  ;;  %v644_v15 = vmul.f32 %v1156_v55, %v1502_v50  ;;  %v710_v18 = vsub.f32 0.0, %v1582_v5  ;;  %v519_v47 = vpop.f32.mrf.mxu0 }
  0xef   : > { %v1209_v16 = vpop.eup %1208  ;;  %v787_v17 = vadd.f32 1.0, %v1207_v11  ;;  %1230 = vpow2.f32 %v735_v7  ;;  %v1589_v20 = vadd.f32 %v1504_v51, %v628_v8  ;;  %v626_v29 = vmul.f32 %v1502_v50, %v516_v6  ;;  %v583_v55 = vpop.f32.mrf.mxu1 }
  0xf0   : > { %v1211_v21 = vpop.eup %1210  ;;  %v803_v22 = vadd.f32 1.0, %v1209_v16  ;;  %1232 = vpow2.f32 %v767_v12  ;;  %v1592_v24 = vadd.f32 %v1504_v51, %v644_v15  ;;  %v731_v33 = vmul.f32 1.442695, %v694_v13 }
  0xf1   : > { %v1213_v26 = vpop.eup %1212  ;;  %1234 = vrcp.f32 %v787_v17  ;;  %v785_v27 = vadd.f32 1.0, %v1211_v21  ;;  %v699_v28 = vsub.f32 0.0, %v1589_v20  ;;  %v642_v35 = vmul.f32 %v1502_v50, %v580_v10  ;;  %v1144_v10 = vpop.f32.mrf.mxu0 }
  0xf2   : > { %v1215_v31 = vpop.eup %1214  ;;  %1236 = vrcp.f32 %v803_v22  ;;  %v801_v32 = vadd.f32 1.0, %v1213_v26  ;;  %v763_v39 = vmul.f32 1.442695, %v710_v18  ;;  %v1598_v40 = vadd.f32 %v1504_v51, %v626_v29  ;;  %v1160_v16 = vpop.f32.mrf.mxu1 }
  0xf3   : > { %v1217_v36 = vpop.eup %1216  ;;  %1238 = vrcp.f32 %v785_v27  ;;  %v788_v37 = vadd.f32 1.0, %v1215_v31  ;;  %v715_v44 = vsub.f32 0.0, %v1592_v24  ;;  %v1602_v45 = vadd.f32 %v1504_v51, %v642_v35 }
  0xf4   : > { %v1219_v41 = vpop.eup %1218  ;;  %1240 = vrcp.f32 %v801_v32  ;;  %v804_v43 = vadd.f32 1.0, %v1217_v36  ;;  %v1604_v52 = vmul.f32 1.442695, %v699_v28  ;;  %v629_v54 = vmul.f32 %v1141_v25, %v1502_v50 }
  0xf5   : > { %v1221_v48 = vpop.eup %1220  ;;  %1242 = vrcp.f32 %v788_v37  ;;  %v786_v49 = vadd.f32 1.0, %v1219_v41  ;;  %v697_v58 = vsub.f32 0.0, %v1598_v40  ;;  %v645_v61 = vmul.f32 %v1157_v30, %v1502_v50  ;;  %v596_v41 = vpop.f32.mrf.mxu1 }
  0xf6   : > { %1244 = vrcp.f32 %v804_v43  ;;  %v802_v56 = vadd.f32 1.0, %v1221_v48  ;;  %v713_v62 = vsub.f32 0.0, %v1602_v45  ;;  %v1611_v63 = vadd.f32 %v1504_v51, %v629_v54 }
  0xf7   : > { %1246 = vrcp.f32 %v786_v49  ;;  %v627_v2 = vmul.f32 %v1502_v50, %v519_v47  ;;  %v773_v6 = vmul.f32 1.442695, %v715_v44  ;;  %v1615_v7 = vadd.f32 %v1504_v51, %v645_v61 }
  0xf8   : > { %v1223_v3 = vpop.eup %1222  ;;  %1248 = vrcp.f32 %v802_v56  ;;  %v643_v8 = vmul.f32 %v1502_v50, %v583_v55  ;;  %v700_v13 = vsub.f32 0.0, %v1611_v63  ;;  %v737_v27 = vmul.f32 1.442695, %v697_v58 }
  0xf9   : > { %v1225_v11 = vpop.eup %1224  ;;  %v791_v12 = vadd.f32 1.0, %v1223_v3  ;;  %1250 = vpow2.f32 %v731_v33  ;;  %v1620_v15 = vadd.f32 %v1504_v51, %v627_v2  ;;  %v716_v21 = vsub.f32 0.0, %v1615_v7  ;;  %v532_v33 = vpop.f32.mrf.mxu0 }
  0xfa   : > { %v1227_v17 = vpop.eup %1226  ;;  %v807_v18 = vadd.f32 1.0, %v1225_v11  ;;  %1252 = vpow2.f32 %v763_v39  ;;  %v1624_v22 = vadd.f32 %v1504_v51, %v643_v8  ;;  %v769_v28 = vmul.f32 1.442695, %v713_v62 }
  0xfb   : > { %v1229_v25 = vpop.eup %1228  ;;  %1254 = vrcp.f32 %v791_v12  ;;  %v789_v26 = vadd.f32 1.0, %v1227_v17  ;;  %v743_v31 = vmul.f32 1.442695, %v700_v13  ;;  %v698_v32 = vsub.f32 0.0, %v1620_v15 }
  0xfc   : > { %v1231_v29 = vpop.eup %1230  ;;  %1256 = vrcp.f32 %v807_v18  ;;  %v805_v30 = vadd.f32 1.0, %v1229_v25  ;;  %v775_v37 = vmul.f32 1.442695, %v716_v21  ;;  %v632_v39 = vmul.f32 %v1144_v10, %v1502_v50  ;;  %v1161_v21 = vpop.f32.mrf.mxu1 }
  0xfd   : > { %v1233_v35 = vpop.eup %1232  ;;  %1258 = vrcp.f32 %v789_v26  ;;  %v792_v36 = vadd.f32 1.0, %v1231_v29  ;;  %v714_v47 = vsub.f32 0.0, %v1624_v22  ;;  %v648_v48 = vmul.f32 %v1160_v16, %v1502_v50 }
  0xfe   : > { %v1235_v43 = vpop.eup %1234  ;;  %1260 = vrcp.f32 %v805_v30  ;;  %v808_v44 = vadd.f32 1.0, %v1233_v35  ;;  %v1639_v55 = vadd.f32 %v1504_v51, %v632_v39  ;;  %v630_v56 = vmul.f32 %v1502_v50, %v532_v33 }
  0xff   : > { %v1237_v49 = vpop.eup %1236  ;;  %v851_v54 = vmul.f32 %v1235_v43, %v1509_v57  ;;  %1262 = vrcp.f32 %v792_v36  ;;  %v1644_v62 = vadd.f32 %v1504_v51, %v648_v48  ;;  %v646_v2 = vmul.f32 %v1502_v50, %v596_v41 }
 0x100   : > { %v1239_v58 = vpop.eup %1238  ;;  %v867_v61 = vmul.f32 %v1237_v49, %v1513_v60  ;;  %1264 = vrcp.f32 %v808_v44  ;;  %v703_v8 = vsub.f32 0.0, %v1639_v55  ;;  %v1652_v10 = vadd.f32 %v1504_v51, %v630_v56 }
 0x101   : > { %v1241_v3 = vpop.eup %1240  ;;  %883 = vst [vmem:[%s1633_s15 + $0x10] sm:$0xff] %v851_v54  ;;  %v849_v57 = vmul.f32 %v1239_v58, %v1518_v0  ;;  %1266 = vpow2.f32 %v1604_v52  ;;  %v719_v12 = vsub.f32 0.0, %v1644_v62  ;;  %v1658_v13 = vadd.f32 %v1504_v51, %v646_v2  ;;  %v1145_v0 = vpop.f32.mrf.mxu0 }
 0x102   : > { %v1243_v60 = vpop.eup %1242  ;;  %899 = vst [vmem:[%s1633_s15 + $0x90] sm:$0xff] %v867_v61  ;;  %v865_v11 = vmul.f32 %v1241_v3, %v1523_v4  ;;  %1268 = vpow2.f32 %v773_v6  ;;  %v739_v17 = vmul.f32 1.442695, %v698_v32  ;;  %v701_v18 = vsub.f32 0.0, %v1652_v10 }
 0x103   : > { %v1245_v16 = vpop.eup %1244  ;;  %881 = vst [vmem:[%s1633_s15] sm:$0xff] %v849_v57  ;;  %v852_v52 = vmul.f32 %v1243_v60, %v1528_v9  ;;  %1270 = vpow2.f32 %v737_v27  ;;  %v771_v6 = vmul.f32 1.442695, %v714_v47  ;;  %v717_v26 = vsub.f32 0.0, %v1658_v13  ;;  %v535_v35 = vpop.f32.mrf.mxu0 }
 0x104   : > { %v1247_v25 = vpop.eup %1246  ;;  %897 = vst [vmem:[%s1633_s15 + $0x80] sm:$0xff] %v865_v11  ;;  %v868_v4 = vmul.f32 %v1245_v16, %v1533_v14  ;;  %1272 = vpow2.f32 %v769_v28  ;;  %v749_v9 = vmul.f32 1.442695, %v703_v8  ;;  %v633_v27 = vmul.f32 %v1145_v0, %v1502_v50 }
 0x105   : > { %v1249_v29 = vpop.eup %1248  ;;  %884 = vst [vmem:[%s1633_s15 + $0x18] sm:$0xff] %v852_v52  ;;  %v850_v30 = vmul.f32 %v1247_v25, %v1538_v19  ;;  %1274 = vpow2.f32 %v743_v31  ;;  %v781_v14 = vmul.f32 1.442695, %v719_v12  ;;  %v649_v28 = vmul.f32 %v1161_v21, %v1502_v50  ;;  %v599_v31 = vpop.f32.mrf.mxu1 }
 0x106   : > { %v1251_v32 = vpop.eup %1250  ;;  %900 = vst [vmem:[%s1633_s15 + $0x98] sm:$0xff] %v868_v4  ;;  %v866_v33 = vmul.f32 %v1249_v29, %v1542_v23  ;;  %1276 = vpow2.f32 %v775_v37  ;;  %v745_v41 = vmul.f32 1.442695, %v701_v18  ;;  %v1674_v19 = vadd.f32 %v1504_v51, %v633_v27 }
 0x107   : > { %v1253_v36 = vpop.eup %1252  ;;  %882 = vst [vmem:[%s1633_s15 + $0x8] sm:$0xff] %v850_v30  ;;  %v790_v39 = vadd.f32 1.0, %v1251_v32  ;;  %1278 = vpow2.f32 %v739_v17  ;;  %v777_v23 = vmul.f32 1.442695, %v717_v26  ;;  %v1678_v37 = vadd.f32 %v1504_v51, %v649_v28 }
 0x108   : > { %v1255_v43 = vpop.eup %1254  ;;  %898 = vst [vmem:[%s1633_s15 + $0x88] sm:$0xff] %v866_v33  ;;  %v806_v44 = vadd.f32 1.0, %v1253_v36  ;;  %1280 = vpow2.f32 %v771_v6  ;;  %v704_v49 = vsub.f32 0.0, %v1674_v19  ;;  %v631_v54 = vmul.f32 %v1502_v50, %v535_v35 }
 0x109   : > { %v1257_v47 = vpop.eup %1256  ;;  %v855_v48 = vmul.f32 %v1255_v43, %v1549_v34  ;;  %1282 = vrcp.f32 %v790_v39  ;;  %v720_v61 = vsub.f32 0.0, %v1678_v37  ;;  %v647_v2 = vmul.f32 %v1502_v50, %v599_v31 }
 0x10a   : > { %v1259_v56 = vpop.eup %1258  ;;  %v871_v58 = vmul.f32 %v1257_v47, %v1553_v38  ;;  %1284 = vrcp.f32 %v806_v44  ;;  %v751_v34 = vmul.f32 1.442695, %v704_v49  ;;  %v1693_v50 = vadd.f32 %v1504_v51, %v631_v54 }
 0x10b   : > { %v1261_v3 = vpop.eup %1260  ;;  %887 = vst [vmem:[%s1633_s15 + $0x30] sm:$0xff] %v855_v48  ;;  %v853_v57 = vmul.f32 %v1259_v56, %v1558_v42  ;;  %1286 = vpow2.f32 %v749_v9  ;;  %v783_v11 = vmul.f32 1.442695, %v720_v61  ;;  %v1698_v16 = vadd.f32 %v1504_v51, %v647_v2 }
 0x10c   : > { %v1263_v8 = vpop.eup %1262  ;;  %903 = vst [vmem:[%s1633_s15 + $0xb0] sm:$0xff] %v871_v58  ;;  %v869_v60 = vmul.f32 %v1261_v3, %v1563_v46  ;;  %1288 = vpow2.f32 %v781_v14  ;;  %v702_v25 = vsub.f32 0.0, %v1693_v50 }
 0x10d   : > { %v1265_v38 = vpop.eup %1264  ;;  %885 = vst [vmem:[%s1633_s15 + $0x20] sm:$0xff] %v853_v57  ;;  %v856_v12 = vmul.f32 %v1263_v8, %v1568_v53  ;;  %1290 = vpow2.f32 %v745_v41  ;;  %v718_v6 = vsub.f32 0.0, %v1698_v16 }
 0x10e   : > { %v1267_v0 = vpop.eup %1266  ;;  %901 = vst [vmem:[%s1633_s15 + $0xa0] sm:$0xff] %v869_v60  ;;  %v872_v42 = vmul.f32 %v1265_v38, %v1573_v59  ;;  %1292 = vpow2.f32 %v777_v23  ;;  %v747_v32 = vmul.f32 1.442695, %v702_v25 }
 0x10f   : > { %v1269_v46 = vpop.eup %1268  ;;  %888 = vst [vmem:[%s1633_s15 + $0x38] sm:$0xff] %v856_v12  ;;  %v795_v52 = vadd.f32 1.0, %v1267_v0  ;;  %1294 = vpow2.f32 %v751_v34  ;;  %v779_v28 = vmul.f32 1.442695, %v718_v6 }
 0x110   : > { %v1271_v17 = vpop.eup %1270  ;;  %904 = vst [vmem:[%s1633_s15 + $0xb8] sm:$0xff] %v872_v42  ;;  %v811_v18 = vadd.f32 1.0, %v1269_v46  ;;  %1296 = vpow2.f32 %v783_v11 }
 0x111   : > { %v1273_v53 = vpop.eup %1272  ;;  %1298 = vrcp.f32 %v795_v52  ;;  %v793_v21 = vadd.f32 1.0, %v1271_v17 }
 0x112   : > { %v1275_v4 = vpop.eup %1274  ;;  %1300 = vrcp.f32 %v811_v18  ;;  %v809_v59 = vadd.f32 1.0, %v1273_v53 }
 0x113   : > { %v1277_v51 = vpop.eup %1276  ;;  %1302 = vrcp.f32 %v793_v21  ;;  %v796_v26 = vadd.f32 1.0, %v1275_v4 }
 0x114   : > { %v1279_v29 = vpop.eup %1278  ;;  %1304 = vrcp.f32 %v809_v59  ;;  %v812_v30 = vadd.f32 1.0, %v1277_v51 }
 0x115   : > { %v1281_v9 = vpop.eup %1280  ;;  %1306 = vrcp.f32 %v796_v26  ;;  %v794_v27 = vadd.f32 1.0, %v1279_v29 }
 0x116   : > { %v1283_v33 = vpop.eup %1282  ;;  %1308 = vrcp.f32 %v812_v30  ;;  %v810_v14 = vadd.f32 1.0, %v1281_v9 }
 0x117   : > { %v1285_v35 = vpop.eup %1284  ;;  %v854_v36 = vmul.f32 %v1283_v33, %v1578_v1  ;;  %1310 = vrcp.f32 %v794_v27 }
 0x118   : > { %v1287_v39 = vpop.eup %1286  ;;  %v870_v41 = vmul.f32 %v1285_v35, %v1582_v5  ;;  %1312 = vrcp.f32 %v810_v14 }
 0x119   : > { %v1289_v31 = vpop.eup %1288  ;;  %886 = vst [vmem:[%s1633_s15 + $0x28] sm:$0xff] %v854_v36  ;;  %v799_v43 = vadd.f32 1.0, %v1287_v39  ;;  %1314 = vpow2.f32 %v747_v32 }
 0x11a   : > { %v1291_v44 = vpop.eup %1290  ;;  %902 = vst [vmem:[%s1633_s15 + $0xa8] sm:$0xff] %v870_v41  ;;  %v815_v23 = vadd.f32 1.0, %v1289_v31  ;;  %1316 = vpow2.f32 %v779_v28 }
 0x11b   : > { %v1293_v47 = vpop.eup %1292  ;;  %1318 = vrcp.f32 %v799_v43  ;;  %v797_v48 = vadd.f32 1.0, %v1291_v44 }
 0x11c   : > { %v1295_v49 = vpop.eup %1294  ;;  %1320 = vrcp.f32 %v815_v23  ;;  %v813_v1 = vadd.f32 1.0, %v1293_v47 }
 0x11d   : > { %v1297_v54 = vpop.eup %1296  ;;  %1322 = vrcp.f32 %v797_v48  ;;  %v800_v5 = vadd.f32 1.0, %v1295_v49 }
 0x11e   : > { %v1299_v56 = vpop.eup %1298  ;;  %1324 = vrcp.f32 %v813_v1  ;;  %v816_v58 = vadd.f32 1.0, %v1297_v54 }
 0x11f   : > { %v1301_v61 = vpop.eup %1300  ;;  %v859_v2 = vmul.f32 %v1299_v56, %v1589_v20  ;;  %1326 = vrcp.f32 %v800_v5 }
 0x120   : > { %v1303_v3 = vpop.eup %1302  ;;  %v875_v57 = vmul.f32 %v1301_v61, %v1592_v24  ;;  %1328 = vrcp.f32 %v816_v58 }
 0x121   : > { %v1305_v34 = vpop.eup %1304  ;;  %891 = vst [vmem:[%s1633_s15 + $0x50] sm:$0xff] %v859_v2  ;;  %v857_v8 = vmul.f32 %v1303_v3, %v1598_v40 }
 0x122   : > { %v1307_v60 = vpop.eup %1306  ;;  %907 = vst [vmem:[%s1633_s15 + $0xd0] sm:$0xff] %v875_v57  ;;  %v873_v11 = vmul.f32 %v1305_v34, %v1602_v45 }
 0x123   : > { %v1309_v38 = vpop.eup %1308  ;;  %889 = vst [vmem:[%s1633_s15 + $0x40] sm:$0xff] %v857_v8  ;;  %v860_v20 = vmul.f32 %v1307_v60, %v1611_v63 }
 0x124   : > { %v1311_v12 = vpop.eup %1310  ;;  %905 = vst [vmem:[%s1633_s15 + $0xc0] sm:$0xff] %v873_v11  ;;  %v876_v24 = vmul.f32 %v1309_v38, %v1615_v7 }
 0x125   : > { %v1313_v0 = vpop.eup %1312  ;;  %892 = vst [vmem:[%s1633_s15 + $0x58] sm:$0xff] %v860_v20  ;;  %v858_v42 = vmul.f32 %v1311_v12, %v1620_v15 }
 0x126   : > { %v1315_v46 = vpop.eup %1314  ;;  %908 = vst [vmem:[%s1633_s15 + $0xd8] sm:$0xff] %v876_v24  ;;  %v874_v40 = vmul.f32 %v1313_v0, %v1624_v22 }
 0x127   : > { %v1317_v52 = vpop.eup %1316  ;;  %890 = vst [vmem:[%s1633_s15 + $0x48] sm:$0xff] %v858_v42  ;;  %v798_v45 = vadd.f32 1.0, %v1315_v46 }
 0x128   : > { %v1319_v17 = vpop.eup %1318  ;;  %906 = vst [vmem:[%s1633_s15 + $0xc8] sm:$0xff] %v874_v40  ;;  %v814_v63 = vadd.f32 1.0, %v1317_v52 }
 0x129   : > { %v1321_v18 = vpop.eup %1320  ;;  %v863_v7 = vmul.f32 %v1319_v17, %v1639_v55  ;;  %1330 = vrcp.f32 %v798_v45 }
 0x12a   : > { %v1323_v15 = vpop.eup %1322  ;;  %v879_v53 = vmul.f32 %v1321_v18, %v1644_v62  ;;  %1332 = vrcp.f32 %v814_v63 }
 0x12b   : > { %v1325_v22 = vpop.eup %1324  ;;  %895 = vst [vmem:[%s1633_s15 + $0x70] sm:$0xff] %v863_v7  ;;  %v861_v21 = vmul.f32 %v1323_v15, %v1652_v10 }
 0x12c   : > { %v1327_v25 = vpop.eup %1326  ;;  %911 = vst [vmem:[%s1633_s15 + $0xf0] sm:$0xff] %v879_v53  ;;  %v877_v4 = vmul.f32 %v1325_v22, %v1658_v13 }
 0x12d   : > { %v1329_v59 = vpop.eup %1328  ;;  %893 = vst [vmem:[%s1633_s15 + $0x60] sm:$0xff] %v861_v21  ;;  %v864_v55 = vmul.f32 %v1327_v25, %v1674_v19 }
 0x12e   : > { %909 = vst [vmem:[%s1633_s15 + $0xe0] sm:$0xff] %v877_v4  ;;  %v880_v6 = vmul.f32 %v1329_v59, %v1678_v37 }
 0x12f   : > { %896 = vst [vmem:[%s1633_s15 + $0x78] sm:$0xff] %v864_v55 }
 0x130   : > { %912 = vst [vmem:[%s1633_s15 + $0xf8] sm:$0xff] %v880_v6 }
 0x136   : > { %v1331_v62 = vpop.eup %1330 }
 0x137   : > { %v1333_v51 = vpop.eup %1332  ;;  %v862_v26 = vmul.f32 %v1331_v62, %v1693_v50 }
 0x138   : > { %v878_v10 = vmul.f32 %v1333_v51, %v1698_v16 }
 0x139   : > { %894 = vst [vmem:[%s1633_s15 + $0x68] sm:$0xff] %v862_v26 }
 0x13a   : > { %910 = vst [vmem:[%s1633_s15 + $0xe8] sm:$0xff] %v878_v10 }
 0x13b PF: > { %s14_s19 = sadd.s32 1, %s1372_s19   ;;  %s1760_s15 = smov %s1364_s17 }
 0x13c   : > { %p11_p7 = scmp.ge.s32.totalorder %s14_s19, 6   ;;  %s1761_s16 = smov %s1368_s18 }
 0x13d   : > { %s1762_s17 = smov %s1765_s20  ;;  %s1763_s18 = smov %s1769_s21 }
 0x13e   :  { %13 = sbr.rel (!%p11_p7) target bundleno = 3 (0x3), region = 76 }

// kernel: _lambda_.7
= control target key start
LH: loop header
LB: loop body
LE: loop exit
PB: predicated region body
PF: predicated region fallthrough
CT: control target
= control target key end

     0   :  { %s1399_s15 = smov 0   ;;  %s1401_s16 = smov 0   ;;  %s1755_s0 = inlined_call_operand.vmem [shape: f32[2,2,256,6], index: 0, kind: input, shape index: {}]   ;;  %s1756_s1 = inlined_call_operand.vmem [shape: bf16[2,1,6,128], index: 1, kind: input, shape index: {}]   ;;  %s1757_s2 = inlined_call_operand.vmem [shape: f32[2,1,128], index: 2, kind: input, shape index: {}]   ;;  %s1758_s3 = inlined_call_operand.vmem [shape: f32[2,1,128], index: 3, kind: input, shape index: {}]   ;;  %s1759_s4 = inlined_call_operand.vmem [shape: f32[2,2,256,128], index: 4, kind: output, shape index: {}]  }
   0x1   :  { %s1403_s17 = smov 0   ;;  %s1405_s18 = smov 0  }
   0x2   :  { %s1407_s19 = smov 0  }
   0x3 LB: > { %s36_s20 = sadd.s32 1, %s1364_s17  ;;  %s40_s21 = sadd.s32 1, %s1368_s18  ;;  %s1372_s19 = sphi %s1407_s19, %s14_s19   ;;  %s1368_s18 = sphi %s1405_s18, %s1763_s18   ;;  %s1364_s17 = sphi %s1403_s17, %s1762_s17   ;;  %s1360_s16 = sphi %s1401_s16, %s1761_s16   ;;  %s1356_s15 = sphi %s1399_s15, %s1760_s15  }
   0x4   : > { %p38_p0 = scmp.ge.s32.totalorder %s36_s20, 2  ;;  %p1083_p1 = scmp.ge.s32.totalorder %s1372_s19, 1 }
   0x5   : > { %p240_p2 = scmp.lt.s32.totalorder %s1372_s19, 5 }
   0x6   : > { %s1765_s20 = smov (%p38_p0, %s36_s20), 0  ;;  %s1767_s21 = smov (!%p38_p0, %s40_s21), %s1368_s18 }
   0x7   : > { %p241_p3 = pnand %p1083_p1, %p240_p2  ;;  %p42_p4 = scmp.ge.s32.totalorder %s1767_s21, 2 }
   0x8   : > { %p300_p5 = scmp.lt.s32.totalorder (!%p241_p3), %s1360_s16, 1  ;;  %p302_p6 = scmp.lt.s32.totalorder (!%p241_p3), %s1356_s15, 1 }
   0x9   : > { %s1769_s21 = smov (%p42_p4, %s1767_s21), 0  ;;  %244 = sbr.rel (%p241_p3) target bundleno = 315 (0x13b), region = 36 }
   0xe   : > { %s1771_s16 = smov (!%p300_p5, %s1360_s16), 1  ;;  %s1773_s15 = smov (!%p302_p6, %s1356_s15), 1  ;;  %vm446_vm0 = vcmask 1042432   ;;  %vm397_vm1 = vcmask 48128  }
   0xf   : > { %s1085_s22 = sshll.u32 %s1771_s16, 6  ;;  %s1087_s23 = sshll.u32 %s1771_s16, 2 }
  0x10   : > { %s1084_s24 = sshll.u32 %s1773_s15, 5  ;;  %s315_s27 = scalar_lea.vmem %s1756_s1, %s1087_s23 }
  0x11   : > { %s1436_s28 = sadd.s32 %s1085_s22, %s1084_s24  ;;  %v396_v0 = vld [vmem:[%s315_s27] sm:$0x7]  ;;  %s321_s9 = scalar_lea.vmem %s1757_s2, %s1771_s16 }
  0x12   : > { %s1086_s29 = sshll.u32 %s1436_s28, 3  ;;  %1164 = vmatprep.subr.msk.bf16.mxu0 %vm446_vm0, %v396_v0  ;;  %1165 = vmatprep.subr.msk.bf16.mxu1 %vm446_vm0, %v396_v0  ;;  %v448_v1 = vsel %vm446_vm0, %v396_v0, 0  ;;  %s327_s12 = scalar_lea.vmem %s1758_s3, %s1771_s16  ;;  %v1502_v50 = vld [vmem:[%s321_s9] ss:$0 sm:$0xff] }
  0x13   : > { %s1444_s6 = scalar_lea.vmem %s1755_s0, %s1086_s29  ;;  %1129 = vmatpush3.bf16.msra.mxu0 %v448_v1  ;;  %1163 = vmatpush3.bf16.msra.mxu1 %v448_v1  ;;  %v1504_v51 = vld [vmem:[%s327_s12] ss:$0 sm:$0xff]  ;;  %s1633_s15 = scalar_lea.vmem %s1759_s4, %s1086_s29 }
  0x14   : > { %v348_v2 = vld [vmem:[%s1444_s6] sm:$0xff]  ;;  %v349_v3 = vld [vmem:[%s1444_s6 + $0x8] sm:$0xff]  ;;  %v350_v7 = vld [vmem:[%s1444_s6 + $0x10] sm:$0xff] }
  0x15   : > { %v364_v4 = vld [vmem:[%s1444_s6 + $0x80] sm:$0xff]  ;;  %v380_v5 = vpack.c.bf16 %v349_v3, %v348_v2  ;;  %v365_v6 = vld [vmem:[%s1444_s6 + $0x88] sm:$0xff]  ;;  %v351_v8 = vld [vmem:[%s1444_s6 + $0x18] sm:$0xff] }
  0x16   : > { %v388_v9 = vpack.c.bf16 %v365_v6, %v364_v4  ;;  %v381_v10 = vpack.c.bf16 %v351_v8, %v350_v7  ;;  %v366_v11 = vld [vmem:[%s1444_s6 + $0x90] sm:$0xff]  ;;  %v367_v12 = vld [vmem:[%s1444_s6 + $0x98] sm:$0xff]  ;;  %v352_v13 = vld [vmem:[%s1444_s6 + $0x20] sm:$0xff] }
  0x17   : > { %1130 = vmatprep.mubr.msk.bf16.mxu0 %vm397_vm1, %v380_v5  ;;  %v389_v14 = vpack.c.bf16 %v367_v12, %v366_v11  ;;  %v353_v15 = vld [vmem:[%s1444_s6 + $0x28] sm:$0xff]  ;;  %v368_v16 = vld [vmem:[%s1444_s6 + $0xa0] sm:$0xff]  ;;  %v354_v20 = vld [vmem:[%s1444_s6 + $0x30] sm:$0xff] }
  0x18   : > { %v369_v17 = vld [vmem:[%s1444_s6 + $0xa8] sm:$0xff]  ;;  %1146 = vmatprep.mubr.msk.bf16.mxu1 %vm397_vm1, %v388_v9  ;;  %1131 = vmatmul.mubr.msk.bf16.vlgmr.msra.gmra.mxu0 %vm397_vm1, %v381_v10  ;;  %v382_v18 = vpack.c.bf16 %v353_v15, %v352_v13  ;;  %v355_v21 = vld [vmem:[%s1444_s6 + $0x38] sm:$0xff]  ;;  %v370_v22 = vld [vmem:[%s1444_s6 + $0xb0] sm:$0xff] }
  0x19   : > { %v390_v19 = vpack.c.bf16 %v369_v17, %v368_v16  ;;  %1147 = vmatmul.mubr.msk.bf16.vlgmr.msra.gmra.mxu1 %vm397_vm1, %v389_v14  ;;  %v371_v23 = vld [vmem:[%s1444_s6 + $0xb8] sm:$0xff]  ;;  %v356_v24 = vld [vmem:[%s1444_s6 + $0x40] sm:$0xff]  ;;  %v357_v25 = vld [vmem:[%s1444_s6 + $0x48] sm:$0xff]  ;;  %v383_v28 = vpack.c.bf16 %v355_v21, %v354_v20 }
  0x1a   : > { %1134 = vmatprep.mubr.msk.bf16.mxu0 %vm397_vm1, %v382_v18  ;;  %v372_v26 = vld [vmem:[%s1444_s6 + $0xc0] sm:$0xff]  ;;  %v373_v27 = vld [vmem:[%s1444_s6 + $0xc8] sm:$0xff]  ;;  %v391_v29 = vpack.c.bf16 %v371_v23, %v370_v22  ;;  %v384_v30 = vpack.c.bf16 %v357_v25, %v356_v24  ;;  %v358_v32 = vld [vmem:[%s1444_s6 + $0x50] sm:$0xff] }
  0x1b   : > { %1150 = vmatprep.mubr.msk.bf16.mxu1 %vm397_vm1, %v390_v19  ;;  %v392_v31 = vpack.c.bf16 %v373_v27, %v372_v26  ;;  %v359_v33 = vld [vmem:[%s1444_s6 + $0x58] sm:$0xff]  ;;  %v374_v34 = vld [vmem:[%s1444_s6 + $0xd0] sm:$0xff]  ;;  %v360_v36 = vld [vmem:[%s1444_s6 + $0x60] sm:$0xff] }
  0x1c   : > { %v375_v35 = vld [vmem:[%s1444_s6 + $0xd8] sm:$0xff]  ;;  %v361_v37 = vld [vmem:[%s1444_s6 + $0x68] sm:$0xff]  ;;  %v376_v38 = vld [vmem:[%s1444_s6 + $0xe0] sm:$0xff]  ;;  %v385_v40 = vpack.c.bf16 %v359_v33, %v358_v32 }
  0x1d   : > { %v377_v39 = vld [vmem:[%s1444_s6 + $0xe8] sm:$0xff]  ;;  %v393_v41 = vpack.c.bf16 %v375_v35, %v374_v34  ;;  %v386_v42 = vpack.c.bf16 %v361_v37, %v360_v36  ;;  %v362_v44 = vld [vmem:[%s1444_s6 + $0x70] sm:$0xff]  ;;  %v363_v45 = vld [vmem:[%s1444_s6 + $0x78] sm:$0xff] }
  0x1e   : > { %v394_v43 = vpack.c.bf16 %v377_v39, %v376_v38  ;;  %v378_v46 = vld [vmem:[%s1444_s6 + $0xf0] sm:$0xff]  ;;  %v379_v47 = vld [vmem:[%s1444_s6 + $0xf8] sm:$0xff]  ;;  %v387_v48 = vpack.c.bf16 %v363_v45, %v362_v44 }
  0x1f   : > { %v395_v49 = vpack.c.bf16 %v379_v47, %v378_v46 }
  0x20   : > { %1135 = vmatmul.mubr.msk.bf16.gmra.mxu0 %vm397_vm1, %v383_v28 }
  0x21   : > { %1151 = vmatmul.mubr.msk.bf16.gmra.mxu1 %vm397_vm1, %v391_v29  ;;  %1138 = vmatprep.mubr.msk.bf16.mxu0 %vm397_vm1, %v384_v30 }
  0x22   : > { %1154 = vmatprep.mubr.msk.bf16.mxu1 %vm397_vm1, %v392_v31 }
  0x28   : > { %1139 = vmatmul.mubr.msk.bf16.gmra.mxu0 %vm397_vm1, %v385_v40 }
  0x29   : > { %1155 = vmatmul.mubr.msk.bf16.gmra.mxu1 %vm397_vm1, %v393_v41  ;;  %1142 = vmatprep.mubr.msk.bf16.mxu0 %vm397_vm1, %v386_v42 }
  0x2a   : > { %1158 = vmatprep.mubr.msk.bf16.mxu1 %vm397_vm1, %v394_v43 }
  0x30   : > { %1143 = vmatmul.mubr.msk.bf16.gmra.mxu0 %vm397_vm1, %v387_v48 }
  0x31   : > { %1159 = vmatmul.mubr.msk.bf16.gmra.mxu1 %vm397_vm1, %v395_v49 }
  0xd8   : > { %v1132_v52 = vpop.f32.mrf.mxu0 }
  0xd9   : > { %v620_v53 = vmul.f32 %v1132_v52, %v1502_v50  ;;  %v1148_v54 = vpop.f32.mrf.mxu1 }
  0xda   : > { %v636_v55 = vmul.f32 %v1148_v54, %v1502_v50  ;;  %v484_v56 = vpop.f32.mrf.mxu0 }
  0xdb   : > { %v1509_v57 = vadd.f32 %v1504_v51, %v620_v53  ;;  %v618_v58 = vmul.f32 %v1502_v50, %v484_v56  ;;  %v548_v59 = vpop.f32.mrf.mxu1 }
  0xdc   : > { %v1513_v60 = vadd.f32 %v1504_v51, %v636_v55  ;;  %v634_v61 = vmul.f32 %v1502_v50, %v548_v59  ;;  %v1133_v62 = vpop.f32.mrf.mxu0 }
  0xdd   : > { %v691_v63 = vsub.f32 0.0, %v1509_v57  ;;  %v1518_v0 = vadd.f32 %v1504_v51, %v618_v58  ;;  %v621_v1 = vmul.f32 %v1133_v62, %v1502_v50  ;;  %v1149_v2 = vpop.f32.mrf.mxu1 }
  0xde   : > { %v707_v3 = vsub.f32 0.0, %v1513_v60  ;;  %v1523_v4 = vadd.f32 %v1504_v51, %v634_v61  ;;  %v637_v5 = vmul.f32 %v1149_v2, %v1502_v50  ;;  %v487_v6 = vpop.f32.mrf.mxu0 }
  0xdf   : > { %v725_v7 = vmul.f32 1.442695, %v691_v63  ;;  %v689_v8 = vsub.f32 0.0, %v1518_v0  ;;  %v1528_v9 = vadd.f32 %v1504_v51, %v621_v1  ;;  %v619_v10 = vmul.f32 %v1502_v50, %v487_v6  ;;  %v551_v11 = vpop.f32.mrf.mxu1 }
  0xe0   : > { %v757_v12 = vmul.f32 1.442695, %v707_v3  ;;  %v705_v13 = vsub.f32 0.0, %v1523_v4  ;;  %v1533_v14 = vadd.f32 %v1504_v51, %v637_v5  ;;  %v635_v15 = vmul.f32 %v1502_v50, %v551_v11  ;;  %v1136_v16 = vpop.f32.mrf.mxu0 }
  0xe1   : > { %1206 = vpow2.f32 %v725_v7  ;;  %v721_v17 = vmul.f32 1.442695, %v689_v8  ;;  %v692_v18 = vsub.f32 0.0, %v1528_v9  ;;  %v1538_v19 = vadd.f32 %v1504_v51, %v619_v10  ;;  %v1152_v20 = vpop.f32.mrf.mxu1 }
  0xe2   : > { %1208 = vpow2.f32 %v757_v12  ;;  %v753_v21 = vmul.f32 1.442695, %v705_v13  ;;  %v708_v22 = vsub.f32 0.0, %v1533_v14  ;;  %v1542_v23 = vadd.f32 %v1504_v51, %v635_v15  ;;  %v500_v24 = vpop.f32.mrf.mxu0 }
  0xe3   : > { %1210 = vpow2.f32 %v721_v17  ;;  %v727_v25 = vmul.f32 1.442695, %v692_v18  ;;  %v690_v26 = vsub.f32 0.0, %v1538_v19  ;;  %v624_v27 = vmul.f32 %v1136_v16, %v1502_v50  ;;  %v564_v28 = vpop.f32.mrf.mxu1 }
  0xe4   : > { %1212 = vpow2.f32 %v753_v21  ;;  %v759_v29 = vmul.f32 1.442695, %v708_v22  ;;  %v706_v30 = vsub.f32 0.0, %v1542_v23  ;;  %v640_v31 = vmul.f32 %v1152_v20, %v1502_v50  ;;  %v1137_v32 = vpop.f32.mrf.mxu0 }
  0xe5   : > { %1214 = vpow2.f32 %v727_v25  ;;  %v723_v33 = vmul.f32 1.442695, %v690_v26  ;;  %v1549_v34 = vadd.f32 %v1504_v51, %v624_v27  ;;  %v622_v35 = vmul.f32 %v1502_v50, %v500_v24  ;;  %v1153_v36 = vpop.f32.mrf.mxu1 }
  0xe6   : > { %1216 = vpow2.f32 %v759_v29  ;;  %v755_v37 = vmul.f32 1.442695, %v706_v30  ;;  %v1553_v38 = vadd.f32 %v1504_v51, %v640_v31  ;;  %v638_v39 = vmul.f32 %v1502_v50, %v564_v28  ;;  %v503_v40 = vpop.f32.mrf.mxu0 }
  0xe7   : > { %1218 = vpow2.f32 %v723_v33  ;;  %v695_v41 = vsub.f32 0.0, %v1549_v34  ;;  %v1558_v42 = vadd.f32 %v1504_v51, %v622_v35  ;;  %v625_v43 = vmul.f32 %v1137_v32, %v1502_v50  ;;  %v567_v44 = vpop.f32.mrf.mxu1 }
  0xe8   : > { %1220 = vpow2.f32 %v755_v37  ;;  %v711_v45 = vsub.f32 0.0, %v1553_v38  ;;  %v1563_v46 = vadd.f32 %v1504_v51, %v638_v39  ;;  %v641_v47 = vmul.f32 %v1153_v36, %v1502_v50  ;;  %v1140_v48 = vpop.f32.mrf.mxu0 }
  0xe9   : > { %v733_v49 = vmul.f32 1.442695, %v695_v41  ;;  %v693_v52 = vsub.f32 0.0, %v1558_v42  ;;  %v1568_v53 = vadd.f32 %v1504_v51, %v625_v43  ;;  %v623_v54 = vmul.f32 %v1502_v50, %v503_v40  ;;  %v1156_v55 = vpop.f32.mrf.mxu1 }
  0xea   : > { %v765_v56 = vmul.f32 1.442695, %v711_v45  ;;  %v709_v58 = vsub.f32 0.0, %v1563_v46  ;;  %v1573_v59 = vadd.f32 %v1504_v51, %v641_v47  ;;  %v639_v61 = vmul.f32 %v1502_v50, %v567_v44  ;;  %v516_v6 = vpop.f32.mrf.mxu0 }
  0xeb   : > { %1222 = vpow2.f32 %v733_v49  ;;  %v729_v62 = vmul.f32 1.442695, %v693_v52  ;;  %v696_v63 = vsub.f32 0.0, %v1568_v53  ;;  %v1578_v1 = vadd.f32 %v1504_v51, %v623_v54  ;;  %v580_v10 = vpop.f32.mrf.mxu1 }
  0xec   : > { %1224 = vpow2.f32 %v765_v56  ;;  %v761_v2 = vmul.f32 1.442695, %v709_v58  ;;  %v712_v3 = vsub.f32 0.0, %v1573_v59  ;;  %v1582_v5 = vadd.f32 %v1504_v51, %v639_v61  ;;  %v1141_v25 = vpop.f32.mrf.mxu0 }
  0xed   : > { %1226 = vpow2.f32 %v729_v62  ;;  %v735_v7 = vmul.f32 1.442695, %v696_v63  ;;  %v628_v8 = vmul.f32 %v1140_v48, %v1502_v50  ;;  %v694_v13 = vsub.f32 0.0, %v1578_v1  ;;  %v1157_v30 = vpop.f32.mrf.mxu1 }
  0xee   : > { %v1207_v11 = vpop.eup %1206  ;;  %1228 = vpow2.f32 %v761_v2  ;;  %v767_v12 = vmul.f32 1.442695, %v712_v3  ;;  %v644_v15 = vmul.f32 %v1156_v55, %v1502_v50  ;;  %v710_v18 = vsub.f32 0.0, %v1582_v5  ;;  %v519_v47 = vpop.f32.mrf.mxu0 }
  0xef   : > { %v1209_v16 = vpop.eup %1208  ;;  %v787_v17 = vadd.f32 1.0, %v1207_v11  ;;  %1230 = vpow2.f32 %v735_v7  ;;  %v1589_v20 = vadd.f32 %v1504_v51, %v628_v8  ;;  %v626_v29 = vmul.f32 %v1502_v50, %v516_v6  ;;  %v583_v55 = vpop.f32.mrf.mxu1 }
  0xf0   : > { %v1211_v21 = vpop.eup %1210  ;;  %v803_v22 = vadd.f32 1.0, %v1209_v16  ;;  %1232 = vpow2.f32 %v767_v12  ;;  %v1592_v24 = vadd.f32 %v1504_v51, %v644_v15  ;;  %v731_v33 = vmul.f32 1.442695, %v694_v13 }
  0xf1   : > { %v1213_v26 = vpop.eup %1212  ;;  %1234 = vrcp.f32 %v787_v17  ;;  %v785_v27 = vadd.f32 1.0, %v1211_v21  ;;  %v699_v28 = vsub.f32 0.0, %v1589_v20  ;;  %v642_v35 = vmul.f32 %v1502_v50, %v580_v10  ;;  %v1144_v10 = vpop.f32.mrf.mxu0 }
  0xf2   : > { %v1215_v31 = vpop.eup %1214  ;;  %1236 = vrcp.f32 %v803_v22  ;;  %v801_v32 = vadd.f32 1.0, %v1213_v26  ;;  %v763_v39 = vmul.f32 1.442695, %v710_v18  ;;  %v1598_v40 = vadd.f32 %v1504_v51, %v626_v29  ;;  %v1160_v16 = vpop.f32.mrf.mxu1 }
  0xf3   : > { %v1217_v36 = vpop.eup %1216  ;;  %1238 = vrcp.f32 %v785_v27  ;;  %v788_v37 = vadd.f32 1.0, %v1215_v31  ;;  %v715_v44 = vsub.f32 0.0, %v1592_v24  ;;  %v1602_v45 = vadd.f32 %v1504_v51, %v642_v35 }
  0xf4   : > { %v1219_v41 = vpop.eup %1218  ;;  %1240 = vrcp.f32 %v801_v32  ;;  %v804_v43 = vadd.f32 1.0, %v1217_v36  ;;  %v1604_v52 = vmul.f32 1.442695, %v699_v28  ;;  %v629_v54 = vmul.f32 %v1141_v25, %v1502_v50 }
  0xf5   : > { %v1221_v48 = vpop.eup %1220  ;;  %1242 = vrcp.f32 %v788_v37  ;;  %v786_v49 = vadd.f32 1.0, %v1219_v41  ;;  %v697_v58 = vsub.f32 0.0, %v1598_v40  ;;  %v645_v61 = vmul.f32 %v1157_v30, %v1502_v50  ;;  %v596_v41 = vpop.f32.mrf.mxu1 }
  0xf6   : > { %1244 = vrcp.f32 %v804_v43  ;;  %v802_v56 = vadd.f32 1.0, %v1221_v48  ;;  %v713_v62 = vsub.f32 0.0, %v1602_v45  ;;  %v1611_v63 = vadd.f32 %v1504_v51, %v629_v54 }
  0xf7   : > { %1246 = vrcp.f32 %v786_v49  ;;  %v627_v2 = vmul.f32 %v1502_v50, %v519_v47  ;;  %v773_v6 = vmul.f32 1.442695, %v715_v44  ;;  %v1615_v7 = vadd.f32 %v1504_v51, %v645_v61 }
  0xf8   : > { %v1223_v3 = vpop.eup %1222  ;;  %1248 = vrcp.f32 %v802_v56  ;;  %v643_v8 = vmul.f32 %v1502_v50, %v583_v55  ;;  %v700_v13 = vsub.f32 0.0, %v1611_v63  ;;  %v737_v27 = vmul.f32 1.442695, %v697_v58 }
  0xf9   : > { %v1225_v11 = vpop.eup %1224  ;;  %v791_v12 = vadd.f32 1.0, %v1223_v3  ;;  %1250 = vpow2.f32 %v731_v33  ;;  %v1620_v15 = vadd.f32 %v1504_v51, %v627_v2  ;;  %v716_v21 = vsub.f32 0.0, %v1615_v7  ;;  %v532_v33 = vpop.f32.mrf.mxu0 }
  0xfa   : > { %v1227_v17 = vpop.eup %1226  ;;  %v807_v18 = vadd.f32 1.0, %v1225_v11  ;;  %1252 = vpow2.f32 %v763_v39  ;;  %v1624_v22 = vadd.f32 %v1504_v51, %v643_v8  ;;  %v769_v28 = vmul.f32 1.442695, %v713_v62 }
  0xfb   : > { %v1229_v25 = vpop.eup %1228  ;;  %1254 = vrcp.f32 %v791_v12  ;;  %v789_v26 = vadd.f32 1.0, %v1227_v17  ;;  %v743_v31 = vmul.f32 1.442695, %v700_v13  ;;  %v698_v32 = vsub.f32 0.0, %v1620_v15 }
  0xfc   : > { %v1231_v29 = vpop.eup %1230  ;;  %1256 = vrcp.f32 %v807_v18  ;;  %v805_v30 = vadd.f32 1.0, %v1229_v25  ;;  %v775_v37 = vmul.f32 1.442695, %v716_v21  ;;  %v632_v39 = vmul.f32 %v1144_v10, %v1502_v50  ;;  %v1161_v21 = vpop.f32.mrf.mxu1 }
  0xfd   : > { %v1233_v35 = vpop.eup %1232  ;;  %1258 = vrcp.f32 %v789_v26  ;;  %v792_v36 = vadd.f32 1.0, %v1231_v29  ;;  %v714_v47 = vsub.f32 0.0, %v1624_v22  ;;  %v648_v48 = vmul.f32 %v1160_v16, %v1502_v50 }
  0xfe   : > { %v1235_v43 = vpop.eup %1234  ;;  %1260 = vrcp.f32 %v805_v30  ;;  %v808_v44 = vadd.f32 1.0, %v1233_v35  ;;  %v1639_v55 = vadd.f32 %v1504_v51, %v632_v39  ;;  %v630_v56 = vmul.f32 %v1502_v50, %v532_v33 }
  0xff   : > { %v1237_v49 = vpop.eup %1236  ;;  %v851_v54 = vmul.f32 %v1235_v43, %v1509_v57  ;;  %1262 = vrcp.f32 %v792_v36  ;;  %v1644_v62 = vadd.f32 %v1504_v51, %v648_v48  ;;  %v646_v2 = vmul.f32 %v1502_v50, %v596_v41 }
 0x100   : > { %v1239_v58 = vpop.eup %1238  ;;  %v867_v61 = vmul.f32 %v1237_v49, %v1513_v60  ;;  %1264 = vrcp.f32 %v808_v44  ;;  %v703_v8 = vsub.f32 0.0, %v1639_v55  ;;  %v1652_v10 = vadd.f32 %v1504_v51, %v630_v56 }
 0x101   : > { %v1241_v3 = vpop.eup %1240  ;;  %883 = vst [vmem:[%s1633_s15 + $0x10] sm:$0xff] %v851_v54  ;;  %v849_v57 = vmul.f32 %v1239_v58, %v1518_v0  ;;  %1266 = vpow2.f32 %v1604_v52  ;;  %v719_v12 = vsub.f32 0.0, %v1644_v62  ;;  %v1658_v13 = vadd.f32 %v1504_v51, %v646_v2  ;;  %v1145_v0 = vpop.f32.mrf.mxu0 }
 0x102   : > { %v1243_v60 = vpop.eup %1242  ;;  %899 = vst [vmem:[%s1633_s15 + $0x90] sm:$0xff] %v867_v61  ;;  %v865_v11 = vmul.f32 %v1241_v3, %v1523_v4  ;;  %1268 = vpow2.f32 %v773_v6  ;;  %v739_v17 = vmul.f32 1.442695, %v698_v32  ;;  %v701_v18 = vsub.f32 0.0, %v1652_v10 }
 0x103   : > { %v1245_v16 = vpop.eup %1244  ;;  %881 = vst [vmem:[%s1633_s15] sm:$0xff] %v849_v57  ;;  %v852_v52 = vmul.f32 %v1243_v60, %v1528_v9  ;;  %1270 = vpow2.f32 %v737_v27  ;;  %v771_v6 = vmul.f32 1.442695, %v714_v47  ;;  %v717_v26 = vsub.f32 0.0, %v1658_v13  ;;  %v535_v35 = vpop.f32.mrf.mxu0 }
 0x104   : > { %v1247_v25 = vpop.eup %1246  ;;  %897 = vst [vmem:[%s1633_s15 + $0x80] sm:$0xff] %v865_v11  ;;  %v868_v4 = vmul.f32 %v1245_v16, %v1533_v14  ;;  %1272 = vpow2.f32 %v769_v28  ;;  %v749_v9 = vmul.f32 1.442695, %v703_v8  ;;  %v633_v27 = vmul.f32 %v1145_v0, %v1502_v50 }
 0x105   : > { %v1249_v29 = vpop.eup %1248  ;;  %884 = vst [vmem:[%s1633_s15 + $0x18] sm:$0xff] %v852_v52  ;;  %v850_v30 = vmul.f32 %v1247_v25, %v1538_v19  ;;  %1274 = vpow2.f32 %v743_v31  ;;  %v781_v14 = vmul.f32 1.442695, %v719_v12  ;;  %v649_v28 = vmul.f32 %v1161_v21, %v1502_v50  ;;  %v599_v31 = vpop.f32.mrf.mxu1 }
 0x106   : > { %v1251_v32 = vpop.eup %1250  ;;  %900 = vst [vmem:[%s1633_s15 + $0x98] sm:$0xff] %v868_v4  ;;  %v866_v33 = vmul.f32 %v1249_v29, %v1542_v23  ;;  %1276 = vpow2.f32 %v775_v37  ;;  %v745_v41 = vmul.f32 1.442695, %v701_v18  ;;  %v1674_v19 = vadd.f32 %v1504_v51, %v633_v27 }
 0x107   : > { %v1253_v36 = vpop.eup %1252  ;;  %882 = vst [vmem:[%s1633_s15 + $0x8] sm:$0xff] %v850_v30  ;;  %v790_v39 = vadd.f32 1.0, %v1251_v32  ;;  %1278 = vpow2.f32 %v739_v17  ;;  %v777_v23 = vmul.f32 1.442695, %v717_v26  ;;  %v1678_v37 = vadd.f32 %v1504_v51, %v649_v28 }
 0x108   : > { %v1255_v43 = vpop.eup %1254  ;;  %898 = vst [vmem:[%s1633_s15 + $0x88] sm:$0xff] %v866_v33  ;;  %v806_v44 = vadd.f32 1.0, %v1253_v36  ;;  %1280 = vpow2.f32 %v771_v6  ;;  %v704_v49 = vsub.f32 0.0, %v1674_v19  ;;  %v631_v54 = vmul.f32 %v1502_v50, %v535_v35 }
 0x109   : > { %v1257_v47 = vpop.eup %1256  ;;  %v855_v48 = vmul.f32 %v1255_v43, %v1549_v34  ;;  %1282 = vrcp.f32 %v790_v39  ;;  %v720_v61 = vsub.f32 0.0, %v1678_v37  ;;  %v647_v2 = vmul.f32 %v1502_v50, %v599_v31 }
 0x10a   : > { %v1259_v56 = vpop.eup %1258  ;;  %v871_v58 = vmul.f32 %v1257_v47, %v1553_v38  ;;  %1284 = vrcp.f32 %v806_v44  ;;  %v751_v34 = vmul.f32 1.442695, %v704_v49  ;;  %v1693_v50 = vadd.f32 %v1504_v51, %v631_v54 }
 0x10b   : > { %v1261_v3 = vpop.eup %1260  ;;  %887 = vst [vmem:[%s1633_s15 + $0x30] sm:$0xff] %v855_v48  ;;  %v853_v57 = vmul.f32 %v1259_v56, %v1558_v42  ;;  %1286 = vpow2.f32 %v749_v9  ;;  %v783_v11 = vmul.f32 1.442695, %v720_v61  ;;  %v1698_v16 = vadd.f32 %v1504_v51, %v647_v2 }
 0x10c   : > { %v1263_v8 = vpop.eup %1262  ;;  %903 = vst [vmem:[%s1633_s15 + $0xb0] sm:$0xff] %v871_v58  ;;  %v869_v60 = vmul.f32 %v1261_v3, %v1563_v46  ;;  %1288 = vpow2.f32 %v781_v14  ;;  %v702_v25 = vsub.f32 0.0, %v1693_v50 }
 0x10d   : > { %v1265_v38 = vpop.eup %1264  ;;  %885 = vst [vmem:[%s1633_s15 + $0x20] sm:$0xff] %v853_v57  ;;  %v856_v12 = vmul.f32 %v1263_v8, %v1568_v53  ;;  %1290 = vpow2.f32 %v745_v41  ;;  %v718_v6 = vsub.f32 0.0, %v1698_v16 }
 0x10e   : > { %v1267_v0 = vpop.eup %1266  ;;  %901 = vst [vmem:[%s1633_s15 + $0xa0] sm:$0xff] %v869_v60  ;;  %v872_v42 = vmul.f32 %v1265_v38, %v1573_v59  ;;  %1292 = vpow2.f32 %v777_v23  ;;  %v747_v32 = vmul.f32 1.442695, %v702_v25 }
 0x10f   : > { %v1269_v46 = vpop.eup %1268  ;;  %888 = vst [vmem:[%s1633_s15 + $0x38] sm:$0xff] %v856_v12  ;;  %v795_v52 = vadd.f32 1.0, %v1267_v0  ;;  %1294 = vpow2.f32 %v751_v34  ;;  %v779_v28 = vmul.f32 1.442695, %v718_v6 }
 0x110   : > { %v1271_v17 = vpop.eup %1270  ;;  %904 = vst [vmem:[%s1633_s15 + $0xb8] sm:$0xff] %v872_v42  ;;  %v811_v18 = vadd.f32 1.0, %v1269_v46  ;;  %1296 = vpow2.f32 %v783_v11 }
 0x111   : > { %v1273_v53 = vpop.eup %1272  ;;  %1298 = vrcp.f32 %v795_v52  ;;  %v793_v21 = vadd.f32 1.0, %v1271_v17 }
 0x112   : > { %v1275_v4 = vpop.eup %1274  ;;  %1300 = vrcp.f32 %v811_v18  ;;  %v809_v59 = vadd.f32 1.0, %v1273_v53 }
 0x113   : > { %v1277_v51 = vpop.eup %1276  ;;  %1302 = vrcp.f32 %v793_v21  ;;  %v796_v26 = vadd.f32 1.0, %v1275_v4 }
 0x114   : > { %v1279_v29 = vpop.eup %1278  ;;  %1304 = vrcp.f32 %v809_v59  ;;  %v812_v30 = vadd.f32 1.0, %v1277_v51 }
 0x115   : > { %v1281_v9 = vpop.eup %1280  ;;  %1306 = vrcp.f32 %v796_v26  ;;  %v794_v27 = vadd.f32 1.0, %v1279_v29 }
 0x116   : > { %v1283_v33 = vpop.eup %1282  ;;  %1308 = vrcp.f32 %v812_v30  ;;  %v810_v14 = vadd.f32 1.0, %v1281_v9 }
 0x117   : > { %v1285_v35 = vpop.eup %1284  ;;  %v854_v36 = vmul.f32 %v1283_v33, %v1578_v1  ;;  %1310 = vrcp.f32 %v794_v27 }
 0x118   : > { %v1287_v39 = vpop.eup %1286  ;;  %v870_v41 = vmul.f32 %v1285_v35, %v1582_v5  ;;  %1312 = vrcp.f32 %v810_v14 }
 0x119   : > { %v1289_v31 = vpop.eup %1288  ;;  %886 = vst [vmem:[%s1633_s15 + $0x28] sm:$0xff] %v854_v36  ;;  %v799_v43 = vadd.f32 1.0, %v1287_v39  ;;  %1314 = vpow2.f32 %v747_v32 }
 0x11a   : > { %v1291_v44 = vpop.eup %1290  ;;  %902 = vst [vmem:[%s1633_s15 + $0xa8] sm:$0xff] %v870_v41  ;;  %v815_v23 = vadd.f32 1.0, %v1289_v31  ;;  %1316 = vpow2.f32 %v779_v28 }
 0x11b   : > { %v1293_v47 = vpop.eup %1292  ;;  %1318 = vrcp.f32 %v799_v43  ;;  %v797_v48 = vadd.f32 1.0, %v1291_v44 }
 0x11c   : > { %v1295_v49 = vpop.eup %1294  ;;  %1320 = vrcp.f32 %v815_v23  ;;  %v813_v1 = vadd.f32 1.0, %v1293_v47 }
 0x11d   : > { %v1297_v54 = vpop.eup %1296  ;;  %1322 = vrcp.f32 %v797_v48  ;;  %v800_v5 = vadd.f32 1.0, %v1295_v49 }
 0x11e   : > { %v1299_v56 = vpop.eup %1298  ;;  %1324 = vrcp.f32 %v813_v1  ;;  %v816_v58 = vadd.f32 1.0, %v1297_v54 }
 0x11f   : > { %v1301_v61 = vpop.eup %1300  ;;  %v859_v2 = vmul.f32 %v1299_v56, %v1589_v20  ;;  %1326 = vrcp.f32 %v800_v5 }
 0x120   : > { %v1303_v3 = vpop.eup %1302  ;;  %v875_v57 = vmul.f32 %v1301_v61, %v1592_v24  ;;  %1328 = vrcp.f32 %v816_v58 }
 0x121   : > { %v1305_v34 = vpop.eup %1304  ;;  %891 = vst [vmem:[%s1633_s15 + $0x50] sm:$0xff] %v859_v2  ;;  %v857_v8 = vmul.f32 %v1303_v3, %v1598_v40 }
 0x122   : > { %v1307_v60 = vpop.eup %1306  ;;  %907 = vst [vmem:[%s1633_s15 + $0xd0] sm:$0xff] %v875_v57  ;;  %v873_v11 = vmul.f32 %v1305_v34, %v1602_v45 }
 0x123   : > { %v1309_v38 = vpop.eup %1308  ;;  %889 = vst [vmem:[%s1633_s15 + $0x40] sm:$0xff] %v857_v8  ;;  %v860_v20 = vmul.f32 %v1307_v60, %v1611_v63 }
 0x124   : > { %v1311_v12 = vpop.eup %1310  ;;  %905 = vst [vmem:[%s1633_s15 + $0xc0] sm:$0xff] %v873_v11  ;;  %v876_v24 = vmul.f32 %v1309_v38, %v1615_v7 }
 0x125   : > { %v1313_v0 = vpop.eup %1312  ;;  %892 = vst [vmem:[%s1633_s15 + $0x58] sm:$0xff] %v860_v20  ;;  %v858_v42 = vmul.f32 %v1311_v12, %v1620_v15 }
 0x126   : > { %v1315_v46 = vpop.eup %1314  ;;  %908 = vst [vmem:[%s1633_s15 + $0xd8] sm:$0xff] %v876_v24  ;;  %v874_v40 = vmul.f32 %v1313_v0, %v1624_v22 }
 0x127   : > { %v1317_v52 = vpop.eup %1316  ;;  %890 = vst [vmem:[%s1633_s15 + $0x48] sm:$0xff] %v858_v42  ;;  %v798_v45 = vadd.f32 1.0, %v1315_v46 }
 0x128   : > { %v1319_v17 = vpop.eup %1318  ;;  %906 = vst [vmem:[%s1633_s15 + $0xc8] sm:$0xff] %v874_v40  ;;  %v814_v63 = vadd.f32 1.0, %v1317_v52 }
 0x129   : > { %v1321_v18 = vpop.eup %1320  ;;  %v863_v7 = vmul.f32 %v1319_v17, %v1639_v55  ;;  %1330 = vrcp.f32 %v798_v45 }
 0x12a   : > { %v1323_v15 = vpop.eup %1322  ;;  %v879_v53 = vmul.f32 %v1321_v18, %v1644_v62  ;;  %1332 = vrcp.f32 %v814_v63 }
 0x12b   : > { %v1325_v22 = vpop.eup %1324  ;;  %895 = vst [vmem:[%s1633_s15 + $0x70] sm:$0xff] %v863_v7  ;;  %v861_v21 = vmul.f32 %v1323_v15, %v1652_v10 }
 0x12c   : > { %v1327_v25 = vpop.eup %1326  ;;  %911 = vst [vmem:[%s1633_s15 + $0xf0] sm:$0xff] %v879_v53  ;;  %v877_v4 = vmul.f32 %v1325_v22, %v1658_v13 }
 0x12d   : > { %v1329_v59 = vpop.eup %1328  ;;  %893 = vst [vmem:[%s1633_s15 + $0x60] sm:$0xff] %v861_v21  ;;  %v864_v55 = vmul.f32 %v1327_v25, %v1674_v19 }
 0x12e   : > { %909 = vst [vmem:[%s1633_s15 + $0xe0] sm:$0xff] %v877_v4  ;;  %v880_v6 = vmul.f32 %v1329_v59, %v1678_v37 }
 0x12f   : > { %896 = vst [vmem:[%s1633_s15 + $0x78] sm:$0xff] %v864_v55 }
 0x130   : > { %912 = vst [vmem:[%s1633_s15 + $0xf8] sm:$0xff] %v880_v6 }
 0x136   : > { %v1331_v62 = vpop.eup %1330 }
 0x137   : > { %v1333_v51 = vpop.eup %1332  ;;  %v862_v26 = vmul.f32 %v1331_v62, %v1693_v50 }
 0x138   : > { %v878_v10 = vmul.f32 %v1333_v51, %v1698_v16 }
 0x139   : > { %894 = vst [vmem:[%s1633_s15 + $0x68] sm:$0xff] %v862_v26 }
 0x13a   : > { %910 = vst [vmem:[%s1633_s15 + $0xe8] sm:$0xff] %v878_v10 }
 0x13b PF: > { %s14_s19 = sadd.s32 1, %s1372_s19   ;;  %s1760_s15 = smov %s1364_s17 }
 0x13c   : > { %p11_p7 = scmp.ge.s32.totalorder %s14_s19, 6   ;;  %s1761_s16 = smov %s1368_s18 }
 0x13d   : > { %s1762_s17 = smov %s1765_s20  ;;  %s1763_s18 = smov %s1769_s21 }
 0x13e   :  { %13 = sbr.rel (!%p11_p7) target bundleno = 3 (0x3), region = 76 }

// kernel: _lambda_.5
= control target key start
LH: loop header
LB: loop body
LE: loop exit
PB: predicated region body
PF: predicated region fallthrough
CT: control target
= control target key end

     0   :  { %s5560_s15 = smov 0   ;;  %s5562_s16 = smov 0   ;;  %s7538_s0 = inlined_call_operand.vmem [shape: f32[2,2,290,2], index: 0, kind: input, shape index: {}]   ;;  %s7539_s1 = inlined_call_operand.vmem [shape: bf16[2,9,2,128], index: 1, kind: input, shape index: {}]   ;;  %s7540_s2 = inlined_call_operand.vmem [shape: f32[2,1,128], index: 2, kind: input, shape index: {}]   ;;  %s7541_s3 = inlined_call_operand.vmem [shape: f32[2,1,128], index: 3, kind: input, shape index: {}]   ;;  %s7542_s4 = inlined_call_operand.vmem [shape: f32[2,2,256,128], index: 4, kind: output, shape index: {}]  }
   0x1   :  { %s5564_s17 = smov 0   ;;  %s5566_s18 = smov 0  }
   0x2   :  { %s5568_s19 = smov 0  }
   0x3 LB: > { %s36_s20 = sadd.s32 1, %s5525_s17  ;;  %s40_s21 = sadd.s32 1, %s5529_s18  ;;  %s5533_s19 = sphi %s5568_s19, %s14_s19   ;;  %s5529_s18 = sphi %s5566_s18, %s7927_s18   ;;  %s5525_s17 = sphi %s5564_s17, %s7926_s17   ;;  %s5521_s16 = sphi %s5562_s16, %s7925_s16   ;;  %s5517_s15 = sphi %s5560_s15, %s7924_s15  }
   0x4   : > { %p38_p0 = scmp.ge.s32.totalorder %s36_s20, 2  ;;  %p4436_p1 = scmp.ge.s32.totalorder %s5533_s19, 1 }
   0x5   : > { %p240_p2 = scmp.lt.s32.totalorder %s5533_s19, 5 }
   0x6   : > { %s7929_s20 = smov (%p38_p0, %s36_s20), 0  ;;  %s7931_s21 = smov (!%p38_p0, %s40_s21), %s5529_s18 }
   0x7   : > { %p241_p3 = pnand %p4436_p1, %p240_p2  ;;  %p42_p4 = scmp.ge.s32.totalorder %s7931_s21, 2 }
   0x9   : > { %s7933_s21 = smov (%p42_p4, %s7931_s21), 0  ;;  %244 = sbr.rel (%p241_p3) target bundleno = 564 (0x234), region = 36 }
   0xe   : > { %p300_p5 = scmp.lt.s32.totalorder %s5521_s16, 1  ;;  %p302_p6 = scmp.lt.s32.totalorder %s5517_s15, 1  ;;  %v347_v0 = vlaneseq  ;;  %vm7556_vm0 = vcmask 1040384   ;;  %vm1090_vm1 = vcmask 15360  }
  0x10   : > { %s7935_s16 = smov (!%p300_p5, %s5521_s16), 1  ;;  %s7937_s15 = smov (!%p302_p6, %s5517_s15), 1  ;;  %v5608_v5 = vshrl.u32 %v347_v0, 7 }
  0x11   : > { %s5326_s22 = smul.u32 9, %s7935_s16  ;;  %s321_s9 = scalar_lea.vmem %s7540_s2, %s7935_s16 }
  0x12   : > { %s5324_s23 = smul.u32 37, %s7937_s15  ;;  %v351_v13 = vadd.s32 24, %v5608_v5  ;;  %v349_v38 = vadd.s32 8, %v5608_v5  ;;  %v384_v46 = vand.u32 15, %v5608_v5  ;;  %v350_v49 = vadd.s32 16, %v5608_v5  ;;  %s327_s12 = scalar_lea.vmem %s7541_s3, %s7935_s16 }
  0x13   : > { %s5599_s26 = scalar_lea.vmem %s7539_s1, %s5326_s22  ;;  %s5325_s27 = smul.u32 74, %s7935_s16  ;;  %v352_v60 = vadd.s32 32, %v5608_v5  ;;  %v353_v0 = vadd.s32 40, %v5608_v5 }
  0x14   : > { %v4473_v1 = vld [vmem:[%s5599_s26 + $0x1] sm:$0x1]  ;;  %v1037_v2 = vld [vmem:[%s5599_s26] sm:$0x1]  ;;  %v4538_v3 = vld [vmem:[%s5599_s26 + $0x2] sm:$0x1] }
  0x15   : > { %5315 = vmatprep.subr.msk.bf16.mxu1 %vm7556_vm0, %v4473_v1  ;;  %5314 = vmatprep.subr.msk.bf16.mxu0 %vm7556_vm0, %v4473_v1  ;;  %v1141_v4 = vsel %vm7556_vm0, %v4473_v1, 0  ;;  %s306_s28 = sadd.s32 %s5325_s27, %s5324_s23  ;;  %v1841_v18 = vsel %vm7556_vm0, %v4538_v3, 0  ;;  %v1353_v21 = vsel %vm7556_vm0, %v1037_v2, 0  ;;  %v5648_v27 = vld [vmem:[%s5599_s26 + $0x3] sm:$0x1]  ;;  %v405_v32 = vand.u32 15, %v351_v13 }
  0x16   : > { %5313 = vmatpush3.bf16.msra.mxu1 %v1141_v4  ;;  %5007 = vmatpush3.bf16.msra.mxu0 %v1141_v4  ;;  %s4437_s29 = sshll.u32 %s306_s28, 3  ;;  %v5651_v28 = vld [vmem:[%s5599_s26 + $0x4] sm:$0x1]  ;;  %v391_v44 = vand.u32 15, %v349_v38  ;;  %v5713_v59 = vadd.s32 4294967295, %v384_v46  ;;  %v398_v63 = vand.u32 15, %v350_v49 }
  0x17   : > { %s5613_s6 = scalar_lea.vmem %s7538_s0, %s4437_s29  ;;  %5316 = vmatprep.subr.msk.bf16.mxu1 %vm7556_vm0, %v1037_v2  ;;  %5317 = vmatprep.subr.msk.bf16.mxu0 %vm7556_vm0, %v4538_v3  ;;  %v5678_v42 = vadd.s32 1, %v405_v32  ;;  %v354_v2 = vadd.s32 48, %v5608_v5  ;;  %v355_v3 = vadd.s32 56, %v5608_v5  ;;  %s4438_s13 = sshll.u32 %s7937_s15, 5 }
  0x18   : > { %v4441_v6 = vld [vmem:[%s5613_s6 + $0x1] sm:$0xff]  ;;  %v4442_v7 = vld [vmem:[%s5613_s6 + $0x9] sm:$0xff]  ;;  %v4443_v11 = vld [vmem:[%s5613_s6 + $0x11] sm:$0xff]  ;;  %v5709_v57 = vadd.s32 1, %v391_v44  ;;  %vm7609_vm4 = vcmp.ge.s32.totalorder %v5713_v59, 0  ;;  %v5740_v13 = vadd.s32 4294967295, %v398_v63 }
  0x19   : > { %v4457_v8 = vld [vmem:[%s5613_s6 + $0x81] sm:$0xff]  ;;  %v1072_v9 = vpack.c.bf16 %v4442_v7, %v4441_v6  ;;  %v4458_v10 = vld [vmem:[%s5613_s6 + $0x89] sm:$0xff]  ;;  %v4444_v12 = vld [vmem:[%s5613_s6 + $0x19] sm:$0xff]  ;;  %vm1617_vm2 = vcmp.lt.s32.totalorder %v5678_v42, 16  ;;  %v356_v6 = vadd.s32 64, %v5608_v5  ;;  %v357_v7 = vadd.s32 72, %v5608_v5 }
  0x1a   : > { %v5624_v14 = vpack.c.bf16 %v4458_v10, %v4457_v8  ;;  %v5626_v15 = vpack.c.bf16 %v4444_v12, %v4443_v11  ;;  %v4459_v16 = vld [vmem:[%s5613_s6 + $0x91] sm:$0xff]  ;;  %v4460_v17 = vld [vmem:[%s5613_s6 + $0x99] sm:$0xff]  ;;  %v4445_v19 = vld [vmem:[%s5613_s6 + $0x21] sm:$0xff]  ;;  %7671 = vst [vmem:[#allocation12_spill] sm:$0xff] %v5709_v57  ;;  %vm7608_vm3 = vcmp.lt.s32.totalorder %v5709_v57, 16  ;;  %v358_v10 = vadd.s32 80, %v5608_v5 }
  0x1b   : > { %5008 = vmatprep.mubr.msk.bf16.mxu0 %vm1090_vm1, %v1072_v9  ;;  %v5633_v20 = vpack.c.bf16 %v4460_v17, %v4459_v16  ;;  %v4446_v22 = vld [vmem:[%s5613_s6 + $0x29] sm:$0xff]  ;;  %v4461_v23 = vld [vmem:[%s5613_s6 + $0xa1] sm:$0xff]  ;;  %v4447_v29 = vld [vmem:[%s5613_s6 + $0x31] sm:$0xff]  ;;  %v412_v9 = vand.u32 15, %v352_v60  ;;  %v419_v16 = vand.u32 15, %v353_v0  ;;  %v359_v17 = vadd.s32 88, %v5608_v5 }
  0x1c   : > { %7661 = vst [vmem:[#allocation2_spill] sm:$0xff] %v5624_v14  ;;  %7662 = vst [vmem:[#allocation3_spill] sm:$0xff] %v5626_v15  ;;  %v4462_v24 = vld [vmem:[%s5613_s6 + $0xa9] sm:$0xff]  ;;  %5024 = vmatprep.mubr.msk.bf16.mxu1 %vm1090_vm1, %v5624_v14  ;;  %5009 = vmatmul.mubr.msk.bf16.vlgmr.msra.gmra.mxu0 %vm1090_vm1, %v5626_v15  ;;  %v5643_v25 = vpack.c.bf16 %v4446_v22, %v4445_v19  ;;  %v4448_v30 = vld [vmem:[%s5613_s6 + $0x39] sm:$0xff]  ;;  %v447_v32 = vand.u32 15, %v357_v7  ;;  %vm831_vm5 = vcmp.ge.s32.totalorder %v5740_v13, 0 }
  0x1d   : > { %7663 = vst [vmem:[#allocation4_spill] sm:$0xff] %v5633_v20  ;;  %v5645_v26 = vpack.c.bf16 %v4462_v24, %v4461_v23  ;;  %5025 = vmatmul.mubr.msk.bf16.vlgmr.msra.gmra.mxu1 %vm1090_vm1, %v5633_v20  ;;  %5075 = vmatpush3.bf16.msra.mxu0 %v1841_v18  ;;  %v4463_v31 = vld [vmem:[%s5613_s6 + $0xb1] sm:$0xff]  ;;  %v4464_v33 = vld [vmem:[%s5613_s6 + $0xb9] sm:$0xff]  ;;  %v4449_v34 = vld [vmem:[%s5613_s6 + $0x41] sm:$0xff]  ;;  %v5670_v39 = vpack.c.bf16 %v4448_v30, %v4447_v29  ;;  %v426_v23 = vand.u32 15, %v354_v2  ;;  %v433_v24 = vand.u32 15, %v355_v3 }
  0x1e   : > { %7664 = vst [vmem:[#allocation5_spill] sm:$0xff] %v5643_v25  ;;  %5041 = vmatpush3.bf16.msra.mxu1 %v1353_v21  ;;  %5012 = vmatprep.mubr.msk.bf16.mxu0 %vm1090_vm1, %v5643_v25  ;;  %v4450_v35 = vld [vmem:[%s5613_s6 + $0x49] sm:$0xff]  ;;  %v4465_v36 = vld [vmem:[%s5613_s6 + $0xc1] sm:$0xff]  ;;  %v5674_v40 = vpack.c.bf16 %v4464_v33, %v4463_v31  ;;  %v4451_v45 = vld [vmem:[%s5613_s6 + $0x51] sm:$0xff]  ;;  %v440_v31 = vand.u32 15, %v356_v6  ;;  %v360_v33 = vadd.s32 96, %v5608_v5 }
  0x1f   : > { %7665 = vst [vmem:[#allocation6_spill] sm:$0xff] %v5645_v26  ;;  %5028 = vmatprep.mubr.msk.bf16.mxu1 %vm1090_vm1, %v5645_v26  ;;  %v4466_v37 = vld [vmem:[%s5613_s6 + $0xc9] sm:$0xff]  ;;  %5318 = vmatprep.subr.msk.bf16.mxu1 %vm7556_vm0, %v5648_v27  ;;  %7666 = vst [vmem:[#allocation7_spill] sm:$0xff] %v5670_v39  ;;  %v5676_v41 = vpack.c.bf16 %v4450_v35, %v4449_v34  ;;  %v4452_v47 = vld [vmem:[%s5613_s6 + $0x59] sm:$0xff]  ;;  %v5756_v35 = vadd.s32 4294967295, %v412_v9  ;;  %v5760_v44 = vadd.s32 1, %v419_v16 }
  0x20   : > { %5319 = vmatprep.subr.msk.bf16.mxu0 %vm7556_vm0, %v5651_v28  ;;  %7667 = vst [vmem:[#allocation8_spill] sm:$0xff] %v5674_v40  ;;  %v5680_v43 = vpack.c.bf16 %v4466_v37, %v4465_v36  ;;  %v4467_v48 = vld [vmem:[%s5613_s6 + $0xd1] sm:$0xff]  ;;  %v5695_v50 = vld [vmem:[%s5613_s6 + $0x3a] sm:$0xff]  ;;  %v4454_v53 = vld [vmem:[%s5613_s6 + $0x69] sm:$0xff]  ;;  %v5711_v58 = vpack.c.bf16 %v4452_v47, %v4451_v45  ;;  %v454_v36 = vand.u32 15, %v358_v10  ;;  %v461_v45 = vand.u32 15, %v359_v17 }
  0x21   : > { %7668 = vst [vmem:[#allocation9_spill] sm:$0xff] %v5676_v41  ;;  %v4468_v51 = vld [vmem:[%s5613_s6 + $0xd9] sm:$0xff]  ;;  %v4453_v52 = vld [vmem:[%s5613_s6 + $0x61] sm:$0xff]  ;;  %v5705_v54 = vsel %vm1617_vm2, %v5695_v50, 0.0  ;;  %v4470_v56 = vld [vmem:[%s5613_s6 + $0xe9] sm:$0xff]  ;;  %v5767_v49 = vadd.s32 1, %v433_v24 }
  0x22   : > { %7669 = vst [vmem:[#allocation10_spill] sm:$0xff] %v5680_v43  ;;  %7670 = vst [vmem:[#allocation11_spill] sm:$0xff] %v5705_v54  ;;  %v4469_v55 = vld [vmem:[%s5613_s6 + $0xe1] sm:$0xff]  ;;  %v5716_v61 = vpack.c.bf16 %v4468_v51, %v4467_v48  ;;  %v5718_v62 = vpack.c.bf16 %v4454_v53, %v4453_v52  ;;  %v4507_v4 = vld [vmem:[%s5613_s6 + $0xa] sm:$0xff]  ;;  %v5765_v48 = vadd.s32 4294967295, %v426_v23  ;;  %v5773_v52 = vadd.s32 4294967295, %v440_v31 }
  0x23   : > { %7672 = vst [vmem:[#allocation13_spill] sm:$0xff] %v5711_v58  ;;  %v5721_v1 = vpack.c.bf16 %v4470_v56, %v4469_v55  ;;  %v765_v8 = vld [vmem:[%s5613_s6] sm:$0xff]  ;;  %v4455_v11 = vld [vmem:[%s5613_s6 + $0x71] sm:$0xff]  ;;  %v1743_v22 = vsel %vm7608_vm3, %v4507_v4, 0.0  ;;  %v766_v29 = vld [vmem:[%s5613_s6 + $0x8] sm:$0xff]  ;;  %v5775_v53 = vadd.s32 1, %v447_v32 }
  0x24   : > { %5013 = vmatmul.mubr.msk.bf16.gmra.mxu0 %vm1090_vm1, %v5670_v39  ;;  %7673 = vst [vmem:[#allocation14_spill] sm:$0xff] %v5716_v61  ;;  %7674 = vst [vmem:[#allocation15_spill] sm:$0xff] %v5718_v62  ;;  %v4456_v12 = vld [vmem:[%s5613_s6 + $0x79] sm:$0xff]  ;;  %v4471_v18 = vld [vmem:[%s5613_s6 + $0xf1] sm:$0xff]  ;;  %v989_v30 = vsel %vm7609_vm4, %v765_v8, 0.0  ;;  %v468_v55 = vand.u32 15, %v360_v33 }
  0x25   : > { %5029 = vmatmul.mubr.msk.bf16.gmra.mxu1 %vm1090_vm1, %v5674_v40  ;;  %5016 = vmatprep.mubr.msk.bf16.mxu0 %vm1090_vm1, %v5676_v41  ;;  %7675 = vst [vmem:[#allocation16_spill] sm:$0xff] %v5721_v1  ;;  %v4472_v19 = vld [vmem:[%s5613_s6 + $0xf9] sm:$0xff]  ;;  %v4506_v21 = vld [vmem:[%s5613_s6 + $0x2] sm:$0xff]  ;;  %v5754_v34 = vpack.c.bf16 %v4456_v12, %v4455_v11  ;;  %7678 = vst [vmem:[#allocation19_spill] sm:$0xff] %v5760_v44  ;;  %v1021_v46 = vpack.c.bf16 %v766_v29, %v989_v30  ;;  %v2169_v56 = vsel %vm7556_vm0, %v5648_v27, 0  ;;  %s4439_s14 = sshll.u32 %s7935_s16, 6 }
  0x26   : > { %5032 = vmatprep.mubr.msk.bf16.mxu1 %vm1090_vm1, %v5680_v43  ;;  %v5758_v37 = vpack.c.bf16 %v4472_v19, %v4471_v18  ;;  %v1774_v38 = vpack.c.bf16 %v1743_v22, %v4506_v21  ;;  %v5763_v47 = vld [vmem:[%s5613_s6 + $0x1a] sm:$0xff]  ;;  %7679 = vst [vmem:[#allocation20_spill] sm:$0xff] %v5767_v49  ;;  %v5770_v51 = vld [vmem:[%s5613_s6 + $0x10] sm:$0xff]  ;;  %7681 = vst [vmem:[#allocation22_spill] sm:$0xff] %v5775_v53  ;;  %vm833_vm6 = vcmp.ge.s32.totalorder %v5756_v35, 0  ;;  %v5785_v63 = vadd.s32 4294967295, %v454_v36  ;;  %s7337_s15 = sadd.s32 %s4439_s14, %s4438_s13 }
  0x27   : > { %7676 = vst [vmem:[#allocation17_spill] sm:$0xff] %v5754_v34  ;;  %7680 = vst [vmem:[#allocation21_spill] sm:$0xff] %v5770_v51  ;;  %v5782_v60 = vld [vmem:[%s5613_s6 + $0x20] sm:$0xff]  ;;  %v5791_v0 = vld [vmem:[%s5613_s6 + $0x12] sm:$0xff]  ;;  %v1745_v2 = vsel %vm1617_vm2, %v5763_v47, 0.0  ;;  %vm7611_vm7 = vcmp.lt.s32.totalorder %v5760_v44, 16 }
  0x28   : > { %7677 = vst [vmem:[#allocation18_spill] sm:$0xff] %v5758_v37  ;;  %7682 = vst [vmem:[#allocation23_spill] sm:$0xff] %v5785_v63  ;;  %v5797_v3 = vld [vmem:[%s5613_s6 + $0x2a] sm:$0xff]  ;;  %v5800_v27 = vadd.s32 1, %v461_v45  ;;  %v361_v4 = vadd.s32 104, %v5608_v5  ;;  %v5805_v6 = vld [vmem:[%s5613_s6 + $0x18] sm:$0xff]  ;;  %v1775_v12 = vpack.c.bf16 %v1745_v2, %v5791_v0 }
  0x29   : > { %7683 = vst [vmem:[#allocation24_spill] sm:$0xff] %v5791_v0  ;;  %7685 = vst [vmem:[#allocation26_spill] sm:$0xff] %v5805_v6  ;;  %v991_v7 = vsel %vm831_vm5, %v5770_v51, 0.0  ;;  %v2465_v8 = vsel %vm7556_vm0, %v5651_v28, 0  ;;  %vm7612_vm8 = vcmp.ge.s32.totalorder %v5765_v48, 0  ;;  %vm7610_vm9 = vcmp.lt.s32.totalorder %v5767_v49, 16 }
  0x2a   : > { %7684 = vst [vmem:[#allocation25_spill] sm:$0xff] %v5800_v27  ;;  %v5815_v9 = vld [vmem:[%s5613_s6 + $0x28] sm:$0xff]  ;;  %v993_v10 = vsel %vm833_vm6, %v5782_v60, 0.0  ;;  %vm7562_vm10 = vcmp.ge.s32.totalorder %v5773_v52, 0  ;;  %vm7570_vm11 = vcmp.lt.s32.totalorder %v5775_v53, 16  ;;  %v5822_v11 = vadd.s32 4294967295, %v468_v55 }
  0x2b   : > { %v5826_v28 = vld [vmem:[%s5613_s6 + $0x22] sm:$0xff]  ;;  %v1747_v16 = vsel %vm7611_vm7, %v5797_v3, 0.0  ;;  %v5832_v17 = vld [vmem:[%s5613_s6 + $0x30] sm:$0xff]  ;;  %vm7559_vm12 = vcmp.ge.s32.totalorder %v5785_v63, 0  ;;  %v362_v18 = vadd.s32 112, %v5608_v5  ;;  %v1022_v19 = vpack.c.bf16 %v5805_v6, %v991_v7  ;;  %v5844_v29 = vld [vmem:[%s5613_s6 + $0x38] sm:$0xff] }
  0x2c   : > { %5017 = vmatmul.mubr.msk.bf16.gmra.mxu0 %vm1090_vm1, %v5711_v58  ;;  %7686 = vst [vmem:[#allocation27_spill] sm:$0xff] %v5822_v11  ;;  %7687 = vst [vmem:[#allocation28_spill] sm:$0xff] %v5826_v28  ;;  %v5838_v21 = vld [vmem:[%s5613_s6 + $0x4a] sm:$0xff]  ;;  %vm7561_vm13 = vcmp.lt.s32.totalorder %v5800_v27, 16  ;;  %v475_v22 = vand.u32 15, %v361_v4  ;;  %v363_v23 = vadd.s32 120, %v5608_v5  ;;  %v1023_v24 = vpack.c.bf16 %v5815_v9, %v993_v10 }
  0x2d   : > { %5033 = vmatmul.mubr.msk.bf16.gmra.mxu1 %vm1090_vm1, %v5716_v61  ;;  %5020 = vmatprep.mubr.msk.bf16.mxu0 %vm1090_vm1, %v5718_v62  ;;  %v1749_v30 = vsel %vm7610_vm9, %v5695_v50, 0.0  ;;  %v364_v31 = vadd.s32 128, %v5608_v5  ;;  %v365_v32 = vadd.s32 136, %v5608_v5  ;;  %v1776_v33 = vpack.c.bf16 %v1747_v16, %v5826_v28  ;;  %v5859_v45 = vld [vmem:[%s5613_s6 + $0x40] sm:$0xff]  ;;  %v5871_v7 = vld [vmem:[%s5613_s6 + $0x50] sm:$0xff]  ;;  %v5994_v15 = vld [vmem:[%s5613_s6 + $0x78] sm:$0xff] }
  0x2e   : > { %5036 = vmatprep.mubr.msk.bf16.mxu1 %vm1090_vm1, %v5721_v1  ;;  %v995_v36 = vsel %vm7612_vm8, %v5832_v17, 0.0  ;;  %v366_v55 = vadd.s32 144, %v5608_v5  ;;  %v367_v2 = vadd.s32 152, %v5608_v5  ;;  %v1751_v4 = vsel %vm7570_vm11, %v5838_v21, 0.0  ;;  %v5875_v54 = vld [vmem:[%s5599_s26 + $0x5] sm:$0x1] }
  0x2f   : > { %v482_v10 = vand.u32 15, %v362_v18  ;;  %v368_v16 = vadd.s32 160, %v5608_v5  ;;  %7690 = vst [vmem:[#allocation31_spill] sm:$0xff] %v5875_v54  ;;  %v5881_v1 = vadd.s32 1, %v475_v22  ;;  %v369_v61 = vadd.s32 168, %v5608_v5  ;;  %v5984_v25 = vld [vmem:[%s5613_s6 + $0x90] sm:$0xff] }
  0x30   : > { %v5885_v43 = vld [vmem:[%s5599_s26 + $0x6] sm:$0x1]  ;;  %vm7557_vm14 = vcmp.ge.s32.totalorder %v5822_v11, 0  ;;  %v1024_v22 = vpack.c.bf16 %v5844_v29, %v995_v36  ;;  %v510_v40 = vand.u32 15, %v366_v55  ;;  %7708 = vst [vmem:[#allocation49_spill] sm:$0xff] %v5984_v25  ;;  %v6002_v6 = vld [vmem:[%s5613_s6 + $0x72] sm:$0xff] }
  0x31   : > { %7691 = vst [vmem:[#allocation32_spill] sm:$0xff] %v5881_v1  ;;  %7692 = vst [vmem:[#allocation33_spill] sm:$0xff] %v5885_v43  ;;  %v524_v55 = vand.u32 15, %v368_v16  ;;  %vm7558_vm15 = vcmp.lt.s32.totalorder %v5881_v1, 16  ;;  %v5926_v26 = vadd.s32 4294967295, %v482_v10  ;;  %v531_v14 = vand.u32 15, %v369_v61 }
  0x32   : > { %v5937_v41 = vadd.s32 4294967295, %v510_v40  ;;  %v5945_v10 = vld [vmem:[%s5613_s6 + $0x68] sm:$0xff]  ;;  %7709 = vst [vmem:[#allocation50_spill] sm:$0xff] %v6002_v6  ;;  %v6008_v11 = vld [vmem:[%s5613_s6 + $0xa0] sm:$0xff]  ;;  %v6135_v42 = vsel %vm7611_vm7, %v5695_v50, 0.0  ;;  %vm7726_vm7 = vcmp.lt.s32.totalorder %v5800_v27, 16 }
  0x33   : > { %7694 = vst [vmem:[#allocation35_spill] sm:$0xff] %v5926_v26  ;;  %7700 = vst [vmem:[#allocation41_spill] sm:$0xff] %v5945_v10  ;;  %v6333_v28 = vld [vmem:[%s5613_s6 + $0xe0] sm:$0xff]  ;;  %v6468_v13 = vld [vmem:[%s5599_s26 + $0x8] sm:$0x1]  ;;  %s4440_s16 = sshll.u32 %s7337_s15, 3 }
  0x34   : > { %5021 = vmatmul.mubr.msk.bf16.gmra.mxu0 %vm1090_vm1, %v5754_v34  ;;  %7698 = vst [vmem:[#allocation39_spill] sm:$0xff] %v5937_v41  ;;  %7718 = vst [vmem:[#allocation59_spill] sm:$0xff] %v6135_v42  ;;  %s7357_s24 = scalar_lea.vmem %s7542_s4, %s4440_s16 }
  0x35   : > { %5037 = vmatmul.mubr.msk.bf16.gmra.mxu1 %vm1090_vm1, %v5758_v37  ;;  %5076 = vmatprep.mubr.msk.bf16.mxu0 %vm1090_vm1, %v1774_v38  ;;  %v5856_v38 = vld [vmem:[%s5613_s6 + $0x32] sm:$0xff]  ;;  %v5879_v37 = vld [vmem:[%s5613_s6 + $0x5a] sm:$0xff] }
  0x36   : > { %5042 = vmatprep.mubr.msk.bf16.mxu1 %vm1090_vm1, %v1021_v46  ;;  %7688 = vst [vmem:[#allocation29_spill] sm:$0xff] %v5856_v38  ;;  %v5862_v46 = vld [vmem:[%s5613_s6 + $0x42] sm:$0xff]  ;;  %v1777_v18 = vpack.c.bf16 %v1749_v30, %v5856_v38  ;;  %v5915_v36 = vsel %vm7561_vm13, %v5879_v37, 0.0  ;;  %vm847_vm13 = vcmp.ge.s32.totalorder %v5937_v41, 0  ;;  %v6054_v41 = vadd.s32 208, %v5608_v5 }
  0x37   : > { %7689 = vst [vmem:[#allocation30_spill] sm:$0xff] %v5862_v46  ;;  %v1778_v30 = vpack.c.bf16 %v1751_v4, %v5862_v46  ;;  %v5923_v4 = vld [vmem:[%s5613_s6 + $0x6a] sm:$0xff]  ;;  %v7746_v44 = vld [vmem:[#allocation49_spill] sm:$0xff] }
  0x38   : > { %v1755_v40 = vsel %vm7558_vm15, %v5923_v4, 0.0  ;;  %v7736_v46 = vld [vmem:[#allocation32_spill] sm:$0xff] }
  0x3c   : > { %5077 = vmatmul.mubr.msk.bf16.vlgmr.msra.gmra.mxu0 %vm1090_vm1, %v1775_v12  ;;  %v489_v12 = vand.u32 15, %v363_v23  ;;  %v5893_v23 = vld [vmem:[%s5613_s6 + $0x48] sm:$0xff] }
  0x3d   : > { %5043 = vmatmul.mubr.msk.bf16.vlgmr.msra.gmra.mxu1 %vm1090_vm1, %v1022_v19  ;;  %5143 = vmatpush3.bf16.msra.mxu0 %v2465_v8  ;;  %v496_v19 = vand.u32 15, %v364_v31  ;;  %v503_v8 = vand.u32 15, %v365_v32  ;;  %v5902_v31 = vld [vmem:[%s5613_s6 + $0x58] sm:$0xff]  ;;  %v5907_v32 = vsel %vm7559_vm12, %v5871_v7, 0.0 }
  0x3e   : > { %5109 = vmatpush3.bf16.msra.mxu1 %v2169_v56  ;;  %5046 = vmatprep.mubr.msk.bf16.mxu1 %vm1090_vm1, %v1023_v24  ;;  %v997_v56 = vsel %vm7562_vm10, %v5859_v45, 0.0  ;;  %v517_v24 = vand.u32 15, %v367_v2  ;;  %v5920_v2 = vld [vmem:[%s5613_s6 + $0x60] sm:$0xff]  ;;  %v5928_v20 = vadd.s32 1, %v489_v12  ;;  %v1026_v58 = vpack.c.bf16 %v5902_v31, %v5907_v32 }
  0x3f   : > { %5080 = vmatprep.mubr.msk.bf16.mxu0 %vm1090_vm1, %v1776_v33  ;;  %5320 = vmatprep.subr.msk.bf16.mxu1 %vm7556_vm0, %v5875_v54  ;;  %v5910_v33 = vld [vmem:[%s5613_s6 + $0x52] sm:$0xff]  ;;  %v1025_v34 = vpack.c.bf16 %v5893_v23, %v997_v56  ;;  %v5931_v16 = vadd.s32 4294967295, %v496_v19  ;;  %v5933_v62 = vadd.s32 1, %v503_v8  ;;  %v1001_v12 = vsel %vm7557_vm14, %v5920_v2, 0.0  ;;  %v5951_v19 = vld [vmem:[%s5613_s6 + $0x62] sm:$0xff]  ;;  %v5965_v56 = vld [vmem:[%s5613_s6 + $0x7a] sm:$0xff] }
  0x40   : > { %7693 = vst [vmem:[#allocation34_spill] sm:$0xff] %v5910_v33  ;;  %5321 = vmatprep.subr.msk.bf16.mxu0 %vm7556_vm0, %v5885_v43  ;;  %7695 = vst [vmem:[#allocation36_spill] sm:$0xff] %v5928_v20  ;;  %v5939_v39 = vadd.s32 1, %v517_v24  ;;  %v1779_v61 = vpack.c.bf16 %v5915_v36, %v5910_v33  ;;  %v5956_v8 = vadd.s32 4294967295, %v524_v55  ;;  %vm7577_vm0 = vcmp.ge.s32.totalorder %v5926_v26, 0  ;;  %v6043_v33 = vld [vmem:[%s5613_s6 + $0x92] sm:$0xff] }
  0x41   : > { %7696 = vst [vmem:[#allocation37_spill] sm:$0xff] %v5931_v16  ;;  %7697 = vst [vmem:[#allocation38_spill] sm:$0xff] %v5933_v62  ;;  %vm1629_vm14 = vcmp.lt.s32.totalorder %v5928_v20, 16  ;;  %v5968_v24 = vadd.s32 1, %v531_v14  ;;  %v370_v32 = vadd.s32 176, %v5608_v5  ;;  %vm845_vm15 = vcmp.ge.s32.totalorder %v5931_v16, 0 }
  0x42   : > { %7699 = vst [vmem:[#allocation40_spill] sm:$0xff] %v5939_v39  ;;  %7701 = vst [vmem:[#allocation42_spill] sm:$0xff] %v5951_v19  ;;  %vm1631_vm12 = vcmp.lt.s32.totalorder %v5933_v62, 16  ;;  %v371_v36 = vadd.s32 184, %v5608_v5  ;;  %v372_v14 = vadd.s32 192, %v5608_v5  ;;  %v1027_v55 = vpack.c.bf16 %v5945_v10, %v1001_v12  ;;  %v6030_v10 = vld [vmem:[%s5613_s6 + $0x98] sm:$0xff] }
  0x43   : > { %7702 = vst [vmem:[#allocation43_spill] sm:$0xff] %v5956_v8  ;;  %7704 = vst [vmem:[#allocation45_spill] sm:$0xff] %v5965_v56  ;;  %vm7640_vm10 = vcmp.lt.s32.totalorder %v5939_v39, 16  ;;  %v373_v54 = vadd.s32 200, %v5608_v5  ;;  %v1780_v43 = vpack.c.bf16 %v1755_v40, %v5951_v19  ;;  %v1757_v51 = vsel %vm1629_vm14, %v5965_v56, 0.0  ;;  %v6012_v40 = vld [vmem:[%s5613_s6 + $0x88] sm:$0xff] }
  0x44   : > { %5081 = vmatmul.mubr.msk.bf16.gmra.mxu0 %vm1090_vm1, %v1777_v18  ;;  %v5961_v18 = vld [vmem:[%s5613_s6 + $0x70] sm:$0xff]  ;;  %7705 = vst [vmem:[#allocation46_spill] sm:$0xff] %v5968_v24  ;;  %vm7607_vm11 = vcmp.ge.s32.totalorder %v5956_v8, 0  ;;  %v538_v20 = vand.u32 15, %v370_v32  ;;  %v6027_v56 = vld [vmem:[%s5613_s6 + $0x82] sm:$0xff]  ;;  %v6035_v16 = vsel %vm847_vm13, %v5984_v25, 0.0 }
  0x45   : > { %5047 = vmatmul.mubr.msk.bf16.gmra.mxu1 %vm1090_vm1, %v1024_v22  ;;  %5084 = vmatprep.mubr.msk.bf16.mxu0 %vm1090_vm1, %v1778_v30  ;;  %7703 = vst [vmem:[#allocation44_spill] sm:$0xff] %v5961_v18  ;;  %v5973_v22 = vld [vmem:[%s5613_s6 + $0x80] sm:$0xff]  ;;  %v5977_v30 = vld [vmem:[%s5613_s6 + $0x8a] sm:$0xff]  ;;  %v5999_v12 = vsel %vm7577_vm0, %v5961_v18, 0.0  ;;  %vm1635_vm0 = vcmp.lt.s32.totalorder %v5968_v24, 16  ;;  %7711 = vst [vmem:[#allocation52_spill] sm:$0xff] %v6027_v56 }
  0x46   : > { %5050 = vmatprep.mubr.msk.bf16.mxu1 %vm1090_vm1, %v1025_v34  ;;  %7706 = vst [vmem:[#allocation47_spill] sm:$0xff] %v5973_v22  ;;  %7707 = vst [vmem:[#allocation48_spill] sm:$0xff] %v5977_v30  ;;  %v5988_v34 = vld [vmem:[%s5613_s6 + $0x9a] sm:$0xff]  ;;  %v6017_v26 = vsel %vm845_vm15, %v5973_v22, 0.0  ;;  %v1759_v1 = vsel %vm1631_vm12, %v5977_v30, 0.0  ;;  %v6023_v19 = vld [vmem:[%s5613_s6 + $0xaa] sm:$0xff] }
  0x47   : > { %7710 = vst [vmem:[#allocation51_spill] sm:$0xff] %v6023_v19  ;;  %v6040_v62 = vsel %vm7640_vm10, %v5988_v34, 0.0  ;;  %v545_v30 = vand.u32 15, %v371_v36  ;;  %v552_v22 = vand.u32 15, %v372_v14  ;;  %7712 = vst [vmem:[#allocation53_spill] sm:$0xff] %v6043_v33  ;;  %v6046_v32 = vld [vmem:[%s5613_s6 + $0xa8] sm:$0xff]  ;;  %v1028_v36 = vpack.c.bf16 %v5994_v15, %v5999_v12 }
  0x48   : > { %v6051_v63 = vsel %vm7607_vm11, %v6008_v11, 0.0  ;;  %v559_v18 = vand.u32 15, %v373_v54  ;;  %v6057_v25 = vadd.s32 216, %v5608_v5  ;;  %v1781_v14 = vpack.c.bf16 %v1757_v51, %v6002_v6  ;;  %v6064_v39 = vld [vmem:[%s5613_s6 + $0xa2] sm:$0xff] }
  0x49   : > { %7713 = vst [vmem:[#allocation54_spill] sm:$0xff] %v6064_v39  ;;  %v6069_v8 = vsel %vm1635_vm0, %v6023_v19, 0.0  ;;  %v1029_v54 = vpack.c.bf16 %v6012_v40, %v6017_v26  ;;  %v6078_v51 = vadd.s32 4294967295, %v538_v20  ;;  %v6085_v19 = vadd.s32 1, %v545_v30 }
  0x4a   : > { %v573_v12 = vand.u32 15, %v6057_v25  ;;  %v6099_v24 = vadd.s32 232, %v5608_v5  ;;  %v6145_v26 = vsel %vm7610_vm9, %v5838_v21, 0.0  ;;  %v6150_v25 = vsel %vm7612_vm8, %v5871_v7, 0.0  ;;  %v7735_v57 = vld [vmem:[#allocation45_spill] sm:$0xff] }
  0x4b   : > { %7714 = vst [vmem:[#allocation55_spill] sm:$0xff] %v6085_v19  ;;  %vm851_vm11 = vcmp.ge.s32.totalorder %v6078_v51, 0  ;;  %7720 = vst [vmem:[#allocation61_spill] sm:$0xff] %v6145_v26  ;;  %vm7724_vm9 = vcmp.ge.s32.totalorder %v5773_v52, 0  ;;  %v6176_v20 = vsel %vm7726_vm7, %v5923_v4, 0.0  ;;  %vm7737_vm7 = vcmp.lt.s32.totalorder %v7736_v46, 16 }
  0x4c   : > { %5085 = vmatmul.mubr.msk.bf16.gmra.mxu0 %vm1090_vm1, %v1779_v61  ;;  %v1782_v61 = vpack.c.bf16 %v1759_v1, %v6027_v56  ;;  %v6091_v1 = vadd.s32 1, %v559_v18  ;;  %v6109_v18 = vsel %vm7609_vm4, %v5782_v60, 0.0  ;;  %7721 = vst [vmem:[#allocation62_spill] sm:$0xff] %v6150_v25  ;;  %v6171_v50 = vsel %vm7724_vm9, %v5920_v2, 0.0  ;;  %7727 = vst [vmem:[#allocation65_spill] sm:$0xff] %v6176_v20  ;;  %v7728_v21 = vld [vmem:[#allocation44_spill] sm:$0xff] }
  0x4d   : > { %5051 = vmatmul.mubr.msk.bf16.gmra.mxu1 %vm1090_vm1, %v1026_v58  ;;  %5088 = vmatprep.mubr.msk.bf16.mxu0 %vm1090_vm1, %v1780_v43  ;;  %v6087_v43 = vadd.s32 4294967295, %v552_v22  ;;  %v6104_v22 = vsel %vm7608_vm3, %v5763_v47, 0.0  ;;  %v6119_v58 = vsel %vm1617_vm2, %v5797_v3, 0.0  ;;  %v6124_v47 = vsel %vm831_vm5, %v5832_v17, 0.0  ;;  %7725 = vst [vmem:[#allocation64_spill] sm:$0xff] %v6171_v50  ;;  %v7740_v25 = vld [vmem:[#allocation27_spill] sm:$0xff] }
  0x4e   : > { %5054 = vmatprep.mubr.msk.bf16.mxu1 %vm1090_vm1, %v1027_v55  ;;  %7715 = vst [vmem:[#allocation56_spill] sm:$0xff] %v6091_v1  ;;  %v6096_v55 = vadd.s32 224, %v5608_v5  ;;  %7716 = vst [vmem:[#allocation57_spill] sm:$0xff] %v6119_v58  ;;  %vm7652_vm3 = vcmp.lt.s32.totalorder %v6085_v19, 16  ;;  %v6140_v3 = vsel %vm833_vm6, %v5859_v45, 0.0  ;;  %vm7722_vm2 = vcmp.lt.s32.totalorder %v5775_v53, 16 }
  0x4f   : > { %7717 = vst [vmem:[#allocation58_spill] sm:$0xff] %v6124_v47  ;;  %vm853_vm4 = vcmp.ge.s32.totalorder %v6087_v43, 0  ;;  %7719 = vst [vmem:[#allocation60_spill] sm:$0xff] %v6140_v3  ;;  %v7733_v53 = vld [vmem:[#allocation41_spill] sm:$0xff]  ;;  %v6195_v26 = vsel %vm7737_vm7, %v7735_v57, 0.0  ;;  %v7743_v49 = vld [vmem:[#allocation48_spill] sm:$0xff] }
  0x50   : > { %v6205_v27 = vsel %vm1629_vm14, %v7743_v49, 0.0  ;;  %v7747_v20 = vld [vmem:[#allocation35_spill] sm:$0xff]  ;;  %v4529_v49 = vld [vmem:[%s5613_s6 + $0xba] sm:$0xff]  ;;  %v580_v50 = vand.u32 15, %v6096_v55  ;;  %v6229_v57 = vsel %vm1631_vm12, %v5988_v34, 0.0  ;;  %v587_v38 = vand.u32 15, %v6099_v24 }
  0x51   : > { %7745 = vst [vmem:[#allocation45_spill] sm:$0xff] %v6205_v27  ;;  %vm7748_vm9 = vcmp.ge.s32.totalorder %v7747_v20, 0  ;;  %7751 = vst [vmem:[#allocation27_spill] sm:$0xff] %v6229_v57  ;;  %v6237_v56 = vld [vmem:[%s5613_s6 + $0xb8] sm:$0xff]  ;;  %v4531_v27 = vld [vmem:[%s5613_s6 + $0xca] sm:$0xff]  ;;  %v7759_v55 = vpack.c.bf16 %v6040_v62, %v6043_v33  ;;  %v1765_v24 = vsel %vm7652_vm3, %v4529_v49, 0.0  ;;  %v7763_v62 = vpack.c.bf16 %v6030_v10, %v6035_v16 }
  0x52   : > { %v6210_v4 = vsel %vm7748_vm9, %v7746_v44, 0.0  ;;  %v7754_v3 = vld [vmem:[#allocation51_spill] sm:$0xff]  ;;  %v6270_v34 = vld [vmem:[%s5613_s6 + $0xb2] sm:$0xff]  ;;  %v7761_v57 = vand.u32 15, %v6054_v41  ;;  %v6299_v16 = vadd.s32 4294967295, %v580_v50  ;;  %v378_v33 = vadd.s32 240, %v5608_v5 }
  0x53   : > { %v6250_v6 = vsel %vm7640_vm10, %v7754_v3, 0.0  ;;  %7760 = vst [vmem:[#allocation37_spill] sm:$0xff] %v6270_v34  ;;  %v4535_v47 = vld [vmem:[%s5613_s6 + $0xea] sm:$0xff]  ;;  %v6361_v19 = vld [vmem:[%s5613_s6 + $0xd2] sm:$0xff] }
  0x54   : > { %5089 = vmatmul.mubr.msk.bf16.gmra.mxu0 %vm1090_vm1, %v1781_v14  ;;  %v6166_v14 = vsel %vm7722_vm2, %v5879_v37, 0.0  ;;  %v6221_v37 = vld [vmem:[%s5613_s6 + $0xb0] sm:$0xff]  ;;  %vm7653_vm2 = vcmp.lt.s32.totalorder %v6091_v1, 16  ;;  %7756 = vst [vmem:[#allocation49_spill] sm:$0xff] %v6250_v6  ;;  %v6276_v42 = vadd.s32 4294967295, %v7761_v57  ;;  %v6278_v6 = vadd.s32 1, %v573_v12 }
  0x55   : > { %5055 = vmatmul.mubr.msk.bf16.gmra.mxu1 %vm1090_vm1, %v1028_v36  ;;  %5092 = vmatprep.mubr.msk.bf16.mxu0 %vm1090_vm1, %v1782_v61  ;;  %7723 = vst [vmem:[#allocation63_spill] sm:$0xff] %v6166_v14  ;;  %v7729_v36 = vld [vmem:[#allocation23_spill] sm:$0xff]  ;;  %v6240_v14 = vld [vmem:[%s5613_s6 + $0xc0] sm:$0xff]  ;;  %v1011_v3 = vsel %vm851_vm11, %v6221_v37, 0.0  ;;  %v1767_v12 = vsel %vm7653_vm2, %v4531_v27, 0.0  ;;  %vm857_vm9 = vcmp.ge.s32.totalorder %v6299_v16, 0 }
  0x56   : > { %vm7730_vm8 = vcmp.ge.s32.totalorder %v7729_v36, 0  ;;  %5058 = vmatprep.mubr.msk.bf16.mxu1 %vm1090_vm1, %v1029_v54  ;;  %7738 = vst [vmem:[#allocation23_spill] sm:$0xff] %v6195_v26  ;;  %v7739_v54 = vld [vmem:[#allocation47_spill] sm:$0xff]  ;;  %7762 = vst [vmem:[#allocation51_spill] sm:$0xff] %v6278_v6  ;;  %v1013_v41 = vsel %vm853_vm4, %v6240_v14, 0.0  ;;  %vm855_vm7 = vcmp.ge.s32.totalorder %v6276_v42, 0 }
  0x57   : > { %v6181_v61 = vsel %vm7730_vm8, %v7728_v21, 0.0  ;;  %vm7741_vm8 = vcmp.ge.s32.totalorder %v7740_v25, 0  ;;  %7749 = vst [vmem:[#allocation47_spill] sm:$0xff] %v6210_v4  ;;  %v6289_v4 = vld [vmem:[%s5613_s6 + $0xc8] sm:$0xff]  ;;  %v594_v0 = vand.u32 15, %v378_v33  ;;  %v2096_v51 = vsel %vm855_vm7, %v6333_v28, 0.0 }
  0x58   : > { %7731 = vst [vmem:[#allocation44_spill] sm:$0xff] %v6181_v61  ;;  %v6200_v30 = vsel %vm7741_vm8, %v7739_v54, 0.0  ;;  %v6234_v61 = vsel %vm845_vm15, %v6008_v11, 0.0  ;;  %v6295_v57 = vld [vmem:[%s5613_s6 + $0xc2] sm:$0xff]  ;;  %v1033_v50 = vpack.c.bf16 %v6289_v4, %v1013_v41  ;;  %vm7656_vm8 = vcmp.lt.s32.totalorder %v6278_v6, 16  ;;  %v6329_v41 = vld [vmem:[%s5613_s6 + $0xd8] sm:$0xff] }
  0x59   : > { %7742 = vst [vmem:[#allocation41_spill] sm:$0xff] %v6200_v30  ;;  %7753 = vst [vmem:[#allocation48_spill] sm:$0xff] %v6234_v61  ;;  %v6255_v30 = vsel %vm847_vm13, %v6221_v37, 0.0  ;;  %v1786_v61 = vpack.c.bf16 %v1767_v12, %v6295_v57  ;;  %v4533_v12 = vld [vmem:[%s5613_s6 + $0xda] sm:$0xff]  ;;  %v6366_v58 = vld [vmem:[%s5613_s6 + $0xe8] sm:$0xff] }
  0x5a   : > { %7758 = vst [vmem:[#allocation35_spill] sm:$0xff] %v6255_v30  ;;  %7765 = vst [vmem:[#allocation39_spill] sm:$0xff] %v6295_v57  ;;  %v6308_v30 = vadd.s32 1, %v587_v38  ;;  %v6321_v38 = vsel %vm1635_vm0, %v4529_v49, 0.0  ;;  %v6341_v49 = vsel %vm7652_vm3, %v4531_v27, 0.0  ;;  %v1769_v33 = vsel %vm7656_vm8, %v4533_v12, 0.0 }
  0x5b   : > { %7768 = vst [vmem:[#allocation66_spill] sm:$0xff] %v6321_v38  ;;  %7772 = vst [vmem:[#allocation67_spill] sm:$0xff] %v6341_v49  ;;  %v6379_v57 = vadd.s32 4294967295, %v594_v0  ;;  %v6396_v0 = vsel %vm853_vm4, %v6333_v28, 0.0  ;;  %v7776_v6 = vld [vmem:[#allocation21_spill] sm:$0xff]  ;;  %v4635_v42 = vld [vmem:[%s5613_s6 + $0x109] sm:$0xff] }
  0x5c   : > { %5093 = vmatmul.mubr.msk.bf16.gmra.mxu0 %vm1090_vm1, %v7759_v55  ;;  %v7764_v55 = vpack.c.bf16 %v6069_v8, %v6064_v39  ;;  %v7766_v8 = vpack.c.bf16 %v6046_v32, %v6051_v63  ;;  %v1785_v39 = vpack.c.bf16 %v1765_v24, %v6270_v34  ;;  %v6316_v63 = vld [vmem:[%s5613_s6 + $0xd0] sm:$0xff] }
  0x5d   : > { %5059 = vmatmul.mubr.msk.bf16.gmra.mxu1 %vm1090_vm1, %v7763_v62  ;;  %v379_v62 = vadd.s32 248, %v5608_v5  ;;  %v7769_v5 = vld [vmem:[#allocation43_spill] sm:$0xff]  ;;  %v1015_v27 = vsel %vm855_vm7, %v6316_v63, 0.0  ;;  %v2094_v26 = vsel %vm853_vm4, %v6316_v63, 0.0 }
  0x5e   : > { %5096 = vmatprep.mubr.msk.bf16.mxu0 %vm1090_vm1, %v7764_v55  ;;  %5062 = vmatprep.mubr.msk.bf16.mxu1 %vm1090_vm1, %v7766_v8  ;;  %v1032_v55 = vpack.c.bf16 %v6237_v56, %v1011_v3  ;;  %vm7770_vm10 = vcmp.ge.s32.totalorder %v7769_v5, 0  ;;  %v6346_v8 = vsel %vm851_vm11, %v6316_v63, 0.0  ;;  %v1034_v49 = vpack.c.bf16 %v6329_v41, %v1015_v27  ;;  %v4537_v27 = vld [vmem:[%s5613_s6 + $0xfa] sm:$0xff]  ;;  %v4801_v16 = vld [vmem:[%s5613_s6 + $0x2a] sm:$0xff] }
  0x5f   : > { %v601_v3 = vand.u32 15, %v379_v62  ;;  %v6326_v24 = vsel %vm7770_vm10, %v6240_v14, 0.0  ;;  %7773 = vst [vmem:[#allocation68_spill] sm:$0xff] %v6346_v8  ;;  %vm7660_vm10 = vcmp.lt.s32.totalorder %v6308_v30, 16  ;;  %v1787_v8 = vpack.c.bf16 %v1769_v33, %v6361_v19 }
  0x60   : > { %7771 = vst [vmem:[#allocation43_spill] sm:$0xff] %v6326_v24  ;;  %v1771_v62 = vsel %vm7660_vm10, %v4535_v47, 0.0  ;;  %v6386_v24 = vld [vmem:[%s5613_s6 + $0xf0] sm:$0xff] }
  0x61   : > { %v2098_v43 = vsel %vm857_vm9, %v6386_v24, 0.0 }
  0x64   : > { %5097 = vmatmul.mubr.msk.bf16.gmra.mxu0 %vm1090_vm1, %v1785_v39  ;;  %v1017_v39 = vsel %vm857_vm9, %v6333_v28, 0.0  ;;  %v4586_v28 = vld [vmem:[%s5613_s6 + $0x108] sm:$0xff] }
  0x65   : > { %5063 = vmatmul.mubr.msk.bf16.gmra.mxu1 %vm1090_vm1, %v1032_v55  ;;  %5100 = vmatprep.mubr.msk.bf16.mxu0 %vm1090_vm1, %v1786_v61  ;;  %v6371_v55 = vadd.s32 1, %v601_v3  ;;  %v6375_v61 = vld [vmem:[%s5613_s6 + $0xe2] sm:$0xff]  ;;  %v1035_v34 = vpack.c.bf16 %v6366_v58, %v1017_v39  ;;  %v6399_v3 = vld [vmem:[%s5613_s6 + $0xf8] sm:$0xff]  ;;  %v6408_v39 = vsel %vm7656_vm8, %v4535_v47, 0.0  ;;  %vm7777_vm8 = vcmp.ge.s32.totalorder %v5713_v59, 0 }
  0x66   : > { %5066 = vmatprep.mubr.msk.bf16.mxu1 %vm1090_vm1, %v1033_v50  ;;  %7775 = vst [vmem:[#allocation70_spill] sm:$0xff] %v6375_v61  ;;  %v1788_v38 = vpack.c.bf16 %v1771_v62, %v6375_v61  ;;  %v6391_v50 = vsel %vm7653_vm2, %v4533_v12, 0.0  ;;  %v6413_v12 = vsel %vm855_vm7, %v6386_v24, 0.0  ;;  %vm859_vm2 = vcmp.ge.s32.totalorder %v6379_v57, 0  ;;  %v6424_v47 = vld [vmem:[%s5613_s6 + $0xf2] sm:$0xff]  ;;  %v7779_v59 = vld [vmem:[#allocation3_spill] sm:$0xff] }
  0x67   : > { %7774 = vst [vmem:[#allocation69_spill] sm:$0xff] %v6371_v55  ;;  %vm1645_vm3 = vcmp.lt.s32.totalorder %v6371_v55, 16  ;;  %v1019_v1 = vsel %vm859_vm2, %v6386_v24, 0.0  ;;  %v2070_v62 = vsel %vm7777_vm8, %v7776_v6, 0.0  ;;  %v7778_v55 = vld [vmem:[#allocation26_spill] sm:$0xff]  ;;  %v2072_v6 = vsel %vm831_vm5, %v5782_v60, 0.0 }
  0x68   : > { %v1773_v33 = vsel %vm1645_vm3, %v4537_v27, 0.0  ;;  %v2102_v61 = vpack.c.bf16 %v7778_v55, %v2070_v62  ;;  %v2103_v55 = vpack.c.bf16 %v5815_v9, %v2072_v6  ;;  %vm7781_vm8 = vcmask 1040384   ;;  %v7786_v60 = vld [vmem:[#allocation7_spill] sm:$0xff] }
  0x69   : > { %vm7785_vm5 = vcmp.ge.s32.totalorder %v5765_v48, 0  ;;  %v7790_v48 = vld [vmem:[#allocation13_spill] sm:$0xff]  ;;  %v2116_v63 = vpack.c.bf16 %v6399_v3, %v2098_v43  ;;  %vm7808_vm4 = vmmov %vm7781_vm8  ;;  %v7837_v43 = vld [vmem:[#allocation23_spill] sm:$0xff] }
  0x6a   : > { %v2076_v35 = vsel %vm7785_vm5, %v5859_v45, 0.0  ;;  %vm7791_vm5 = vcmp.ge.s32.totalorder %v7729_v36, 0 }
  0x6b   : > { %v2105_v6 = vpack.c.bf16 %v5893_v23, %v2076_v35  ;;  %v7800_v35 = vld [vmem:[#allocation8_spill] sm:$0xff] }
  0x6c   : > { %5101 = vmatmul.mubr.msk.bf16.gmra.mxu0 %vm1090_vm1, %v1787_v8  ;;  %v1789_v8 = vpack.c.bf16 %v1773_v33, %v6424_v47 }
  0x6d   : > { %5067 = vmatmul.mubr.msk.bf16.gmra.mxu1 %vm1090_vm1, %v1034_v49  ;;  %5104 = vmatprep.mubr.msk.bf16.mxu0 %vm1090_vm1, %v1788_v38  ;;  %v1036_v38 = vpack.c.bf16 %v6399_v3, %v1019_v1  ;;  %v6439_v49 = vsel %vm7660_vm10, %v4537_v27, 0.0  ;;  %v2074_v1 = vsel %vm833_vm6, %v5832_v17, 0.0  ;;  %v7780_v27 = vld [vmem:[#allocation33_spill] sm:$0xff]  ;;  %vm7783_vm10 = vmmov %vm7781_vm8  ;;  %vm7787_vm6 = vcmp.ge.s32.totalorder %v5773_v52, 0 }
  0x6e   : > { %5070 = vmatprep.mubr.msk.bf16.mxu1 %vm1090_vm1, %v1035_v34  ;;  %v2740_v34 = vpack.c.bf16 %v6439_v49, %v6424_v47  ;;  %v3121_v62 = vsel %vm7781_vm8, %v7780_v27, 0  ;;  %v2104_v33 = vpack.c.bf16 %v5844_v29, %v2074_v1  ;;  %v2078_v17 = vsel %vm7787_vm6, %v5871_v7, 0.0 }
  0x6f   : > { %v2106_v1 = vpack.c.bf16 %v5902_v31, %v2078_v17  ;;  %v2080_v52 = vsel %vm7791_vm5, %v5920_v2, 0.0  ;;  %vm7792_vm6 = vcmp.ge.s32.totalorder %v7740_v25, 0  ;;  %v2086_v25 = vsel %vm845_vm15, %v7746_v44, 0.0  ;;  %v7802_v17 = vld [vmem:[#allocation14_spill] sm:$0xff] }
  0x70   : > { %v2082_v45 = vsel %vm7792_vm6, %v7728_v21, 0.0  ;;  %v2107_v7 = vpack.c.bf16 %v7733_v53, %v2080_v52  ;;  %v2110_v36 = vpack.c.bf16 %v6030_v10, %v2086_v25  ;;  %vm7798_vm15 = vcmp.ge.s32.totalorder %v7769_v5, 0  ;;  %v7810_v25 = vld [vmem:[#allocation58_spill] sm:$0xff] }
  0x71   : > { %v2108_v27 = vpack.c.bf16 %v5994_v15, %v2082_v45  ;;  %v2090_v44 = vsel %vm7798_vm15, %v6221_v37, 0.0  ;;  %v2114_v5 = vpack.c.bf16 %v6329_v41, %v2094_v26  ;;  %v7828_v26 = vld [vmem:[#allocation34_spill] sm:$0xff] }
  0x74   : > { %5105 = vmatmul.mubr.msk.bf16.gmra.mxu0 %vm1090_vm1, %v1789_v8  ;;  %v7782_v8 = vld [vmem:[#allocation31_spill] sm:$0xff] }
  0x75   : > { %5071 = vmatmul.mubr.msk.bf16.gmra.mxu1 %vm1090_vm1, %v1036_v38  ;;  %5144 = vmatprep.mubr.msk.bf16.mxu0 %vm1090_vm1, %v7779_v59  ;;  %v2793_v38 = vsel %vm7783_vm10, %v7782_v8, 0  ;;  %v7784_v59 = vld [vmem:[#allocation5_spill] sm:$0xff]  ;;  %vm7788_vm10 = vmmov %vm7781_vm8  ;;  %v7796_v8 = vld [vmem:[#allocation2_spill] sm:$0xff] }
  0x76   : > { %5110 = vmatprep.mubr.msk.bf16.mxu1 %vm1090_vm1, %v2102_v61  ;;  %v6464_v61 = vld [vmem:[%s5599_s26 + $0x7] sm:$0x1] }
  0x7c   : > { %5145 = vmatmul.mubr.msk.bf16.vlgmr.msra.gmra.mxu0 %vm1090_vm1, %v7784_v59  ;;  %v7799_v59 = vld [vmem:[#allocation6_spill] sm:$0xff] }
  0x7d   : > { %5111 = vmatmul.mubr.msk.bf16.vlgmr.msra.gmra.mxu1 %vm1090_vm1, %v2103_v55  ;;  %5211 = vmatpush3.bf16.msra.mxu0 %v3121_v62  ;;  %v7789_v55 = vld [vmem:[#allocation9_spill] sm:$0xff]  ;;  %v7793_v62 = vld [vmem:[#allocation15_spill] sm:$0xff] }
  0x7e   : > { %5177 = vmatpush3.bf16.msra.mxu1 %v2793_v38  ;;  %5114 = vmatprep.mubr.msk.bf16.mxu1 %vm1090_vm1, %v2104_v33  ;;  %v7794_v33 = vld [vmem:[#allocation17_spill] sm:$0xff]  ;;  %v7797_v38 = vld [vmem:[#allocation4_spill] sm:$0xff] }
  0x7f   : > { %5148 = vmatprep.mubr.msk.bf16.mxu0 %vm1090_vm1, %v7786_v60  ;;  %5322 = vmatprep.subr.msk.bf16.mxu1 %vm7788_vm10, %v6464_v61  ;;  %vm7795_vm10 = vcmp.ge.s32.totalorder %v7747_v20, 0  ;;  %v2088_v20 = vsel %vm847_vm13, %v6008_v11, 0.0  ;;  %v2092_v11 = vsel %vm851_vm11, %v6240_v14, 0.0  ;;  %v7801_v60 = vld [vmem:[#allocation10_spill] sm:$0xff]  ;;  %v2115_v14 = vpack.c.bf16 %v6366_v58, %v2096_v51  ;;  %vm7809_vm11 = vmmov %vm7808_vm4  ;;  %v7835_v51 = vld [vmem:[#allocation41_spill] sm:$0xff] }
  0x80   : > { %5323 = vmatprep.subr.msk.bf16.mxu0 %vm7781_vm8, %v6468_v13  ;;  %v2084_v2 = vsel %vm7795_vm10, %v7739_v54, 0.0  ;;  %v2111_v46 = vpack.c.bf16 %v6046_v32, %v2088_v20  ;;  %v2112_v54 = vpack.c.bf16 %v6237_v56, %v2090_v44  ;;  %v2113_v37 = vpack.c.bf16 %v6289_v4, %v2092_v11  ;;  %v7822_v44 = vld [vmem:[#allocation61_spill] sm:$0xff]  ;;  %v7827_v11 = vld [vmem:[#allocation63_spill] sm:$0xff] }
  0x81   : > { %v2109_v21 = vpack.c.bf16 %v6012_v40, %v2084_v2  ;;  %v3417_v2 = vsel %vm7809_vm11, %v6464_v61, 0  ;;  %vm7895_vm10 = vcmp.lt.s32.totalorder %v6308_v30, 16  ;;  %v4831_v30 = vld [vmem:[%s5613_s6 + $0x11a] sm:$0xff] }
  0x84   : > { %5149 = vmatmul.mubr.msk.bf16.gmra.mxu0 %vm1090_vm1, %v7789_v55  ;;  %v7804_v55 = vld [vmem:[#allocation18_spill] sm:$0xff] }
  0x85   : > { %5115 = vmatmul.mubr.msk.bf16.gmra.mxu1 %vm1090_vm1, %v2105_v6  ;;  %5152 = vmatprep.mubr.msk.bf16.mxu0 %vm1090_vm1, %v7790_v48  ;;  %v4585_v6 = vld [vmem:[%s5613_s6 + $0x100] sm:$0xff] }
  0x86   : > { %5118 = vmatprep.mubr.msk.bf16.mxu1 %vm1090_vm1, %v2106_v1  ;;  %v7803_v1 = vld [vmem:[#allocation16_spill] sm:$0xff]  ;;  %v4634_v48 = vld [vmem:[%s5613_s6 + $0x101] sm:$0xff]  ;;  %v2100_v24 = vsel %vm859_vm2, %v4585_v6, 0.0 }
  0x87   : > { %v6567_v52 = vpack.c.bf16 %v4635_v42, %v4634_v48  ;;  %v2117_v45 = vpack.c.bf16 %v4586_v28, %v2100_v24  ;;  %v7843_v48 = vld [vmem:[#allocation52_spill] sm:$0xff] }
  0x88   : > { %v7845_v24 = vld [vmem:[#allocation48_spill] sm:$0xff] }
  0x8c   : > { %5153 = vmatmul.mubr.msk.bf16.gmra.mxu0 %vm1090_vm1, %v7793_v62 }
  0x8d   : > { %5119 = vmatmul.mubr.msk.bf16.gmra.mxu1 %vm1090_vm1, %v2107_v7  ;;  %5156 = vmatprep.mubr.msk.bf16.mxu0 %vm1090_vm1, %v7794_v33  ;;  %v7805_v7 = vpack.c.bf16 %v5815_v9, %v6109_v18  ;;  %v3745_v33 = vsel %vm7808_vm4, %v6468_v13, 0  ;;  %v7813_v9 = vld [vmem:[#allocation28_spill] sm:$0xff] }
  0x8e   : > { %5122 = vmatprep.mubr.msk.bf16.mxu1 %vm1090_vm1, %v2108_v27  ;;  %v7806_v27 = vld [vmem:[#allocation24_spill] sm:$0xff] }
  0x8f   : > { %v7807_v62 = vpack.c.bf16 %v6104_v22, %v7806_v27  ;;  %v7815_v22 = vld [vmem:[#allocation59_spill] sm:$0xff]  ;;  %v7818_v13 = vld [vmem:[#allocation60_spill] sm:$0xff] }
  0x90   : > { %v7819_v61 = vpack.c.bf16 %v5893_v23, %v7818_v13  ;;  %v7829_v23 = vpack.c.bf16 %v7827_v11, %v7828_v26  ;;  %v7865_v26 = vpack.c.bf16 %v6366_v58, %v6396_v0 }
  0x94   : > { %5157 = vmatmul.mubr.msk.bf16.gmra.mxu0 %vm1090_vm1, %v7796_v8  ;;  %v7816_v8 = vld [vmem:[#allocation29_spill] sm:$0xff] }
  0x95   : > { %5123 = vmatmul.mubr.msk.bf16.gmra.mxu1 %vm1090_vm1, %v2109_v21  ;;  %5160 = vmatprep.mubr.msk.bf16.mxu0 %vm1090_vm1, %v7797_v38  ;;  %v7811_v21 = vpack.c.bf16 %v5844_v29, %v7810_v25  ;;  %v7817_v38 = vpack.c.bf16 %v7815_v22, %v7816_v8  ;;  %v7820_v29 = vld [vmem:[#allocation62_spill] sm:$0xff]  ;;  %v7852_v25 = vld [vmem:[#allocation49_spill] sm:$0xff] }
  0x96   : > { %5126 = vmatprep.mubr.msk.bf16.mxu1 %vm1090_vm1, %v2110_v36  ;;  %v7812_v36 = vld [vmem:[#allocation57_spill] sm:$0xff]  ;;  %v7821_v20 = vpack.c.bf16 %v5902_v31, %v7820_v29  ;;  %v7857_v22 = vld [vmem:[#allocation66_spill] sm:$0xff] }
  0x97   : > { %v7814_v18 = vpack.c.bf16 %v7812_v36, %v7813_v9  ;;  %v7858_v8 = vld [vmem:[#allocation37_spill] sm:$0xff] }
  0x9c   : > { %5161 = vmatmul.mubr.msk.bf16.gmra.mxu0 %vm1090_vm1, %v7799_v59  ;;  %v7825_v59 = vld [vmem:[#allocation64_spill] sm:$0xff] }
  0x9d   : > { %5127 = vmatmul.mubr.msk.bf16.gmra.mxu1 %vm1090_vm1, %v2111_v46  ;;  %5164 = vmatprep.mubr.msk.bf16.mxu0 %vm1090_vm1, %v7800_v35  ;;  %v7823_v46 = vld [vmem:[#allocation30_spill] sm:$0xff]  ;;  %v7826_v35 = vpack.c.bf16 %v7733_v53, %v7825_v59  ;;  %v7836_v53 = vpack.c.bf16 %v6012_v40, %v7835_v51  ;;  %v7846_v40 = vpack.c.bf16 %v6046_v32, %v7845_v24  ;;  %v7855_v32 = vld [vmem:[#allocation43_spill] sm:$0xff] }
  0x9e   : > { %5130 = vmatprep.mubr.msk.bf16.mxu1 %vm1090_vm1, %v2112_v54  ;;  %v7824_v54 = vpack.c.bf16 %v7822_v44, %v7823_v46  ;;  %v7856_v9 = vpack.c.bf16 %v6289_v4, %v7855_v32  ;;  %v7860_v44 = vld [vmem:[#allocation68_spill] sm:$0xff]  ;;  %v7862_v59 = vld [vmem:[#allocation67_spill] sm:$0xff] }
  0x9f   : > { %v7861_v46 = vpack.c.bf16 %v6329_v41, %v7860_v44  ;;  %v7866_v41 = vpack.c.bf16 %v6391_v50, %v6361_v19  ;;  %v6716_v19 = vld [vmem:[%s5613_s6 + $0x10a] sm:$0xff] }
  0xa0   : > { %v4752_v24 = vld [vmem:[%s5613_s6 + $0x29] sm:$0xff] }
  0xa4   : > { %5165 = vmatmul.mubr.msk.bf16.gmra.mxu0 %vm1090_vm1, %v7801_v60  ;;  %v7833_v60 = vld [vmem:[#allocation42_spill] sm:$0xff] }
  0xa5   : > { %5131 = vmatmul.mubr.msk.bf16.gmra.mxu1 %vm1090_vm1, %v2113_v37  ;;  %5168 = vmatprep.mubr.msk.bf16.mxu0 %vm1090_vm1, %v7802_v17  ;;  %v7830_v37 = vld [vmem:[#allocation44_spill] sm:$0xff] }
  0xa6   : > { %5134 = vmatprep.mubr.msk.bf16.mxu1 %vm1090_vm1, %v2114_v5  ;;  %v7831_v31 = vpack.c.bf16 %v5994_v15, %v7830_v37  ;;  %v7832_v5 = vld [vmem:[#allocation65_spill] sm:$0xff]  ;;  %v3050_v37 = vsel %vm857_vm9, %v4585_v6, 0.0  ;;  %v7867_v6 = vpack.c.bf16 %v6399_v3, %v6413_v12  ;;  %v6742_v3 = vld [vmem:[%s5613_s6 + $0x102] sm:$0xff]  ;;  %v2725_v12 = vsel %vm1645_vm3, %v6716_v19, 0.0 }
  0xa7   : > { %v7834_v17 = vpack.c.bf16 %v7832_v5, %v7833_v60  ;;  %v3068_v58 = vpack.c.bf16 %v4586_v28, %v3050_v37  ;;  %v7868_v28 = vld [vmem:[#allocation70_spill] sm:$0xff] }
  0xac   : > { %5169 = vmatmul.mubr.msk.bf16.gmra.mxu0 %vm1090_vm1, %v7803_v1  ;;  %v7840_v1 = vld [vmem:[#allocation47_spill] sm:$0xff] }
  0xad   : > { %5135 = vmatmul.mubr.msk.bf16.gmra.mxu1 %vm1090_vm1, %v2115_v14  ;;  %5172 = vmatprep.mubr.msk.bf16.mxu0 %vm1090_vm1, %v7804_v55  ;;  %v7838_v14 = vld [vmem:[#allocation50_spill] sm:$0xff]  ;;  %v7841_v15 = vpack.c.bf16 %v6030_v10, %v7840_v1  ;;  %v7842_v55 = vld [vmem:[#allocation45_spill] sm:$0xff]  ;;  %v7850_v10 = vld [vmem:[#allocation35_spill] sm:$0xff] }
  0xae   : > { %5138 = vmatprep.mubr.msk.bf16.mxu1 %vm1090_vm1, %v2116_v63  ;;  %v7839_v63 = vpack.c.bf16 %v7837_v43, %v7838_v14  ;;  %v7844_v42 = vpack.c.bf16 %v7842_v55, %v7843_v48  ;;  %v7869_v43 = vpack.c.bf16 %v6408_v39, %v7868_v28  ;;  %v4733_v14 = vld [vmem:[%s5613_s6 + $0x118] sm:$0xff]  ;;  %v7871_v55 = vld [vmem:[#allocation12_spill] sm:$0xff] }
  0xaf   : > { %vm7872_vm13 = vcmp.lt.s32.totalorder %v7871_v55, 16  ;;  %v4807_v28 = vld [vmem:[%s5613_s6 + $0x5a] sm:$0xff]  ;;  %v7876_v55 = vld [vmem:[#allocation20_spill] sm:$0xff] }
  0xb0   : > { %v3647_v48 = vsel %vm7872_vm13, %v4801_v16, 0.0  ;;  %vm7877_vm7 = vcmp.lt.s32.totalorder %v7876_v55, 16 }
  0xb4   : > { %5173 = vmatmul.mubr.msk.bf16.gmra.mxu0 %vm1090_vm1, %v6567_v52 }
  0xb5   : > { %5139 = vmatmul.mubr.msk.bf16.gmra.mxu1 %vm1090_vm1, %v2117_v45  ;;  %5212 = vmatprep.mubr.msk.bf16.mxu0 %vm1090_vm1, %v7805_v7  ;;  %v7847_v45 = vld [vmem:[#allocation27_spill] sm:$0xff]  ;;  %v7848_v7 = vld [vmem:[#allocation53_spill] sm:$0xff] }
  0xb6   : > { %5178 = vmatprep.mubr.msk.bf16.mxu1 %vm1090_vm1, %v7807_v62  ;;  %v7849_v27 = vpack.c.bf16 %v7847_v45, %v7848_v7 }
  0xbc   : > { %5213 = vmatmul.mubr.msk.bf16.vlgmr.msra.gmra.mxu0 %vm1090_vm1, %v7811_v21  ;;  %v7853_v21 = vld [vmem:[#allocation54_spill] sm:$0xff] }
  0xbd   : > { %5179 = vmatmul.mubr.msk.bf16.vlgmr.msra.gmra.mxu1 %vm1090_vm1, %v7814_v18  ;;  %5279 = vmatpush3.bf16.msra.mxu0 %v3745_v33  ;;  %v7851_v33 = vpack.c.bf16 %v6237_v56, %v7850_v10  ;;  %v7854_v36 = vpack.c.bf16 %v7852_v25, %v7853_v21 }
  0xbe   : > { %5245 = vmatpush3.bf16.msra.mxu1 %v3417_v2  ;;  %5182 = vmatprep.mubr.msk.bf16.mxu1 %vm1090_vm1, %v7817_v38  ;;  %v7859_v38 = vpack.c.bf16 %v7857_v22, %v7858_v8  ;;  %v4754_v22 = vld [vmem:[%s5613_s6 + $0x39] sm:$0xff]  ;;  %v4804_v8 = vld [vmem:[%s5613_s6 + $0x42] sm:$0xff] }
  0xbf   : > { %5216 = vmatprep.mubr.msk.bf16.mxu0 %vm1090_vm1, %v7819_v61 }
  0xc4   : > { %5217 = vmatmul.mubr.msk.bf16.gmra.mxu0 %vm1090_vm1, %v7821_v20 }
  0xc5   : > { %5183 = vmatmul.mubr.msk.bf16.gmra.mxu1 %vm1090_vm1, %v7824_v54  ;;  %5220 = vmatprep.mubr.msk.bf16.mxu0 %vm1090_vm1, %v7826_v35  ;;  %v7863_v35 = vld [vmem:[#allocation39_spill] sm:$0xff] }
  0xc6   : > { %5186 = vmatprep.mubr.msk.bf16.mxu1 %vm1090_vm1, %v7829_v23  ;;  %v7864_v11 = vpack.c.bf16 %v7862_v59, %v7863_v35  ;;  %v4755_v59 = vld [vmem:[%s5613_s6 + $0x41] sm:$0xff]  ;;  %v4756_v35 = vld [vmem:[%s5613_s6 + $0x49] sm:$0xff] }
  0xcc   : > { %5221 = vmatmul.mubr.msk.bf16.gmra.mxu0 %vm1090_vm1, %v7831_v31 }
  0xcd   : > { %5187 = vmatmul.mubr.msk.bf16.gmra.mxu1 %vm1090_vm1, %v7834_v17  ;;  %5224 = vmatprep.mubr.msk.bf16.mxu0 %vm1090_vm1, %v7836_v53  ;;  %v4732_v17 = vld [vmem:[%s5613_s6 + $0x110] sm:$0xff] }
  0xce   : > { %5190 = vmatprep.mubr.msk.bf16.mxu1 %vm1090_vm1, %v7839_v63  ;;  %v3052_v63 = vsel %vm859_vm2, %v4732_v17, 0.0 }
  0xcf   : > { %v3069_v47 = vpack.c.bf16 %v4733_v14, %v3052_v63  ;;  %v4809_v14 = vld [vmem:[%s5613_s6 + $0x6a] sm:$0xff] }
  0xd4   : > { %5225 = vmatmul.mubr.msk.bf16.gmra.mxu0 %vm1090_vm1, %v7841_v15  ;;  %v4800_v15 = vld [vmem:[%s5613_s6 + $0x22] sm:$0xff] }
  0xd5   : > { %5191 = vmatmul.mubr.msk.bf16.gmra.mxu1 %vm1090_vm1, %v7844_v42  ;;  %5228 = vmatprep.mubr.msk.bf16.mxu0 %vm1090_vm1, %v7846_v40  ;;  %v4751_v42 = vld [vmem:[%s5613_s6 + $0x21] sm:$0xff]  ;;  %v3678_v45 = vpack.c.bf16 %v3647_v48, %v4800_v15  ;;  %v4806_v15 = vld [vmem:[%s5613_s6 + $0x52] sm:$0xff]  ;;  %v3653_v48 = vsel %vm7877_vm7, %v4807_v28, 0.0 }
  0xd6   : > { %5194 = vmatprep.mubr.msk.bf16.mxu1 %vm1090_vm1, %v7849_v27  ;;  %v3350_v27 = vpack.c.bf16 %v4752_v24, %v4751_v42  ;;  %v4811_v28 = vld [vmem:[%s5613_s6 + $0x7a] sm:$0xff] }
  0xdc   : > { %v6648_v62 = vpop.f32.mrf.mxu0  ;;  %5229 = vmatmul.mubr.msk.bf16.gmra.mxu0 %vm1090_vm1, %v7851_v33  ;;  %v4805_v33 = vld [vmem:[%s5613_s6 + $0x4a] sm:$0xff] }
  0xdd   : > { %v6654_v2 = vpop.f32.mrf.mxu1  ;;  %5195 = vmatmul.mubr.msk.bf16.gmra.mxu1 %vm1090_vm1, %v7854_v36  ;;  %5232 = vmatprep.mubr.msk.bf16.mxu0 %vm1090_vm1, %v7856_v9  ;;  %v4802_v36 = vld [vmem:[%s5613_s6 + $0x32] sm:$0xff] }
  0xde   : > { %v6664_v18 = vpop.f32.mrf.mxu0  ;;  %5198 = vmatprep.mubr.msk.bf16.mxu1 %vm1090_vm1, %v7859_v38  ;;  %v4753_v9 = vld [vmem:[%s5613_s6 + $0x31] sm:$0xff]  ;;  %v7873_v38 = vld [vmem:[#allocation19_spill] sm:$0xff] }
  0xdf   : > { %v6670_v56 = vpop.f32.mrf.mxu1  ;;  %vm7874_vm2 = vcmp.lt.s32.totalorder %v7873_v38, 16 }
  0xe0   : > { %v6672_v13 = vpop.f32.mrf.mxu0  ;;  %v3651_v44 = vsel %vm7874_vm2, %v4805_v33, 0.0 }
  0xe1   : > { %v6674_v61 = vpop.f32.mrf.mxu1  ;;  %v3680_v17 = vpack.c.bf16 %v3651_v44, %v4804_v8 }
  0xe2   : > { %v6676_v29 = vpop.f32.mrf.mxu0 }
  0xe3   : > { %v6678_v20 = vpop.f32.mrf.mxu1 }
  0xe4   : > { %v6680_v4 = vpop.f32.mrf.mxu0  ;;  %5233 = vmatmul.mubr.msk.bf16.gmra.mxu0 %vm1090_vm1, %v7861_v46 }
  0xe5   : > { %v6686_v54 = vpop.f32.mrf.mxu1  ;;  %5199 = vmatmul.mubr.msk.bf16.gmra.mxu1 %vm1090_vm1, %v7864_v11  ;;  %5236 = vmatprep.mubr.msk.bf16.mxu0 %vm1090_vm1, %v7865_v26  ;;  %v7875_v26 = vld [vmem:[#allocation11_spill] sm:$0xff] }
  0xe6   : > { %v6696_v23 = vpop.f32.mrf.mxu0  ;;  %5202 = vmatprep.mubr.msk.bf16.mxu1 %vm1090_vm1, %v7866_v41  ;;  %v3679_v41 = vpack.c.bf16 %v7875_v26, %v4802_v36 }
  0xe7   : > { %v6704_v31 = vpop.f32.mrf.mxu1 }
  0xe8   : > { %v6706_v5 = vpop.f32.mrf.mxu0 }
  0xe9   : > { %v6708_v60 = vpop.f32.mrf.mxu1 }
  0xea   : > { %v6710_v0 = vpop.f32.mrf.mxu0 }
  0xeb   : > { %v6713_v51 = vpop.f32.mrf.mxu1 }
  0xec   : > { %v6719_v50 = vpop.f32.mrf.mxu0  ;;  %5237 = vmatmul.mubr.msk.bf16.gmra.mxu0 %vm1090_vm1, %v7867_v6  ;;  %v3352_v6 = vpack.c.bf16 %v4756_v35, %v4755_v59 }
  0xed   : > { %v6725_v53 = vpop.f32.mrf.mxu1  ;;  %5203 = vmatmul.mubr.msk.bf16.gmra.mxu1 %vm1090_vm1, %v7869_v43  ;;  %5240 = vmatprep.mubr.msk.bf16.mxu0 %vm1090_vm1, %v3068_v58  ;;  %v3351_v58 = vpack.c.bf16 %v4754_v22, %v4753_v9  ;;  %v4759_v9 = vld [vmem:[%s5613_s6 + $0x61] sm:$0xff]  ;;  %v4760_v22 = vld [vmem:[%s5613_s6 + $0x69] sm:$0xff] }
  0xee   : > { %v6735_v1 = vpop.f32.mrf.mxu0  ;;  %5206 = vmatprep.mubr.msk.bf16.mxu1 %vm1090_vm1, %v2740_v34  ;;  %v2741_v34 = vpack.c.bf16 %v2725_v12, %v6742_v3 }
  0xef   : > { %v6750_v57 = vpop.f32.mrf.mxu1 }
  0xf0   : > { %v6754_v40 = vpop.f32.mrf.mxu0 }
  0xf1   : > { %v6756_v49 = vpop.f32.mrf.mxu1 }
  0xf2   : > { %v6759_v7 = vpop.f32.mrf.mxu0 }
  0xf3   : > { %v6761_v10 = vpop.f32.mrf.mxu1 }
  0xf4   : > { %v6764_v25 = vpop.f32.mrf.mxu0  ;;  %5241 = vmatmul.mubr.msk.bf16.gmra.mxu0 %vm1090_vm1, %v3069_v47  ;;  %v4757_v47 = vld [vmem:[%s5613_s6 + $0x51] sm:$0xff] }
  0xf5   : > { %v6767_v21 = vpop.f32.mrf.mxu1  ;;  %5207 = vmatmul.mubr.msk.bf16.gmra.mxu1 %vm1090_vm1, %v2741_v34  ;;  %5280 = vmatprep.mubr.msk.bf16.mxu0 %vm1090_vm1, %v3678_v45  ;;  %v4758_v34 = vld [vmem:[%s5613_s6 + $0x59] sm:$0xff]  ;;  %v4808_v45 = vld [vmem:[%s5613_s6 + $0x62] sm:$0xff] }
  0xf6   : > { %v6772_v32 = vpop.f32.mrf.mxu0  ;;  %5246 = vmatprep.mubr.msk.bf16.mxu1 %vm1090_vm1, %v3350_v27  ;;  %v7878_v27 = vld [vmem:[#allocation22_spill] sm:$0xff]  ;;  %v3353_v35 = vpack.c.bf16 %v4758_v34, %v4757_v47 }
  0xf7   : > { %v6780_v46 = vpop.f32.mrf.mxu1  ;;  %vm7879_vm9 = vcmp.lt.s32.totalorder %v7878_v27, 16  ;;  %v4812_v27 = vld [vmem:[%s5613_s6 + $0x82] sm:$0xff] }
  0xf8   : > { %v6784_v11 = vpop.f32.mrf.mxu0  ;;  %v3655_v33 = vsel %vm7879_vm9, %v4809_v14, 0.0 }
  0xf9   : > { %v6787_v37 = vpop.f32.mrf.mxu1  ;;  %v3682_v26 = vpack.c.bf16 %v3655_v33, %v4808_v45  ;;  %v4762_v45 = vld [vmem:[%s5613_s6 + $0x79] sm:$0xff]  ;;  %v7882_v33 = vld [vmem:[#allocation32_spill] sm:$0xff] }
  0xfa   : > { %v6789_v16 = vpop.f32.mrf.mxu0  ;;  %vm7883_vm5 = vcmp.lt.s32.totalorder %v7882_v33, 16  ;;  %v4816_v33 = vld [vmem:[%s5613_s6 + $0xa2] sm:$0xff] }
  0xfb   : > { %v6792_v43 = vpop.f32.mrf.mxu1 }
  0xfc   : > { %v5078_v63 = vpop.f32.mrf.mxu0  ;;  %5281 = vmatmul.mubr.msk.bf16.vlgmr.msra.gmra.mxu0 %vm1090_vm1, %v3679_v41 }
  0xfd   : > { %v5044_v12 = vpop.f32.mrf.mxu1  ;;  %5247 = vmatmul.mubr.msk.bf16.vlgmr.msra.gmra.mxu1 %vm1090_vm1, %v3351_v58  ;;  %5284 = vmatprep.mubr.msk.bf16.mxu0 %vm1090_vm1, %v3680_v17 }
  0xfe   : > { %v1398_v42 = vadd.f32 %v5044_v12, %v6648_v62  ;;  %v1877_v24 = vpop.f32.mrf.mxu0  ;;  %5250 = vmatprep.mubr.msk.bf16.mxu1 %vm1090_vm1, %v3352_v6  ;;  %v3681_v62 = vpack.c.bf16 %v3653_v48, %v4806_v15  ;;  %v3354_v6 = vpack.c.bf16 %v4760_v22, %v4759_v9  ;;  %v7880_v48 = vld [vmem:[#allocation25_spill] sm:$0xff]  ;;  %v4763_v22 = vld [vmem:[%s5613_s6 + $0x81] sm:$0xff] }
  0xff   : > { %v1389_v36 = vpop.f32.mrf.mxu1  ;;  %vm7881_vm8 = vcmp.lt.s32.totalorder %v7880_v48, 16 }
 0x100   : > { %v6810_v8 = vadd.f32 %v5078_v63, %v1398_v42  ;;  %v1390_v38 = vadd.f32 %v1389_v36, %v6664_v18  ;;  %v5079_v44 = vpop.f32.mrf.mxu0  ;;  %v4813_v63 = vld [vmem:[%s5613_s6 + $0x8a] sm:$0xff]  ;;  %v3657_v42 = vsel %vm7881_vm8, %v4811_v28, 0.0 }
 0x101   : > { %v5045_v59 = vpop.f32.mrf.mxu1  ;;  %v3659_v36 = vsel %vm7883_vm5, %v4813_v63, 0.0  ;;  %v4815_v63 = vld [vmem:[%s5613_s6 + $0x9a] sm:$0xff] }
 0x102   : > { %v6813_v41 = vadd.f32 %v1877_v24, %v1390_v38  ;;  %v1401_v58 = vadd.f32 %v5045_v59, %v6672_v13  ;;  %v1880_v17 = vpop.f32.mrf.mxu0  ;;  %v4810_v13 = vld [vmem:[%s5613_s6 + $0x72] sm:$0xff]  ;;  %v4764_v38 = vld [vmem:[%s5613_s6 + $0x89] sm:$0xff] }
 0x103   : > { %v1392_v14 = vpop.f32.mrf.mxu1 }
 0x104   : > { %v6818_v12 = vadd.f32 %v5079_v44, %v1401_v58  ;;  %v1393_v18 = vadd.f32 %v1392_v14, %v6676_v29  ;;  %v5082_v15 = vpop.f32.mrf.mxu0  ;;  %5285 = vmatmul.mubr.msk.bf16.gmra.mxu0 %vm1090_vm1, %v3681_v62  ;;  %v4761_v29 = vld [vmem:[%s5613_s6 + $0x71] sm:$0xff]  ;;  %v3684_v58 = vpack.c.bf16 %v3659_v36, %v4812_v27  ;;  %v3356_v14 = vpack.c.bf16 %v4764_v38, %v4763_v22  ;;  %v4766_v27 = vld [vmem:[%s5613_s6 + $0x99] sm:$0xff]  ;;  %v4767_v38 = vld [vmem:[%s5613_s6 + $0xa1] sm:$0xff] }
 0x105   : > { %v5048_v55 = vpop.f32.mrf.mxu1  ;;  %5251 = vmatmul.mubr.msk.bf16.gmra.mxu1 %vm1090_vm1, %v3353_v35  ;;  %5288 = vmatprep.mubr.msk.bf16.mxu0 %vm1090_vm1, %v3682_v26  ;;  %v3355_v26 = vpack.c.bf16 %v4762_v45, %v4761_v29  ;;  %v4820_v36 = vld [vmem:[%s5613_s6 + $0xc2] sm:$0xff] }
 0x106   : > { %v6827_v24 = vadd.f32 %v1880_v17, %v1393_v18  ;;  %v1414_v47 = vadd.f32 %v5048_v55, %v6680_v4  ;;  %v1893_v34 = vpop.f32.mrf.mxu0  ;;  %5254 = vmatprep.mubr.msk.bf16.mxu1 %vm1090_vm1, %v3354_v6  ;;  %v3683_v4 = vpack.c.bf16 %v3657_v42, %v4810_v13 }
 0x107   : > { %v1405_v9 = vpop.f32.mrf.mxu1 }
 0x108   : > { %v6838_v44 = vadd.f32 %v5082_v15, %v1414_v47  ;;  %v1406_v62 = vadd.f32 %v1405_v9, %v6696_v23  ;;  %v5083_v59 = vpop.f32.mrf.mxu0  ;;  %v4817_v15 = vld [vmem:[%s5613_s6 + $0xaa] sm:$0xff]  ;;  %v3661_v47 = vsel %vm1629_vm14, %v4815_v63, 0.0 }
 0x109   : > { %v5049_v35 = vpop.f32.mrf.mxu1  ;;  %v3663_v9 = vsel %vm1631_vm12, %v4817_v15, 0.0  ;;  %v4819_v15 = vld [vmem:[%s5613_s6 + $0xba] sm:$0xff] }
 0x10a   : > { %v6841_v17 = vadd.f32 %v1893_v34, %v1406_v62  ;;  %v1417_v6 = vadd.f32 %v5049_v35, %v6706_v5  ;;  %v1896_v28 = vpop.f32.mrf.mxu0  ;;  %v4814_v5 = vld [vmem:[%s5613_s6 + $0x92] sm:$0xff]  ;;  %v4768_v62 = vld [vmem:[%s5613_s6 + $0xa9] sm:$0xff] }
 0x10b   : > { %v1408_v18 = vpop.f32.mrf.mxu1 }
 0x10c   : > { %v6846_v55 = vadd.f32 %v5083_v59, %v1417_v6  ;;  %v1409_v23 = vadd.f32 %v1408_v18, %v6710_v0  ;;  %v5086_v13 = vpop.f32.mrf.mxu0  ;;  %5289 = vmatmul.mubr.msk.bf16.gmra.mxu0 %vm1090_vm1, %v3683_v4  ;;  %v4765_v0 = vld [vmem:[%s5613_s6 + $0x91] sm:$0xff]  ;;  %v3686_v6 = vpack.c.bf16 %v3663_v9, %v4816_v33  ;;  %v3358_v18 = vpack.c.bf16 %v4768_v62, %v4767_v38  ;;  %v4770_v33 = vld [vmem:[%s5613_s6 + $0xb9] sm:$0xff]  ;;  %v4771_v62 = vld [vmem:[%s5613_s6 + $0xc1] sm:$0xff] }
 0x10d   : > { %v5052_v48 = vpop.f32.mrf.mxu1  ;;  %5255 = vmatmul.mubr.msk.bf16.gmra.mxu1 %vm1090_vm1, %v3355_v26  ;;  %5292 = vmatprep.mubr.msk.bf16.mxu0 %vm1090_vm1, %v3684_v58  ;;  %v3357_v58 = vpack.c.bf16 %v4766_v27, %v4765_v0  ;;  %v4824_v9 = vld [vmem:[%s5613_s6 + $0xe2] sm:$0xff] }
 0x10e   : > { %v6855_v34 = vadd.f32 %v1896_v28, %v1409_v23  ;;  %v1430_v29 = vadd.f32 %v5052_v48, %v6719_v50  ;;  %v1909_v45 = vpop.f32.mrf.mxu0  ;;  %5258 = vmatprep.mubr.msk.bf16.mxu1 %vm1090_vm1, %v3356_v14  ;;  %v3685_v50 = vpack.c.bf16 %v3661_v47, %v4814_v5  ;;  %v7886_v47 = vld [vmem:[#allocation40_spill] sm:$0xff] }
 0x10f   : > { %v1421_v22 = vpop.f32.mrf.mxu1  ;;  %vm7887_vm12 = vcmp.lt.s32.totalorder %v7886_v47, 16 }
 0x110   : > { %v6866_v59 = vadd.f32 %v5086_v13, %v1430_v29  ;;  %v1422_v4 = vadd.f32 %v1421_v22, %v6735_v1  ;;  %v5087_v35 = vpop.f32.mrf.mxu0  ;;  %v4821_v13 = vld [vmem:[%s5613_s6 + $0xca] sm:$0xff]  ;;  %v3665_v29 = vsel %vm7887_vm12, %v4819_v15, 0.0 }
 0x111   : > { %v5053_v26 = vpop.f32.mrf.mxu1  ;;  %v3667_v22 = vsel %vm1635_vm0, %v4821_v13, 0.0  ;;  %v4823_v13 = vld [vmem:[%s5613_s6 + $0xda] sm:$0xff] }
 0x112   : > { %v6869_v28 = vadd.f32 %v1909_v45, %v1422_v4  ;;  %v1433_v14 = vadd.f32 %v5053_v26, %v6754_v40  ;;  %v1912_v63 = vpop.f32.mrf.mxu0  ;;  %v4818_v40 = vld [vmem:[%s5613_s6 + $0xb2] sm:$0xff]  ;;  %v4772_v4 = vld [vmem:[%s5613_s6 + $0xc9] sm:$0xff] }
 0x113   : > { %v1424_v23 = vpop.f32.mrf.mxu1 }
 0x114   : > { %v6874_v48 = vadd.f32 %v5087_v35, %v1433_v14  ;;  %v1425_v1 = vadd.f32 %v1424_v23, %v6759_v7  ;;  %v5090_v5 = vpop.f32.mrf.mxu0  ;;  %5293 = vmatmul.mubr.msk.bf16.gmra.mxu0 %vm1090_vm1, %v3685_v50  ;;  %v4769_v7 = vld [vmem:[%s5613_s6 + $0xb1] sm:$0xff]  ;;  %v3688_v14 = vpack.c.bf16 %v3667_v22, %v4820_v36  ;;  %v3360_v23 = vpack.c.bf16 %v4772_v4, %v4771_v62  ;;  %v4774_v36 = vld [vmem:[%s5613_s6 + $0xd9] sm:$0xff]  ;;  %v4775_v4 = vld [vmem:[%s5613_s6 + $0xe1] sm:$0xff] }
 0x115   : > { %v5056_v42 = vpop.f32.mrf.mxu1  ;;  %5259 = vmatmul.mubr.msk.bf16.gmra.mxu1 %vm1090_vm1, %v3357_v58  ;;  %5296 = vmatprep.mubr.msk.bf16.mxu0 %vm1090_vm1, %v3686_v6  ;;  %v3359_v6 = vpack.c.bf16 %v4770_v33, %v4769_v7  ;;  %v7891_v22 = vld [vmem:[#allocation56_spill] sm:$0xff] }
 0x116   : > { %v6883_v45 = vadd.f32 %v1912_v63, %v1425_v1  ;;  %v1446_v0 = vadd.f32 %v5056_v42, %v6764_v25  ;;  %v1925_v27 = vpop.f32.mrf.mxu0  ;;  %5262 = vmatprep.mubr.msk.bf16.mxu1 %vm1090_vm1, %v3358_v18  ;;  %v3687_v25 = vpack.c.bf16 %v3665_v29, %v4818_v40  ;;  %v7889_v29 = vld [vmem:[#allocation55_spill] sm:$0xff]  ;;  %vm7892_vm14 = vcmp.lt.s32.totalorder %v7891_v22, 16 }
 0x117   : > { %v1437_v38 = vpop.f32.mrf.mxu1  ;;  %vm7890_vm0 = vcmp.lt.s32.totalorder %v7889_v29, 16  ;;  %v4826_v29 = vld [vmem:[%s5613_s6 + $0xf2] sm:$0xff] }
 0x118   : > { %v6894_v35 = vadd.f32 %v5090_v5, %v1446_v0  ;;  %v1438_v50 = vadd.f32 %v1437_v38, %v6772_v32  ;;  %v5091_v26 = vpop.f32.mrf.mxu0  ;;  %v4825_v5 = vld [vmem:[%s5613_s6 + $0xea] sm:$0xff]  ;;  %v3669_v0 = vsel %vm7890_vm0, %v4823_v13, 0.0 }
 0x119   : > { %v5057_v58 = vpop.f32.mrf.mxu1  ;;  %v3671_v38 = vsel %vm7892_vm14, %v4825_v5, 0.0  ;;  %v4827_v5 = vld [vmem:[%s5613_s6 + $0xfa] sm:$0xff] }
 0x11a   : > { %v6897_v63 = vadd.f32 %v1925_v27, %v1438_v50  ;;  %v1449_v18 = vadd.f32 %v5057_v58, %v6784_v11  ;;  %v1928_v15 = vpop.f32.mrf.mxu0  ;;  %v4822_v11 = vld [vmem:[%s5613_s6 + $0xd2] sm:$0xff]  ;;  %v4776_v50 = vld [vmem:[%s5613_s6 + $0xe9] sm:$0xff] }
 0x11b   : > { %v1440_v1 = vpop.f32.mrf.mxu1 }
 0x11c   : > { %v6902_v42 = vadd.f32 %v5091_v26, %v1449_v18  ;;  %v1441_v32 = vadd.f32 %v1440_v1, %v6789_v16  ;;  %v5094_v40 = vpop.f32.mrf.mxu0  ;;  %5297 = vmatmul.mubr.msk.bf16.gmra.mxu0 %vm1090_vm1, %v3687_v25  ;;  %v4773_v16 = vld [vmem:[%s5613_s6 + $0xd1] sm:$0xff]  ;;  %v3690_v18 = vpack.c.bf16 %v3671_v38, %v4824_v9  ;;  %v3362_v1 = vpack.c.bf16 %v4776_v50, %v4775_v4 }
 0x11d   : > { %v5060_v47 = vpop.f32.mrf.mxu1  ;;  %5263 = vmatmul.mubr.msk.bf16.gmra.mxu1 %vm1090_vm1, %v3359_v6  ;;  %5300 = vmatprep.mubr.msk.bf16.mxu0 %vm1090_vm1, %v3688_v14  ;;  %v3689_v6 = vpack.c.bf16 %v3669_v0, %v4822_v11  ;;  %v3361_v14 = vpack.c.bf16 %v4774_v36, %v4773_v16  ;;  %v4778_v36 = vld [vmem:[%s5613_s6 + $0xf9] sm:$0xff]  ;;  %v3675_v9 = vsel %vm7895_vm10, %v6716_v19, 0.0 }
 0x11e   : > { %v6911_v27 = vadd.f32 %v1928_v15, %v1441_v32  ;;  %v1462_v7 = vadd.f32 %v5060_v47, %v6654_v2  ;;  %v1941_v33 = vpop.f32.mrf.mxu0  ;;  %5266 = vmatprep.mubr.msk.bf16.mxu1 %vm1090_vm1, %v3360_v23 }
 0x11f   : > { %v1453_v62 = vpop.f32.mrf.mxu1 }
 0x120   : > { %v6922_v26 = vadd.f32 %v5094_v40, %v1462_v7  ;;  %v1454_v25 = vadd.f32 %v1453_v62, %v6670_v56  ;;  %v5095_v58 = vpop.f32.mrf.mxu0 }
 0x121   : > { %v5061_v2 = vpop.f32.mrf.mxu1 }
 0x122   : > { %v6925_v15 = vadd.f32 %v1941_v33, %v1454_v25  ;;  %v1465_v23 = vadd.f32 %v5061_v2, %v6674_v61  ;;  %v1944_v13 = vpop.f32.mrf.mxu0  ;;  %v7893_v61 = vld [vmem:[#allocation51_spill] sm:$0xff] }
 0x123   : > { %v1456_v32 = vpop.f32.mrf.mxu1  ;;  %vm7894_vm6 = vcmp.lt.s32.totalorder %v7893_v61, 16 }
 0x124   : > { %v6929_v40 = vadd.f32 %v5095_v58, %v1465_v23  ;;  %v1457_v56 = vadd.f32 %v1456_v32, %v6678_v20  ;;  %v5098_v47 = vpop.f32.mrf.mxu0  ;;  %5301 = vmatmul.mubr.msk.bf16.gmra.mxu0 %vm1090_vm1, %v3689_v6  ;;  %v3673_v0 = vsel %vm7894_vm6, %v4827_v5, 0.0  ;;  %v4777_v20 = vld [vmem:[%s5613_s6 + $0xf1] sm:$0xff]  ;;  %v3692_v58 = vpack.c.bf16 %v3675_v9, %v6742_v3 }
 0x125   : > { %v5064_v11 = vpop.f32.mrf.mxu1  ;;  %5267 = vmatmul.mubr.msk.bf16.gmra.mxu1 %vm1090_vm1, %v3361_v14  ;;  %5304 = vmatprep.mubr.msk.bf16.mxu0 %vm1090_vm1, %v3690_v18  ;;  %v3691_v50 = vpack.c.bf16 %v3673_v0, %v4826_v29  ;;  %v4830_v3 = vld [vmem:[%s5613_s6 + $0x112] sm:$0xff] }
 0x126   : > { %v6938_v7 = vadd.f32 %v1944_v13, %v1457_v56  ;;  %v1478_v33 = vadd.f32 %v5064_v11, %v6686_v54  ;;  %v1957_v16 = vpop.f32.mrf.mxu0  ;;  %5270 = vmatprep.mubr.msk.bf16.mxu1 %vm1090_vm1, %v3362_v1  ;;  %v3363_v54 = vpack.c.bf16 %v4778_v36, %v4777_v20  ;;  %v4782_v56 = vld [vmem:[%s5613_s6 + $0x119] sm:$0xff] }
 0x127   : > { %v1469_v22 = vpop.f32.mrf.mxu1 }
 0x128   : > { %v6947_v38 = vadd.f32 %v5098_v47, %v1478_v33  ;;  %v1470_v62 = vadd.f32 %v1469_v22, %v6704_v31  ;;  %v5099_v4 = vpop.f32.mrf.mxu0 }
 0x129   : > { %v5065_v25 = vpop.f32.mrf.mxu1 }
 0x12a   : > { %v6951_v6 = vadd.f32 %v1957_v16, %v1470_v62  ;;  %v1481_v2 = vadd.f32 %v5065_v25, %v6708_v60  ;;  %v1960_v14 = vpop.f32.mrf.mxu0  ;;  %v3677_v60 = vsel %vm1645_vm3, %v4831_v30, 0.0 }
 0x12b   : > { %v1472_v19 = vpop.f32.mrf.mxu1  ;;  %v3693_v0 = vpack.c.bf16 %v3677_v60, %v4830_v3 }
 0x12c   : > { %v6955_v18 = vadd.f32 %v5099_v4, %v1481_v2  ;;  %v1473_v31 = vadd.f32 %v1472_v19, %v6713_v51  ;;  %v5102_v23 = vpop.f32.mrf.mxu0  ;;  %5305 = vmatmul.mubr.msk.bf16.gmra.mxu0 %vm1090_vm1, %v3691_v50  ;;  %v4781_v51 = vld [vmem:[%s5613_s6 + $0x111] sm:$0xff] }
 0x12d   : > { %v5068_v13 = vpop.f32.mrf.mxu1  ;;  %5271 = vmatmul.mubr.msk.bf16.gmra.mxu1 %vm1090_vm1, %v3363_v54  ;;  %5308 = vmatprep.mubr.msk.bf16.mxu0 %vm1090_vm1, %v3692_v58  ;;  %v3365_v39 = vpack.c.bf16 %v4782_v56, %v4781_v51 }
 0x12e   : > { %v6964_v1 = vadd.f32 %v1960_v14, %v1473_v31  ;;  %v1494_v5 = vadd.f32 %v5068_v13, %v6725_v53  ;;  %v1973_v32 = vpop.f32.mrf.mxu0  ;;  %5274 = vmatprep.mubr.msk.bf16.mxu1 %vm1090_vm1, %v6567_v52 }
 0x12f   : > { %v1485_v47 = vpop.f32.mrf.mxu1 }
 0x130   : > { %v6971_v11 = vadd.f32 %v5102_v23, %v1494_v5  ;;  %v1486_v29 = vadd.f32 %v1485_v47, %v6750_v57  ;;  %v5103_v61 = vpop.f32.mrf.mxu0 }
 0x131   : > { %v5069_v33 = vpop.f32.mrf.mxu1 }
 0x132   : > { %v6974_v16 = vadd.f32 %v1973_v32, %v1486_v29  ;;  %v1497_v20 = vadd.f32 %v5069_v33, %v6756_v49  ;;  %v1976_v53 = vpop.f32.mrf.mxu0 }
 0x133   : > { %v1488_v36 = vpop.f32.mrf.mxu1 }
 0x134   : > { %v6977_v9 = vadd.f32 %v5103_v61, %v1497_v20  ;;  %v1489_v52 = vadd.f32 %v1488_v36, %v6761_v10  ;;  %v5106_v22 = vpop.f32.mrf.mxu0  ;;  %5309 = vmatmul.mubr.msk.bf16.gmra.mxu0 %vm1090_vm1, %v3693_v0 }
 0x135   : > { %v5072_v62 = vpop.f32.mrf.mxu1  ;;  %5275 = vmatmul.mubr.msk.bf16.gmra.mxu1 %vm1090_vm1, %v3365_v39 }
 0x136   : > { %v6982_v57 = vadd.f32 %v1976_v53, %v1489_v52  ;;  %v1510_v4 = vadd.f32 %v5072_v62, %v6767_v21  ;;  %v1989_v50 = vpop.f32.mrf.mxu0 }
 0x137   : > { %v1501_v25 = vpop.f32.mrf.mxu1 }
 0x138   : > { %v6985_v54 = vadd.f32 %v5106_v22, %v1510_v4  ;;  %v1502_v49 = vadd.f32 %v1501_v25, %v6780_v46  ;;  %v5107_v58 = vpop.f32.mrf.mxu0 }
 0x139   : > { %v5073_v2 = vpop.f32.mrf.mxu1 }
 0x13a   : > { %v6988_v14 = vadd.f32 %v1989_v50, %v1502_v49  ;;  %v1513_v10 = vadd.f32 %v5073_v2, %v6787_v37  ;;  %v1992_v30 = vpop.f32.mrf.mxu0 }
 0x13b   : > { %v1504_v19 = vpop.f32.mrf.mxu1 }
 0x13c   : > { %v6991_v31 = vadd.f32 %v5107_v58, %v1513_v10  ;;  %v1505_v23 = vadd.f32 %v1504_v19, %v6792_v43  ;;  %v5146_v13 = vpop.f32.mrf.mxu0 }
 0x13d   : > { %v5112_v21 = vpop.f32.mrf.mxu1 }
 0x13e   : > { %v6994_v3 = vadd.f32 %v1992_v30, %v1505_v23  ;;  %v2334_v60 = vadd.f32 %v5112_v21, %v6810_v8  ;;  %v2501_v5 = vpop.f32.mrf.mxu0 }
 0x13f   : > { %v2205_v46 = vpop.f32.mrf.mxu1 }
 0x140   : > { %v6997_v32 = vadd.f32 %v5146_v13, %v2334_v60  ;;  %v2332_v51 = vadd.f32 %v2205_v46, %v6813_v41  ;;  %v5147_v56 = vpop.f32.mrf.mxu0 }
 0x141   : > { %v5113_v37 = vpop.f32.mrf.mxu1 }
 0x142   : > { %v7000_v47 = vadd.f32 %v2501_v5, %v2332_v51  ;;  %v2335_v29 = vadd.f32 %v5113_v37, %v6818_v12  ;;  %v2504_v61 = vpop.f32.mrf.mxu0 }
 0x143   : > { %v2208_v43 = vpop.f32.mrf.mxu1 }
 0x144   : > { %v7003_v0 = vadd.f32 %v5147_v56, %v2335_v29  ;;  %v2333_v33 = vadd.f32 %v2208_v43, %v6827_v24  ;;  %v5150_v39 = vpop.f32.mrf.mxu0 }
 0x145   : > { %v5116_v8 = vpop.f32.mrf.mxu1 }
 0x146   : > { %v7006_v20 = vadd.f32 %v2504_v61, %v2333_v33  ;;  %v2338_v53 = vadd.f32 %v5116_v8, %v6838_v44  ;;  %v2517_v36 = vpop.f32.mrf.mxu0 }
 0x147   : > { %v2221_v41 = vpop.f32.mrf.mxu1 }
 0x148   : > { %v7009_v52 = vadd.f32 %v5150_v39, %v2338_v53  ;;  %v2336_v22 = vadd.f32 %v2221_v41, %v6841_v17  ;;  %v5151_v62 = vpop.f32.mrf.mxu0 }
 0x149   : > { %v5117_v12 = vpop.f32.mrf.mxu1 }
 0x14a   : > { %v7012_v4 = vadd.f32 %v2517_v36, %v2336_v22  ;;  %v2339_v50 = vadd.f32 %v5117_v12, %v6846_v55  ;;  %v2520_v25 = vpop.f32.mrf.mxu0 }
 0x14b   : > { %v2224_v24 = vpop.f32.mrf.mxu1 }
 0x14c   : > { %v7015_v49 = vadd.f32 %v5151_v62, %v2339_v50  ;;  %v2337_v58 = vadd.f32 %v2224_v24, %v6855_v34  ;;  %v5154_v2 = vpop.f32.mrf.mxu0 }
 0x14d   : > { %v5120_v44 = vpop.f32.mrf.mxu1 }
 0x14e   : > { %v7018_v10 = vadd.f32 %v2520_v25, %v2337_v58  ;;  %v2342_v30 = vadd.f32 %v5120_v44, %v6866_v59  ;;  %v2533_v19 = vpop.f32.mrf.mxu0 }
 0x14f   : > { %v2237_v17 = vpop.f32.mrf.mxu1 }
 0x150   : > { %v7021_v23 = vadd.f32 %v5154_v2, %v2342_v30  ;;  %v2340_v13 = vadd.f32 %v2237_v17, %v6869_v28  ;;  %v5155_v21 = vpop.f32.mrf.mxu0 }
 0x151   : > { %v5121_v55 = vpop.f32.mrf.mxu1 }
 0x152   : > { %v7024_v60 = vadd.f32 %v2533_v19, %v2340_v13  ;;  %v2343_v5 = vadd.f32 %v5121_v55, %v6874_v48  ;;  %v2536_v46 = vpop.f32.mrf.mxu0 }
 0x153   : > { %v2240_v34 = vpop.f32.mrf.mxu1 }
 0x154   : > { %v7027_v51 = vadd.f32 %v5155_v21, %v2343_v5  ;;  %v2341_v56 = vadd.f32 %v2240_v34, %v6883_v45  ;;  %v5158_v37 = vpop.f32.mrf.mxu0 }
 0x155   : > { %v5124_v59 = vpop.f32.mrf.mxu1 }
 0x156   : > { %v7030_v29 = vadd.f32 %v2536_v46, %v2341_v56  ;;  %v2346_v61 = vadd.f32 %v5124_v59, %v6894_v35  ;;  %v2549_v43 = vpop.f32.mrf.mxu0 }
 0x157   : > { %v2253_v28 = vpop.f32.mrf.mxu1 }
 0x158   : > { %7896 = vst [vmem:[#allocation21_spill] sm:$0xff] %v7030_v29  ;;  %v7033_v33 = vadd.f32 %v5158_v37, %v2346_v61  ;;  %v2344_v39 = vadd.f32 %v2253_v28, %v6897_v63  ;;  %v5159_v8 = vpop.f32.mrf.mxu0 }
 0x159   : > { %v5125_v48 = vpop.f32.mrf.mxu1 }
 0x15a   : > { %7897 = vst [vmem:[#allocation26_spill] sm:$0xff] %v7033_v33  ;;  %v7036_v53 = vadd.f32 %v2549_v43, %v2344_v39  ;;  %v2347_v36 = vadd.f32 %v5125_v48, %v6902_v42  ;;  %v2552_v41 = vpop.f32.mrf.mxu0 }
 0x15b   : > { %v2256_v45 = vpop.f32.mrf.mxu1 }
 0x15c   : > { %7898 = vst [vmem:[#allocation3_spill] sm:$0xff] %v7036_v53  ;;  %v7039_v22 = vadd.f32 %v5159_v8, %v2347_v36  ;;  %v2345_v62 = vadd.f32 %v2256_v45, %v6911_v27  ;;  %v5162_v12 = vpop.f32.mrf.mxu0 }
 0x15d   : > { %v5128_v35 = vpop.f32.mrf.mxu1 }
 0x15e   : > { %7899 = vst [vmem:[#allocation33_spill] sm:$0xff] %v7039_v22  ;;  %v7042_v50 = vadd.f32 %v2552_v41, %v2345_v62  ;;  %v2350_v25 = vadd.f32 %v5128_v35, %v6922_v26  ;;  %v2565_v24 = vpop.f32.mrf.mxu0 }
 0x15f   : > { %v2269_v63 = vpop.f32.mrf.mxu1 }
 0x160   : > { %v7045_v58 = vadd.f32 %v5162_v12, %v2350_v25  ;;  %v2348_v2 = vadd.f32 %v2269_v63, %v6925_v15  ;;  %v5163_v44 = vpop.f32.mrf.mxu0 }
 0x161   : > { %v5129_v42 = vpop.f32.mrf.mxu1 }
 0x162   : > { %v7048_v30 = vadd.f32 %v2565_v24, %v2348_v2  ;;  %v2351_v19 = vadd.f32 %v5129_v42, %v6929_v40  ;;  %v2568_v17 = vpop.f32.mrf.mxu0 }
 0x163   : > { %v2272_v27 = vpop.f32.mrf.mxu1 }
 0x164   : > { %v7051_v13 = vadd.f32 %v5163_v44, %v2351_v19  ;;  %v2349_v21 = vadd.f32 %v2272_v27, %v6938_v7  ;;  %v5166_v55 = vpop.f32.mrf.mxu0 }
 0x165   : > { %v5132_v26 = vpop.f32.mrf.mxu1 }
 0x166   : > { %v7054_v5 = vadd.f32 %v2568_v17, %v2349_v21  ;;  %v2354_v46 = vadd.f32 %v5132_v26, %v6947_v38  ;;  %v2581_v34 = vpop.f32.mrf.mxu0 }
 0x167   : > { %v2285_v15 = vpop.f32.mrf.mxu1 }
 0x168   : > { %v7057_v56 = vadd.f32 %v5166_v55, %v2354_v46  ;;  %v2352_v37 = vadd.f32 %v2285_v15, %v6951_v6  ;;  %v5167_v59 = vpop.f32.mrf.mxu0 }
 0x169   : > { %v5133_v40 = vpop.f32.mrf.mxu1 }
 0x16a   : > { %v7060_v61 = vadd.f32 %v2581_v34, %v2352_v37  ;;  %v2355_v43 = vadd.f32 %v5133_v40, %v6955_v18  ;;  %v2584_v28 = vpop.f32.mrf.mxu0 }
 0x16b   : > { %v2288_v7 = vpop.f32.mrf.mxu1 }
 0x16c   : > { %v7063_v39 = vadd.f32 %v5167_v59, %v2355_v43  ;;  %v2353_v8 = vadd.f32 %v2288_v7, %v6964_v1  ;;  %v5170_v48 = vpop.f32.mrf.mxu0 }
 0x16d   : > { %v5136_v38 = vpop.f32.mrf.mxu1 }
 0x16e   : > { %v7066_v36 = vadd.f32 %v2584_v28, %v2353_v8  ;;  %v2358_v41 = vadd.f32 %v5136_v38, %v6971_v11  ;;  %v2597_v45 = vpop.f32.mrf.mxu0 }
 0x16f   : > { %v2301_v6 = vpop.f32.mrf.mxu1 }
 0x170   : > { %v7069_v62 = vadd.f32 %v5170_v48, %v2358_v41  ;;  %v2356_v12 = vadd.f32 %v2301_v6, %v6974_v16  ;;  %v5171_v35 = vpop.f32.mrf.mxu0 }
 0x171   : > { %v5137_v18 = vpop.f32.mrf.mxu1 }
 0x172   : > { %v7072_v25 = vadd.f32 %v2597_v45, %v2356_v12  ;;  %v2359_v24 = vadd.f32 %v5137_v18, %v6977_v9  ;;  %v2600_v63 = vpop.f32.mrf.mxu0 }
 0x173   : > { %v2304_v1 = vpop.f32.mrf.mxu1 }
 0x174   : > { %v7075_v2 = vadd.f32 %v5171_v35, %v2359_v24  ;;  %v2357_v44 = vadd.f32 %v2304_v1, %v6982_v57  ;;  %v5174_v42 = vpop.f32.mrf.mxu0 }
 0x175   : > { %v5140_v11 = vpop.f32.mrf.mxu1 }
 0x176   : > { %v7078_v19 = vadd.f32 %v2600_v63, %v2357_v44  ;;  %v2362_v17 = vadd.f32 %v5140_v11, %v6985_v54  ;;  %v2613_v27 = vpop.f32.mrf.mxu0 }
 0x177   : > { %v2317_v16 = vpop.f32.mrf.mxu1 }
 0x178   : > { %v7081_v21 = vadd.f32 %v5174_v42, %v2362_v17  ;;  %v2360_v55 = vadd.f32 %v2317_v16, %v6988_v14  ;;  %v5175_v26 = vpop.f32.mrf.mxu0 }
 0x179   : > { %v5141_v9 = vpop.f32.mrf.mxu1 }
 0x17a   : > { %v7084_v46 = vadd.f32 %v2613_v27, %v2360_v55  ;;  %v2363_v34 = vadd.f32 %v5141_v9, %v6991_v31  ;;  %v2616_v15 = vpop.f32.mrf.mxu0 }
 0x17b   : > { %v2320_v57 = vpop.f32.mrf.mxu1 }
 0x17c   : > { %v7087_v37 = vadd.f32 %v5175_v26, %v2363_v34  ;;  %v2361_v59 = vadd.f32 %v2320_v57, %v6994_v3  ;;  %v7090_v40 = vpop.f32.mrf.mxu0 }
 0x17d   : > { %v7092_v54 = vpop.f32.mrf.mxu1 }
 0x17e   : > { %v7094_v43 = vadd.f32 %v2616_v15, %v2361_v59  ;;  %v7096_v28 = vpop.f32.mrf.mxu0 }
 0x17f   : > { %v7098_v14 = vpop.f32.mrf.mxu1 }
 0x180   : > { %v7100_v7 = vpop.f32.mrf.mxu0 }
 0x181   : > { %v7102_v8 = vpop.f32.mrf.mxu1 }
 0x182   : > { %v7104_v31 = vpop.f32.mrf.mxu0 }
 0x183   : > { %v7106_v48 = vpop.f32.mrf.mxu1 }
 0x184   : > { %v7108_v38 = vpop.f32.mrf.mxu0 }
 0x185   : > { %v7110_v3 = vpop.f32.mrf.mxu1 }
 0x186   : > { %v7112_v41 = vpop.f32.mrf.mxu0 }
 0x187   : > { %v7114_v45 = vpop.f32.mrf.mxu1 }
 0x188   : > { %v7116_v6 = vpop.f32.mrf.mxu0 }
 0x189   : > { %v7118_v12 = vpop.f32.mrf.mxu1 }
 0x18a   : > { %v7120_v35 = vpop.f32.mrf.mxu0 }
 0x18b   : > { %v7122_v18 = vpop.f32.mrf.mxu1 }
 0x18c   : > { %v7124_v24 = vpop.f32.mrf.mxu0 }
 0x18d   : > { %v7126_v63 = vpop.f32.mrf.mxu1 }
 0x18e   : > { %v7128_v1 = vpop.f32.mrf.mxu0 }
 0x18f   : > { %7900 = vst [vmem:[#allocation31_spill] sm:$0xff] %v7128_v1  ;;  %v7130_v44 = vpop.f32.mrf.mxu1 }
 0x190   : > { %v7132_v42 = vpop.f32.mrf.mxu0 }
 0x191   : > { %7901 = vst [vmem:[#allocation5_spill] sm:$0xff] %v7132_v42  ;;  %v7134_v11 = vpop.f32.mrf.mxu1 }
 0x192   : > { %v7136_v17 = vpop.f32.mrf.mxu0 }
 0x193   : > { %7902 = vst [vmem:[#allocation7_spill] sm:$0xff] %v7136_v17  ;;  %v7138_v27 = vpop.f32.mrf.mxu1 }
 0x194   : > { %7903 = vst [vmem:[#allocation9_spill] sm:$0xff] %v7138_v27  ;;  %v7140_v16 = vpop.f32.mrf.mxu0 }
 0x195   : > { %7904 = vst [vmem:[#allocation13_spill] sm:$0xff] %v7140_v16  ;;  %v7142_v55 = vpop.f32.mrf.mxu1 }
 0x196   : > { %7905 = vst [vmem:[#allocation15_spill] sm:$0xff] %v7142_v55  ;;  %v7144_v26 = vpop.f32.mrf.mxu0 }
 0x197   : > { %7906 = vst [vmem:[#allocation17_spill] sm:$0xff] %v7144_v26  ;;  %v7146_v9 = vpop.f32.mrf.mxu1 }
 0x198   : > { %7907 = vst [vmem:[#allocation2_spill] sm:$0xff] %v7146_v9  ;;  %v7148_v34 = vpop.f32.mrf.mxu0 }
 0x199   : > { %7908 = vst [vmem:[#allocation4_spill] sm:$0xff] %v7148_v34  ;;  %v7150_v15 = vpop.f32.mrf.mxu1 }
 0x19a   : > { %7909 = vst [vmem:[#allocation6_spill] sm:$0xff] %v7150_v15  ;;  %v3208_v57 = vpop.f32.mrf.mxu0 }
 0x19b   : > { %v2880_v59 = vpop.f32.mrf.mxu1 }
 0x19c   : > { %v2969_v22 = vadd.f32 %v2880_v59, %v7042_v50  ;;  %v5230_v53 = vpop.f32.mrf.mxu0 }
 0x19d   : > { %v5196_v17 = vpop.f32.mrf.mxu1 }
 0x19e   : > { %v7153_v33 = vadd.f32 %v3208_v57, %v2969_v22  ;;  %v2974_v16 = vadd.f32 %v5196_v17, %v7045_v58  ;;  %v3221_v27 = vpop.f32.mrf.mxu0 }
 0x19f   : > { %v2893_v55 = vpop.f32.mrf.mxu1 }
 0x1a0   : > { %v7156_v29 = vadd.f32 %v5230_v53, %v2974_v16  ;;  %v2972_v26 = vadd.f32 %v2893_v55, %v7048_v30  ;;  %v5231_v9 = vpop.f32.mrf.mxu0 }
 0x1a1   : > { %v5197_v34 = vpop.f32.mrf.mxu1 }
 0x1a2   : > { %v7159_v42 = vadd.f32 %v3221_v27, %v2972_v26  ;;  %v2975_v15 = vadd.f32 %v5197_v34, %v7051_v13  ;;  %v3224_v1 = vpop.f32.mrf.mxu0 }
 0x1a3   : > { %v2896_v50 = vpop.f32.mrf.mxu1 }
 0x1a4   : > { %v7162_v59 = vadd.f32 %v5231_v9, %v2975_v15  ;;  %v2973_v22 = vadd.f32 %v2896_v50, %v7054_v5  ;;  %v5234_v57 = vpop.f32.mrf.mxu0 }
 0x1a5   : > { %v5200_v58 = vpop.f32.mrf.mxu1 }
 0x1a6   : > { %v7165_v17 = vadd.f32 %v3224_v1, %v2973_v22  ;;  %v2978_v53 = vadd.f32 %v5200_v58, %v7057_v56  ;;  %v3237_v16 = vpop.f32.mrf.mxu0 }
 0x1a7   : > { %v2909_v30 = vpop.f32.mrf.mxu1 }
 0x1a8   : > { %v7168_v55 = vadd.f32 %v5234_v57, %v2978_v53  ;;  %v2976_v27 = vadd.f32 %v2909_v30, %v7060_v61  ;;  %v5235_v26 = vpop.f32.mrf.mxu0 }
 0x1a9   : > { %v5201_v13 = vpop.f32.mrf.mxu1 }
 0x1aa   : > { %v7171_v34 = vadd.f32 %v3237_v16, %v2976_v27  ;;  %v2979_v9 = vadd.f32 %v5201_v13, %v7063_v39  ;;  %v3240_v15 = vpop.f32.mrf.mxu0 }
 0x1ab   : > { %v2912_v5 = vpop.f32.mrf.mxu1 }
 0x1ac   : > { %v7174_v50 = vadd.f32 %v5235_v26, %v2979_v9  ;;  %v2977_v1 = vadd.f32 %v2912_v5, %v7066_v36  ;;  %v5238_v22 = vpop.f32.mrf.mxu0 }
 0x1ad   : > { %v5204_v56 = vpop.f32.mrf.mxu1 }
 0x1ae   : > { %v7177_v58 = vadd.f32 %v3240_v15, %v2977_v1  ;;  %v2982_v57 = vadd.f32 %v5204_v56, %v7069_v62  ;;  %v3253_v53 = vpop.f32.mrf.mxu0 }
 0x1af   : > { %v2925_v61 = vpop.f32.mrf.mxu1 }
 0x1b0   : > { %v7180_v30 = vadd.f32 %v5238_v22, %v2982_v57  ;;  %v2980_v16 = vadd.f32 %v2925_v61, %v7072_v25  ;;  %v5239_v27 = vpop.f32.mrf.mxu0 }
 0x1b1   : > { %v5205_v39 = vpop.f32.mrf.mxu1 }
 0x1b2   : > { %v7183_v13 = vadd.f32 %v3253_v53, %v2980_v16  ;;  %v2983_v26 = vadd.f32 %v5205_v39, %v7075_v2  ;;  %v3256_v9 = vpop.f32.mrf.mxu0  ;;  %v2958_v53 = vadd.f32 %v7092_v54, %v6997_v32  ;;  %v2959_v32 = vadd.f32 %v7102_v8, %v7003_v0 }
 0x1b3   : > { %v2928_v36 = vpop.f32.mrf.mxu1 }
 0x1b4   : > { %v7186_v5 = vadd.f32 %v5239_v27, %v2983_v26  ;;  %v2981_v15 = vadd.f32 %v2928_v36, %v7078_v19  ;;  %v5242_v1 = vpop.f32.mrf.mxu0  ;;  %v2956_v19 = vadd.f32 %v7098_v14, %v7000_v47  ;;  %v3286_v36 = vadd.f32 %v7090_v40, %v2958_v53  ;;  %v7230_v53 = vld [vmem:[%s327_s12] ss:$0 sm:$0xff] }
 0x1b5   : > { %v5208_v62 = vpop.f32.mrf.mxu1 }
 0x1b6   : > { %v7189_v56 = vadd.f32 %v3256_v9, %v2981_v15  ;;  %v2986_v22 = vadd.f32 %v5208_v62, %v7081_v21  ;;  %v3269_v57 = vpop.f32.mrf.mxu0  ;;  %v3284_v15 = vadd.f32 %v7096_v28, %v2956_v19  ;;  %v3287_v62 = vadd.f32 %v7100_v7, %v2959_v32 }
 0x1b7   : > { %v2941_v25 = vpop.f32.mrf.mxu1  ;;  %v2962_v28 = vadd.f32 %v7110_v3, %v7009_v52  ;;  %v2966_v52 = vadd.f32 %v7126_v63, %v7021_v23  ;;  %v2967_v23 = vadd.f32 %v7134_v11, %v7027_v51 }
 0x1b8   : > { %v7194_v61 = vadd.f32 %v5242_v1, %v2986_v22  ;;  %v2984_v2 = vadd.f32 %v2941_v25, %v7084_v46  ;;  %v5243_v16 = vpop.f32.mrf.mxu0 }
 0x1b9   : > { %v5209_v27 = vpop.f32.mrf.mxu1 }
 0x1ba   : > { %v7199_v39 = vadd.f32 %v3269_v57, %v2984_v2  ;;  %v2987_v21 = vadd.f32 %v5209_v27, %v7087_v37  ;;  %v3272_v26 = vpop.f32.mrf.mxu0  ;;  %v2957_v37 = vadd.f32 %v7106_v48, %v7006_v20  ;;  %v2960_v20 = vadd.f32 %v7114_v45, %v7012_v4 }
 0x1bb   : > { %v2944_v9 = vpop.f32.mrf.mxu1  ;;  %v2963_v48 = vadd.f32 %v7118_v12, %v7015_v49  ;;  %v2964_v4 = vadd.f32 %v7130_v44, %v7024_v60 }
 0x1bc   : > { %v7205_v54 = vadd.f32 %v5243_v16, %v2987_v21  ;;  %v2985_v46 = vadd.f32 %v2944_v9, %v7094_v43  ;;  %v5282_v47 = vpop.f32.mrf.mxu0  ;;  %v7221_v43 = vld [vmem:[%s321_s9] ss:$0 sm:$0xff]  ;;  %v3285_v16 = vadd.f32 %v7104_v31, %v2957_v37  ;;  %v3288_v32 = vadd.f32 %v7112_v41, %v2960_v20  ;;  %v7910_v41 = vld [vmem:[#allocation31_spill] sm:$0xff] }
 0x1bd   : > { %v5248_v14 = vpop.f32.mrf.mxu1 }
 0x1be   : > { %v7215_v1 = vadd.f32 %v3272_v26, %v2985_v46  ;;  %v3582_v40 = vadd.f32 %v5248_v14, %v3286_v36  ;;  %v3781_v0 = vpop.f32.mrf.mxu0  ;;  %v2961_v26 = vadd.f32 %v7122_v18, %v7018_v10  ;;  %v3290_v36 = vadd.f32 %v7108_v38, %v2962_v28 }
 0x1bf   : > { %v3453_v8 = vpop.f32.mrf.mxu1  ;;  %v3291_v10 = vadd.f32 %v7116_v6, %v2963_v48  ;;  %v3294_v38 = vadd.f32 %v7124_v24, %v2966_v52 }
 0x1c0   : > { %v3910_v22 = vadd.f32 %v5282_v47, %v3582_v40  ;;  %v3580_v57 = vadd.f32 %v3453_v8, %v3284_v15  ;;  %v5283_v25 = vpop.f32.mrf.mxu0  ;;  %v3289_v14 = vadd.f32 %v7120_v35, %v2961_v26  ;;  %v3292_v15 = vadd.f32 %v7910_v41, %v2964_v4 }
 0x1c1   : > { %v5249_v2 = vpop.f32.mrf.mxu1 }
 0x1c2   : > { %v3949_v27 = vmul.f32 %v7221_v43, %v3910_v22  ;;  %v3908_v7 = vadd.f32 %v3781_v0, %v3580_v57  ;;  %v3583_v19 = vadd.f32 %v5249_v2, %v3287_v62  ;;  %v3784_v21 = vpop.f32.mrf.mxu0  ;;  %v7911_v62 = vld [vmem:[#allocation5_spill] sm:$0xff] }
 0x1c3   : > { %v3456_v49 = vpop.f32.mrf.mxu1  ;;  %v3295_v22 = vadd.f32 %v7911_v62, %v2967_v23  ;;  %v7912_v57 = vld [vmem:[#allocation21_spill] sm:$0xff] }
 0x1c4   : > { %v7241_v3 = vadd.f32 %v7230_v53, %v3949_v27  ;;  %v3947_v31 = vmul.f32 %v7221_v43, %v3908_v7  ;;  %v3911_v45 = vadd.f32 %v5283_v25, %v3583_v19  ;;  %v3581_v12 = vadd.f32 %v3456_v49, %v3285_v16  ;;  %v5286_v9 = vpop.f32.mrf.mxu0  ;;  %v7913_v25 = vld [vmem:[#allocation9_spill] sm:$0xff]  ;;  %v7914_v7 = vld [vmem:[#allocation26_spill] sm:$0xff]  ;;  %v7915_v19 = vld [vmem:[#allocation15_spill] sm:$0xff] }
 0x1c5   : > { %v5252_v18 = vpop.f32.mrf.mxu1  ;;  %v2965_v35 = vadd.f32 %v7913_v25, %v7912_v57 }
 0x1c6   : > { %v4020_v60 = vsub.f32 0.0, %v7241_v3  ;;  %v7251_v63 = vadd.f32 %v7230_v53, %v3947_v31  ;;  %v3950_v44 = vmul.f32 %v7221_v43, %v3911_v45  ;;  %v3909_v46 = vadd.f32 %v3784_v21, %v3581_v12  ;;  %v3797_v47 = vpop.f32.mrf.mxu0 }
 0x1c7   : > { %v3586_v6 = vadd.f32 %v5252_v18, %v3290_v36  ;;  %v3469_v37 = vpop.f32.mrf.mxu1  ;;  %v2970_v21 = vadd.f32 %v7915_v19, %v7914_v7  ;;  %v7916_v36 = vld [vmem:[#allocation7_spill] sm:$0xff] }
 0x1c8   : > { %v4054_v40 = vmul.f32 1.442695, %v4020_v60  ;;  %v4018_v51 = vsub.f32 0.0, %v7251_v63  ;;  %v7259_v11 = vadd.f32 %v7230_v53, %v3950_v44  ;;  %v3948_v0 = vmul.f32 %v7221_v43, %v3909_v46  ;;  %v5287_v8 = vpop.f32.mrf.mxu0 }
 0x1c9   : > { %v3914_v28 = vadd.f32 %v5286_v9, %v3586_v6  ;;  %v3584_v24 = vadd.f32 %v3469_v37, %v3288_v32  ;;  %v5253_v20 = vpop.f32.mrf.mxu1  ;;  %v3293_v32 = vadd.f32 %v7916_v36, %v2965_v35  ;;  %v7917_v6 = vld [vmem:[#allocation13_spill] sm:$0xff]  ;;  %v7918_v35 = vld [vmem:[#allocation3_spill] sm:$0xff] }
 0x1ca   : > { %5367 = vpow2.f32 %v4054_v40  ;;  %v4050_v48 = vmul.f32 1.442695, %v4018_v51  ;;  %v4021_v2 = vsub.f32 0.0, %v7259_v11  ;;  %v7267_v16 = vadd.f32 %v7230_v53, %v3948_v0  ;;  %v3800_v27 = vpop.f32.mrf.mxu0 }
 0x1cb   : > { %v3953_v26 = vmul.f32 %v7221_v43, %v3914_v28  ;;  %v3912_v52 = vadd.f32 %v3797_v47, %v3584_v24  ;;  %v3587_v4 = vadd.f32 %v5253_v20, %v3291_v10  ;;  %v3472_v49 = vpop.f32.mrf.mxu1  ;;  %v3298_v37 = vadd.f32 %v7917_v6, %v2970_v21  ;;  %v7919_v28 = vld [vmem:[#allocation2_spill] sm:$0xff] }
 0x1cc   : > { %5369 = vpow2.f32 %v4050_v48  ;;  %v4056_v31 = vmul.f32 1.442695, %v4021_v2  ;;  %v4019_v45 = vsub.f32 0.0, %v7267_v16  ;;  %v3585_v12 = vadd.f32 %v3472_v49, %v3289_v14  ;;  %v5290_v9 = vpop.f32.mrf.mxu0 }
 0x1cd   : > { %v7275_v23 = vadd.f32 %v7230_v53, %v3953_v26  ;;  %v3951_v18 = vmul.f32 %v7221_v43, %v3912_v52  ;;  %v3915_v60 = vadd.f32 %v5287_v8, %v3587_v4  ;;  %v5256_v44 = vpop.f32.mrf.mxu1  ;;  %v7921_v52 = vld [vmem:[#allocation6_spill] sm:$0xff] }
 0x1ce   : > { %5371 = vpow2.f32 %v4056_v31  ;;  %v4052_v46 = vmul.f32 1.442695, %v4019_v45  ;;  %v3913_v47 = vadd.f32 %v3800_v27, %v3585_v12  ;;  %v3590_v10 = vadd.f32 %v5256_v44, %v3294_v38  ;;  %v3813_v41 = vpop.f32.mrf.mxu0  ;;  %v7922_v44 = vld [vmem:[#allocation17_spill] sm:$0xff] }
 0x1cf   : > { %v4024_v40 = vsub.f32 0.0, %v7275_v23  ;;  %v7281_v14 = vadd.f32 %v7230_v53, %v3951_v18  ;;  %v3954_v51 = vmul.f32 %v7221_v43, %v3915_v60  ;;  %v3485_v0 = vpop.f32.mrf.mxu1  ;;  %v2968_v38 = vadd.f32 %v7919_v28, %v7918_v35 }
 0x1d0   : > { %5373 = vpow2.f32 %v4052_v46  ;;  %v3952_v62 = vmul.f32 %v7221_v43, %v3913_v47  ;;  %v3918_v8 = vadd.f32 %v5290_v9, %v3590_v10  ;;  %v3588_v57 = vadd.f32 %v3485_v0, %v3292_v15  ;;  %v5291_v25 = vpop.f32.mrf.mxu0  ;;  %v7920_v15 = vld [vmem:[#allocation33_spill] sm:$0xff] }
 0x1d1   : > { %v4062_v24 = vmul.f32 1.442695, %v4024_v40  ;;  %v4022_v20 = vsub.f32 0.0, %v7281_v14  ;;  %v7289_v48 = vadd.f32 %v7230_v53, %v3954_v51  ;;  %v5257_v2 = vpop.f32.mrf.mxu1  ;;  %v2971_v4 = vadd.f32 %v7921_v52, %v7920_v15 }
 0x1d2   : > { %v7292_v27 = vadd.f32 %v7230_v53, %v3952_v62  ;;  %v3957_v7 = vmul.f32 %v7221_v43, %v3918_v8  ;;  %v3916_v19 = vadd.f32 %v3813_v41, %v3588_v57  ;;  %v3591_v21 = vadd.f32 %v5257_v2, %v3295_v22  ;;  %v3816_v26 = vpop.f32.mrf.mxu0  ;;  %v7923_v8 = vld [vmem:[#allocation4_spill] sm:$0xff] }
 0x1d3   : > { %5375 = vpow2.f32 %v4062_v24  ;;  %v4058_v49 = vmul.f32 1.442695, %v4022_v20  ;;  %v4025_v31 = vsub.f32 0.0, %v7289_v48  ;;  %v3488_v45 = vpop.f32.mrf.mxu1  ;;  %v3296_v22 = vadd.f32 %v7922_v44, %v2968_v38 }
 0x1d4   : > { %v4023_v12 = vsub.f32 0.0, %v7292_v27  ;;  %v7300_v9 = vadd.f32 %v7230_v53, %v3957_v7  ;;  %v3955_v36 = vmul.f32 %v7221_v43, %v3916_v19  ;;  %v3919_v18 = vadd.f32 %v5291_v25, %v3591_v21  ;;  %v5294_v60 = vpop.f32.mrf.mxu0 }
 0x1d5   : > { %5377 = vpow2.f32 %v4058_v49  ;;  %v4064_v46 = vmul.f32 1.442695, %v4025_v31  ;;  %v3589_v47 = vadd.f32 %v3488_v45, %v3293_v32  ;;  %v5260_v10 = vpop.f32.mrf.mxu1  ;;  %v3299_v57 = vadd.f32 %v7923_v8, %v2971_v4 }
 0x1d6   : > { %v4060_v41 = vmul.f32 1.442695, %v4023_v12  ;;  %v4028_v6 = vsub.f32 0.0, %v7300_v9  ;;  %v7306_v40 = vadd.f32 %v7230_v53, %v3955_v36  ;;  %v3958_v51 = vmul.f32 %v7221_v43, %v3919_v18  ;;  %v3829_v0 = vpop.f32.mrf.mxu0 }
 0x1d7   : > { %v5368_v62 = vpop.eup %5367  ;;  %5379 = vpow2.f32 %v4064_v46  ;;  %v3917_v25 = vadd.f32 %v3816_v26, %v3589_v47  ;;  %v3594_v35 = vadd.f32 %v5260_v10, %v3298_v37  ;;  %v3501_v28 = vpop.f32.mrf.mxu1 }
 0x1d8   : > { %v4116_v38 = vadd.f32 1.0, %v5368_v62  ;;  %5381 = vpow2.f32 %v4060_v41  ;;  %v4070_v32 = vmul.f32 1.442695, %v4028_v6  ;;  %v4026_v24 = vsub.f32 0.0, %v7306_v40  ;;  %v5295_v20 = vpop.f32.mrf.mxu0 }
 0x1d9   : > { %v5370_v2 = vpop.eup %5369  ;;  %v7312_v7 = vadd.f32 %v7230_v53, %v3958_v51  ;;  %v3956_v19 = vmul.f32 %v7221_v43, %v3917_v25  ;;  %v3922_v21 = vadd.f32 %v5294_v60, %v3594_v35  ;;  %v3592_v15 = vadd.f32 %v3501_v28, %v3296_v22  ;;  %v5261_v52 = vpop.f32.mrf.mxu1 }
 0x1da   : > { %5383 = vrcp.f32 %v4116_v38  ;;  %v4114_v4 = vadd.f32 1.0, %v5370_v2  ;;  %v4066_v26 = vmul.f32 1.442695, %v4026_v24  ;;  %v3595_v37 = vadd.f32 %v5261_v52, %v3299_v57  ;;  %v3832_v49 = vpop.f32.mrf.mxu0 }
 0x1db   : > { %v5372_v31 = vpop.eup %5371  ;;  %5385 = vpow2.f32 %v4070_v32  ;;  %v4029_v45 = vsub.f32 0.0, %v7312_v7  ;;  %v7317_v12 = vadd.f32 %v7230_v53, %v3956_v19  ;;  %v3961_v36 = vmul.f32 %v7221_v43, %v3922_v21  ;;  %v3504_v18 = vpop.f32.mrf.mxu1 }
 0x1dc   : > { %5387 = vrcp.f32 %v4114_v4  ;;  %v4117_v60 = vadd.f32 1.0, %v5372_v31  ;;  %v3920_v44 = vadd.f32 %v3829_v0, %v3592_v15  ;;  %v3923_v22 = vadd.f32 %v5295_v20, %v3595_v37  ;;  %v5298_v46 = vpop.f32.mrf.mxu0 }
 0x1dd   : > { %v5374_v47 = vpop.eup %5373  ;;  %5389 = vpow2.f32 %v4066_v26  ;;  %v4072_v10 = vmul.f32 1.442695, %v4029_v45  ;;  %v4027_v41 = vsub.f32 0.0, %v7317_v12  ;;  %v7322_v6 = vadd.f32 %v7230_v53, %v3961_v36  ;;  %v5264_v51 = vpop.f32.mrf.mxu1 }
 0x1de   : > { %5391 = vrcp.f32 %v4117_v60  ;;  %v4115_v62 = vadd.f32 1.0, %v5374_v47  ;;  %v3959_v8 = vmul.f32 %v7221_v43, %v3920_v44  ;;  %v3962_v57 = vmul.f32 %v7221_v43, %v3923_v22  ;;  %v3845_v0 = vpop.f32.mrf.mxu0 }
 0x1df   : > { %5393 = vpow2.f32 %v4072_v10  ;;  %v4068_v25 = vmul.f32 1.442695, %v4027_v41  ;;  %v4032_v35 = vsub.f32 0.0, %v7322_v6  ;;  %v3593_v28 = vadd.f32 %v3504_v18, %v7153_v33  ;;  %v3517_v38 = vpop.f32.mrf.mxu1 }
 0x1e0   : > { %v5376_v32 = vpop.eup %5375  ;;  %5395 = vrcp.f32 %v4115_v62  ;;  %v7331_v24 = vadd.f32 %v7230_v53, %v3959_v8  ;;  %v7334_v20 = vadd.f32 %v7230_v53, %v3962_v57  ;;  %v3598_v2 = vadd.f32 %v5264_v51, %v7156_v29  ;;  %v5299_v19 = vpop.f32.mrf.mxu0 }
 0x1e1   : > { %v4120_v21 = vadd.f32 1.0, %v5376_v32  ;;  %5397 = vpow2.f32 %v4068_v25  ;;  %v4078_v15 = vmul.f32 1.442695, %v4032_v35  ;;  %v3921_v52 = vadd.f32 %v3832_v49, %v3593_v28  ;;  %v5265_v33 = vpop.f32.mrf.mxu1 }
 0x1e2   : > { %v5378_v4 = vpop.eup %5377  ;;  %v4030_v26 = vsub.f32 0.0, %v7331_v24  ;;  %v4033_v37 = vsub.f32 0.0, %v7334_v20  ;;  %v3926_v31 = vadd.f32 %v5298_v46, %v3598_v2  ;;  %v3596_v45 = vadd.f32 %v3517_v38, %v7159_v42  ;;  %v3848_v36 = vpop.f32.mrf.mxu0 }
 0x1e3   : > { %5399 = vrcp.f32 %v4120_v21  ;;  %v4118_v29 = vadd.f32 1.0, %v5378_v4  ;;  %v3960_v18 = vmul.f32 %v7221_v43, %v3921_v52  ;;  %v3599_v60 = vadd.f32 %v5265_v33, %v7162_v59  ;;  %v3520_v44 = vpop.f32.mrf.mxu1 }
 0x1e4   : > { %v5380_v22 = vpop.eup %5379  ;;  %5401 = vpow2.f32 %v4078_v15  ;;  %v4074_v49 = vmul.f32 1.442695, %v4030_v26  ;;  %v4080_v47 = vmul.f32 1.442695, %v4033_v37  ;;  %v3965_v10 = vmul.f32 %v7221_v43, %v3926_v31  ;;  %v5302_v41 = vpop.f32.mrf.mxu0 }
 0x1e5   : > { %v5382_v51 = vpop.eup %5381  ;;  %5403 = vrcp.f32 %v4118_v29  ;;  %v4121_v46 = vadd.f32 1.0, %v5380_v22  ;;  %v7347_v42 = vadd.f32 %v7230_v53, %v3960_v18  ;;  %v3924_v62 = vadd.f32 %v3845_v0, %v3596_v45  ;;  %v5268_v8 = vpop.f32.mrf.mxu1 }
 0x1e6   : > { %v4119_v57 = vadd.f32 1.0, %v5382_v51  ;;  %5405 = vpow2.f32 %v4074_v49  ;;  %v7350_v59 = vadd.f32 %v7230_v53, %v3965_v10  ;;  %v3927_v25 = vadd.f32 %v5299_v19, %v3599_v60  ;;  %v7352_v35 = vpop.f32.mrf.mxu0 }
 0x1e7   : > { %v5384_v28 = vpop.eup %5383  ;;  %5407 = vrcp.f32 %v4121_v46  ;;  %v4031_v38 = vsub.f32 0.0, %v7347_v42  ;;  %v3963_v0 = vmul.f32 %v7221_v43, %v3924_v62  ;;  %v3597_v32 = vadd.f32 %v3520_v44, %v7165_v17  ;;  %v3533_v2 = vpop.f32.mrf.mxu1 }
 0x1e8   : > { %v5386_v21 = vpop.eup %5385  ;;  %v4180_v19 = vmul.f32 %v5384_v28, %v7241_v3  ;;  %5409 = vrcp.f32 %v4119_v57  ;;  %v4036_v15 = vsub.f32 0.0, %v7350_v59  ;;  %v3966_v52 = vmul.f32 %v7221_v43, %v3927_v25  ;;  %v5303_v33 = vpop.f32.mrf.mxu0 }
 0x1e9   : > { %v5388_v4 = vpop.eup %5387  ;;  %v4124_v26 = vadd.f32 1.0, %v5386_v21  ;;  %5411 = vpow2.f32 %v4080_v47  ;;  %v4076_v37 = vmul.f32 1.442695, %v4031_v38  ;;  %v7366_v31 = vadd.f32 %v7230_v53, %v3963_v0  ;;  %v5269_v45 = vpop.f32.mrf.mxu1 }
 0x1ea   : > { %v5390_v17 = vpop.eup %5389  ;;  %4212 = vst [vmem:[%s7357_s24 + $0x10] sm:$0xff] %v4180_v19  ;;  %v4178_v29 = vmul.f32 %v5388_v4, %v7251_v63  ;;  %v4086_v3 = vmul.f32 1.442695, %v4036_v15  ;;  %v7371_v18 = vadd.f32 %v7230_v53, %v3966_v52  ;;  %v3925_v60 = vadd.f32 %v3848_v36, %v3597_v32  ;;  %v3864_v44 = vpop.f32.mrf.mxu0 }
 0x1eb   : > { %v5392_v22 = vpop.eup %5391  ;;  %5413 = vrcp.f32 %v4124_v26  ;;  %v4122_v49 = vadd.f32 1.0, %v5390_v17  ;;  %v4034_v47 = vsub.f32 0.0, %v7366_v31  ;;  %v3602_v10 = vadd.f32 %v5268_v8, %v7168_v55  ;;  %v3536_v51 = vpop.f32.mrf.mxu1 }
 0x1ec   : > { %v5394_v46 = vpop.eup %5393  ;;  %4210 = vst [vmem:[%s7357_s24] sm:$0xff] %v4178_v29  ;;  %v4181_v62 = vmul.f32 %v5392_v22, %v7259_v11  ;;  %5415 = vpow2.f32 %v4076_v37  ;;  %v4037_v63 = vsub.f32 0.0, %v7371_v18  ;;  %v3964_v57 = vmul.f32 %v7221_v43, %v3925_v60  ;;  %v7379_v36 = vpop.f32.mrf.mxu0 }
 0x1ed   : > { %v5396_v25 = vpop.eup %5395  ;;  %5417 = vrcp.f32 %v4122_v49  ;;  %v4125_v28 = vadd.f32 1.0, %v5394_v46  ;;  %v4082_v38 = vmul.f32 1.442695, %v4034_v47  ;;  %v3930_v0 = vadd.f32 %v5302_v41, %v3602_v10  ;;  %v5272_v55 = vpop.f32.mrf.mxu1 }
 0x1ee   : > { %v5398_v8 = vpop.eup %5397  ;;  %4213 = vst [vmem:[%s7357_s24 + $0x18] sm:$0xff] %v4181_v62  ;;  %v4179_v32 = vmul.f32 %v5396_v25, %v7267_v16  ;;  %5419 = vpow2.f32 %v4086_v3  ;;  %v4088_v11 = vmul.f32 1.442695, %v4037_v63  ;;  %v7384_v21 = vadd.f32 %v7230_v53, %v3964_v57  ;;  %v7388_v26 = vpop.f32.mrf.mxu0 }
 0x1ef   : > { %5421 = vrcp.f32 %v4125_v28  ;;  %v4123_v19 = vadd.f32 1.0, %v5398_v8  ;;  %v3969_v15 = vmul.f32 %v7221_v43, %v3930_v0  ;;  %v3600_v52 = vadd.f32 %v3533_v2, %v7171_v34  ;;  %v3549_v4 = vpop.f32.mrf.mxu1 }
 0x1f0   : > { %v5400_v41 = vpop.eup %5399  ;;  %4211 = vst [vmem:[%s7357_s24 + $0x8] sm:$0xff] %v4179_v32  ;;  %5423 = vpow2.f32 %v4082_v38  ;;  %v4035_v16 = vsub.f32 0.0, %v7384_v21  ;;  %v3603_v37 = vadd.f32 %v5269_v45, %v7174_v50  ;;  %v3601_v17 = vadd.f32 %v3536_v51, %v7177_v58  ;;  %v5307_v51 = vpop.f32.mrf.mxu0 }
 0x1f1   : > { %v5402_v29 = vpop.eup %5401  ;;  %v4184_v3 = vmul.f32 %v5400_v41, %v7275_v23  ;;  %5425 = vrcp.f32 %v4123_v19  ;;  %v7396_v60 = vadd.f32 %v7230_v53, %v3969_v15  ;;  %v3928_v34 = vadd.f32 %v7352_v35, %v3600_v52  ;;  %v5273_v2 = vpop.f32.mrf.mxu1 }
 0x1f2   : > { %v5404_v22 = vpop.eup %5403  ;;  %v4128_v49 = vadd.f32 1.0, %v5402_v29  ;;  %5427 = vpow2.f32 %v4088_v11  ;;  %v4084_v47 = vmul.f32 1.442695, %v4035_v16  ;;  %v3931_v10 = vadd.f32 %v5303_v33, %v3603_v37  ;;  %v3880_v11 = vpop.f32.mrf.mxu0 }
 0x1f3   : > { %v5406_v46 = vpop.eup %5405  ;;  %4216 = vst [vmem:[%s7357_s24 + $0x30] sm:$0xff] %v4184_v3  ;;  %v4182_v50 = vmul.f32 %v5404_v22, %v7281_v14  ;;  %v4040_v58 = vsub.f32 0.0, %v7396_v60  ;;  %v3967_v23 = vmul.f32 %v7221_v43, %v3928_v34  ;;  %v3929_v45 = vadd.f32 %v3864_v44, %v3601_v17  ;;  %v7403_v62 = vpop.f32.mrf.mxu1 }
 0x1f4   : > { %v5408_v35 = vpop.eup %5407  ;;  %5429 = vrcp.f32 %v4128_v49  ;;  %v4126_v63 = vadd.f32 1.0, %v5406_v46  ;;  %v3970_v57 = vmul.f32 %v7221_v43, %v3931_v10  ;;  %v3606_v33 = vadd.f32 %v5272_v55, %v7180_v30 }
 0x1f5   : > { %v5410_v25 = vpop.eup %5409  ;;  %4214 = vst [vmem:[%s7357_s24 + $0x20] sm:$0xff] %v4182_v50  ;;  %v4185_v14 = vmul.f32 %v5408_v35, %v7289_v48  ;;  %5431 = vpow2.f32 %v4084_v47  ;;  %v4094_v28 = vmul.f32 1.442695, %v4040_v58  ;;  %v7410_v44 = vadd.f32 %v7230_v53, %v3967_v23  ;;  %v5276_v19 = vpop.f32.mrf.mxu1 }
 0x1f6   : > { %v5412_v38 = vpop.eup %5411  ;;  %v4183_v0 = vmul.f32 %v5410_v25, %v7292_v27  ;;  %5433 = vrcp.f32 %v4126_v63  ;;  %v7414_v8 = vadd.f32 %v7230_v53, %v3970_v57  ;;  %v3968_v32 = vmul.f32 %v7221_v43, %v3929_v45 }
 0x1f7   : > { %4217 = vst [vmem:[%s7357_s24 + $0x38] sm:$0xff] %v4185_v14  ;;  %v4129_v30 = vadd.f32 1.0, %v5412_v38  ;;  %5435 = vpow2.f32 %v4094_v28  ;;  %v4038_v48 = vsub.f32 0.0, %v7410_v44  ;;  %v3934_v55 = vadd.f32 %v7379_v36, %v3606_v33 }
 0x1f8   : > { %v5414_v15 = vpop.eup %5413  ;;  %4215 = vst [vmem:[%s7357_s24 + $0x28] sm:$0xff] %v4183_v0  ;;  %v4041_v27 = vsub.f32 0.0, %v7414_v8  ;;  %v7423_v52 = vadd.f32 %v7230_v53, %v3968_v32  ;;  %v3604_v41 = vadd.f32 %v3549_v4, %v7183_v13  ;;  %v3607_v16 = vadd.f32 %v5273_v2, %v7186_v5  ;;  %v5310_v4 = vpop.f32.mrf.mxu0 }
 0x1f9   : > { %v5416_v37 = vpop.eup %5415  ;;  %v4188_v17 = vmul.f32 %v5414_v15, %v7300_v9  ;;  %5437 = vrcp.f32 %v4129_v30  ;;  %v4090_v29 = vmul.f32 1.442695, %v4038_v48  ;;  %v3973_v36 = vmul.f32 %v7221_v43, %v3934_v55  ;;  %v3565_v2 = vpop.f32.mrf.mxu1 }
 0x1fa   : > { %v5418_v3 = vpop.eup %5417  ;;  %v4127_v34 = vadd.f32 1.0, %v5416_v37  ;;  %v4096_v22 = vmul.f32 1.442695, %v4041_v27  ;;  %v4039_v49 = vsub.f32 0.0, %v7423_v52  ;;  %v3932_v47 = vadd.f32 %v7388_v26, %v3604_v41  ;;  %v3893_v38 = vpop.f32.mrf.mxu0 }
 0x1fb   : > { %v5420_v10 = vpop.eup %5419  ;;  %4220 = vst [vmem:[%s7357_s24 + $0x50] sm:$0xff] %v4188_v17  ;;  %v4186_v13 = vmul.f32 %v5418_v3, %v7306_v40  ;;  %5439 = vpow2.f32 %v4090_v29  ;;  %v7434_v5 = vadd.f32 %v7230_v53, %v3973_v36  ;;  %v3935_v9 = vadd.f32 %v5307_v51, %v3607_v16  ;;  %v5277_v0 = vpop.f32.mrf.mxu1 }
 0x1fc   : > { %v5422_v46 = vpop.eup %5421  ;;  %5441 = vrcp.f32 %v4127_v34  ;;  %v4132_v50 = vadd.f32 1.0, %v5420_v10  ;;  %v4092_v58 = vmul.f32 1.442695, %v4039_v49  ;;  %v3971_v23 = vmul.f32 %v7221_v43, %v3932_v47  ;;  %v5311_v3 = vpop.f32.mrf.mxu0 }
 0x1fd   : > { %v5424_v45 = vpop.eup %5423  ;;  %4218 = vst [vmem:[%s7357_s24 + $0x40] sm:$0xff] %v4186_v13  ;;  %v4189_v26 = vmul.f32 %v5422_v46, %v7312_v7  ;;  %5443 = vpow2.f32 %v4096_v22  ;;  %v4044_v40 = vsub.f32 0.0, %v7434_v5  ;;  %v3974_v35 = vmul.f32 %v7221_v43, %v3935_v9  ;;  %v3568_v34 = vpop.f32.mrf.mxu1 }
 0x1fe   : > { %v5426_v63 = vpop.eup %5425  ;;  %5445 = vrcp.f32 %v4132_v50  ;;  %v4130_v51 = vadd.f32 1.0, %v5424_v45  ;;  %v7442_v57 = vadd.f32 %v7230_v53, %v3971_v23  ;;  %v3605_v33 = vadd.f32 %v7403_v62, %v7189_v56  ;;  %v3896_v46 = vpop.f32.mrf.mxu0 }
 0x1ff   : > { %v5428_v25 = vpop.eup %5427  ;;  %4221 = vst [vmem:[%s7357_s24 + $0x58] sm:$0xff] %v4189_v26  ;;  %v4187_v14 = vmul.f32 %v5426_v63, %v7317_v12  ;;  %5447 = vpow2.f32 %v4092_v58  ;;  %v4102_v7 = vmul.f32 1.442695, %v4044_v40  ;;  %v7449_v28 = vadd.f32 %v7230_v53, %v3974_v35 }
 0x200   : > { %5449 = vrcp.f32 %v4130_v51  ;;  %v4133_v32 = vadd.f32 1.0, %v5428_v25  ;;  %v4042_v30 = vsub.f32 0.0, %v7442_v57  ;;  %v3933_v48 = vadd.f32 %v3880_v11, %v3605_v33 }
 0x201   : > { %v5430_v55 = vpop.eup %5429  ;;  %4219 = vst [vmem:[%s7357_s24 + $0x48] sm:$0xff] %v4187_v14  ;;  %5451 = vpow2.f32 %v4102_v7  ;;  %v4045_v56 = vsub.f32 0.0, %v7449_v28  ;;  %v3610_v12 = vadd.f32 %v5276_v19, %v7194_v61  ;;  %v3608_v62 = vadd.f32 %v3565_v2, %v7199_v39 }
 0x202   : > { %v5432_v15 = vpop.eup %5431  ;;  %v4192_v27 = vmul.f32 %v5430_v55, %v7322_v6  ;;  %5453 = vrcp.f32 %v4133_v32  ;;  %v4098_v41 = vmul.f32 1.442695, %v4042_v30  ;;  %v3972_v16 = vmul.f32 %v7221_v43, %v3933_v48 }
 0x203   : > { %v5434_v37 = vpop.eup %5433  ;;  %v4131_v17 = vadd.f32 1.0, %v5432_v15  ;;  %v4104_v11 = vmul.f32 1.442695, %v4045_v56  ;;  %v3938_v29 = vadd.f32 %v5310_v4, %v3610_v12  ;;  %v3936_v36 = vadd.f32 %v3893_v38, %v3608_v62 }
 0x204   : > { %v5436_v22 = vpop.eup %5435  ;;  %4224 = vst [vmem:[%s7357_s24 + $0x70] sm:$0xff] %v4192_v27  ;;  %v4190_v61 = vmul.f32 %v5434_v37, %v7331_v24  ;;  %5455 = vpow2.f32 %v4098_v41  ;;  %v7461_v39 = vadd.f32 %v7230_v53, %v3972_v16  ;;  %v3611_v6 = vadd.f32 %v5277_v0, %v7205_v54 }
 0x205   : > { %5457 = vrcp.f32 %v4131_v17  ;;  %v4136_v19 = vadd.f32 1.0, %v5436_v22  ;;  %v3977_v49 = vmul.f32 %v7221_v43, %v3938_v29  ;;  %v3975_v47 = vmul.f32 %v7221_v43, %v3936_v36 }
 0x206   : > { %v5438_v10 = vpop.eup %5437  ;;  %4222 = vst [vmem:[%s7357_s24 + $0x60] sm:$0xff] %v4190_v61  ;;  %5459 = vpow2.f32 %v4104_v11  ;;  %v4043_v13 = vsub.f32 0.0, %v7461_v39  ;;  %v3939_v9 = vadd.f32 %v5311_v3, %v3611_v6  ;;  %v3609_v24 = vadd.f32 %v3568_v34, %v7215_v1 }
 0x207   : > { %v4193_v4 = vmul.f32 %v5438_v10, %v7334_v20  ;;  %5461 = vrcp.f32 %v4136_v19  ;;  %v7471_v54 = vadd.f32 %v7230_v53, %v3977_v49  ;;  %v7474_v2 = vadd.f32 %v7230_v53, %v3975_v47 }
 0x208   : > { %v5440_v50 = vpop.eup %5439  ;;  %v4100_v58 = vmul.f32 1.442695, %v4043_v13  ;;  %v3978_v23 = vmul.f32 %v7221_v43, %v3939_v9  ;;  %v3937_v45 = vadd.f32 %v3896_v46, %v3609_v24 }
 0x209   : > { %v5442_v26 = vpop.eup %5441  ;;  %4225 = vst [vmem:[%s7357_s24 + $0x78] sm:$0xff] %v4193_v4  ;;  %v4134_v40 = vadd.f32 1.0, %v5440_v50  ;;  %v4048_v1 = vsub.f32 0.0, %v7471_v54  ;;  %v4046_v20 = vsub.f32 0.0, %v7474_v2 }
 0x20a   : > { %v5444_v35 = vpop.eup %5443  ;;  %v4191_v63 = vmul.f32 %v5442_v26, %v7347_v42  ;;  %5463 = vpow2.f32 %v4100_v58  ;;  %v7482_v51 = vadd.f32 %v7230_v53, %v3978_v23  ;;  %v3976_v33 = vmul.f32 %v7221_v43, %v3937_v45 }
 0x20b   : > { %v5446_v25 = vpop.eup %5445  ;;  %5465 = vrcp.f32 %v4134_v40  ;;  %v4137_v14 = vadd.f32 1.0, %v5444_v35  ;;  %v4110_v7 = vmul.f32 1.442695, %v4048_v1  ;;  %v4106_v32 = vmul.f32 1.442695, %v4046_v20 }
 0x20c   : > { %v5448_v38 = vpop.eup %5447  ;;  %4223 = vst [vmem:[%s7357_s24 + $0x68] sm:$0xff] %v4191_v63  ;;  %v4196_v0 = vmul.f32 %v5446_v25, %v7350_v59  ;;  %v4049_v30 = vsub.f32 0.0, %v7482_v51  ;;  %v7489_v42 = vadd.f32 %v7230_v53, %v3976_v33 }
 0x20d   : > { %v5450_v48 = vpop.eup %5449  ;;  %5467 = vrcp.f32 %v4137_v14  ;;  %v4135_v55 = vadd.f32 1.0, %v5448_v38 }
 0x20e   : > { %v5452_v56 = vpop.eup %5451  ;;  %4228 = vst [vmem:[%s7357_s24 + $0x90] sm:$0xff] %v4196_v0  ;;  %v4194_v43 = vmul.f32 %v5450_v48, %v7366_v31  ;;  %5469 = vpow2.f32 %v4110_v7  ;;  %v4112_v12 = vmul.f32 1.442695, %v4049_v30  ;;  %v4047_v62 = vsub.f32 0.0, %v7489_v42 }
 0x20f   : > { %v5454_v59 = vpop.eup %5453  ;;  %5471 = vrcp.f32 %v4135_v55  ;;  %v4140_v15 = vadd.f32 1.0, %v5452_v56 }
 0x210   : > { %4226 = vst [vmem:[%s7357_s24 + $0x80] sm:$0xff] %v4194_v43  ;;  %v4197_v53 = vmul.f32 %v5454_v59, %v7371_v18  ;;  %5473 = vpow2.f32 %v4106_v32  ;;  %v4108_v27 = vmul.f32 1.442695, %v4047_v62 }
 0x211   : > { %v5456_v41 = vpop.eup %5455  ;;  %5475 = vrcp.f32 %v4140_v15 }
 0x212   : > { %v5458_v16 = vpop.eup %5457  ;;  %4229 = vst [vmem:[%s7357_s24 + $0x98] sm:$0xff] %v4197_v53  ;;  %v4138_v37 = vadd.f32 1.0, %v5456_v41  ;;  %5477 = vpow2.f32 %v4112_v12 }
 0x213   : > { %v5460_v31 = vpop.eup %5459  ;;  %v4195_v17 = vmul.f32 %v5458_v16, %v7384_v21  ;;  %5479 = vpow2.f32 %v4108_v27 }
 0x214   : > { %v5462_v11 = vpop.eup %5461  ;;  %5481 = vrcp.f32 %v4138_v37  ;;  %v4141_v29 = vadd.f32 1.0, %v5460_v31 }
 0x215   : > { %4227 = vst [vmem:[%s7357_s24 + $0x88] sm:$0xff] %v4195_v17  ;;  %v4200_v18 = vmul.f32 %v5462_v11, %v7396_v60 }
 0x216   : > { %5483 = vrcp.f32 %v4141_v29 }
 0x217   : > { %v5464_v36 = vpop.eup %5463  ;;  %4232 = vst [vmem:[%s7357_s24 + $0xb0] sm:$0xff] %v4200_v18 }
 0x218   : > { %v5466_v3 = vpop.eup %5465  ;;  %v4139_v34 = vadd.f32 1.0, %v5464_v36 }
 0x219   : > { %v4198_v22 = vmul.f32 %v5466_v3, %v7410_v44 }
 0x21a   : > { %v5468_v61 = vpop.eup %5467  ;;  %5485 = vrcp.f32 %v4139_v34 }
 0x21b   : > { %v5470_v21 = vpop.eup %5469  ;;  %4230 = vst [vmem:[%s7357_s24 + $0xa0] sm:$0xff] %v4198_v22  ;;  %v4201_v6 = vmul.f32 %v5468_v61, %v7414_v8 }
 0x21c   : > { %v5472_v19 = vpop.eup %5471  ;;  %v4144_v49 = vadd.f32 1.0, %v5470_v21 }
 0x21d   : > { %v5474_v47 = vpop.eup %5473  ;;  %4233 = vst [vmem:[%s7357_s24 + $0xb8] sm:$0xff] %v4201_v6  ;;  %v4199_v60 = vmul.f32 %v5472_v19, %v7423_v52 }
 0x21e   : > { %v5476_v10 = vpop.eup %5475  ;;  %5487 = vrcp.f32 %v4144_v49  ;;  %v4142_v13 = vadd.f32 1.0, %v5474_v47 }
 0x21f   : > { %v5478_v9 = vpop.eup %5477  ;;  %4231 = vst [vmem:[%s7357_s24 + $0xa8] sm:$0xff] %v4199_v60  ;;  %v4204_v44 = vmul.f32 %v5476_v10, %v7434_v5 }
 0x220   : > { %v5480_v24 = vpop.eup %5479  ;;  %5489 = vrcp.f32 %v4142_v13  ;;  %v4145_v8 = vadd.f32 1.0, %v5478_v9 }
 0x221   : > { %v5482_v4 = vpop.eup %5481  ;;  %4236 = vst [vmem:[%s7357_s24 + $0xd0] sm:$0xff] %v4204_v44  ;;  %v4143_v46 = vadd.f32 1.0, %v5480_v24 }
 0x222   : > { %v4202_v50 = vmul.f32 %v5482_v4, %v7442_v57  ;;  %5491 = vrcp.f32 %v4145_v8 }
 0x223   : > { %v5484_v52 = vpop.eup %5483  ;;  %5493 = vrcp.f32 %v4143_v46 }
 0x224   : > { %4234 = vst [vmem:[%s7357_s24 + $0xc0] sm:$0xff] %v4202_v50  ;;  %v4205_v58 = vmul.f32 %v5484_v52, %v7449_v28 }
 0x226   : > { %4237 = vst [vmem:[%s7357_s24 + $0xd8] sm:$0xff] %v4205_v58 }
 0x227   : > { %v5486_v5 = vpop.eup %5485 }
 0x228   : > { %v4203_v23 = vmul.f32 %v5486_v5, %v7461_v39 }
 0x22a   : > { %4235 = vst [vmem:[%s7357_s24 + $0xc8] sm:$0xff] %v4203_v23 }
 0x22b   : > { %v5488_v45 = vpop.eup %5487 }
 0x22c   : > { %v4208_v26 = vmul.f32 %v5488_v45, %v7471_v54 }
 0x22d   : > { %v5490_v40 = vpop.eup %5489 }
 0x22e   : > { %4240 = vst [vmem:[%s7357_s24 + $0xf0] sm:$0xff] %v4208_v26  ;;  %v4206_v57 = vmul.f32 %v5490_v40, %v7474_v2 }
 0x22f   : > { %v5492_v1 = vpop.eup %5491 }
 0x230   : > { %v5494_v20 = vpop.eup %5493  ;;  %4238 = vst [vmem:[%s7357_s24 + $0xe0] sm:$0xff] %v4206_v57  ;;  %v4209_v35 = vmul.f32 %v5492_v1, %v7482_v51 }
 0x231   : > { %v4207_v28 = vmul.f32 %v5494_v20, %v7489_v42 }
 0x232   : > { %4241 = vst [vmem:[%s7357_s24 + $0xf8] sm:$0xff] %v4209_v35 }
 0x233   : > { %4239 = vst [vmem:[%s7357_s24 + $0xe8] sm:$0xff] %v4207_v28 }
 0x234 PF: > { %s14_s19 = sadd.s32 1, %s5533_s19   ;;  %s7924_s15 = smov %s5525_s17 }
 0x235   : > { %p11_p7 = scmp.ge.s32.totalorder %s14_s19, 6   ;;  %s7925_s16 = smov %s5529_s18 }
 0x236   : > { %s7926_s17 = smov %s7929_s20  ;;  %s7927_s18 = smov %s7933_s21 }
 0x237   :  { %13 = sbr.rel (!%p11_p7) target bundleno = 3 (0x3), region = 92 }

</bundles_post_ra>
